<compile_context>
chip_gen: v7x
topology: tpu7x:2x2x1
jax: 0.10.0
libtpu: 0.0.40
codegen_flags: <defaults>
</compile_context>

<pallas_src>
import functools
import string

import numpy as np
import jax
import jax.numpy as jnp
from jax.experimental import pallas as pl
from jax.experimental.pallas import tpu as pltpu

MAX_LEN = 15


# ------------------------- host-side vocab / tokenization (glue) -------------
def build_vocab():
    token2id = {sym: i for i, sym in enumerate(list(string.printable), start=2)}
    token2id['<pad>'] = 0
    token2id['<unk>'] = 1
    return token2id


def make_vectors(sent, token2id):
    ids = []
    for word in sent:
        w = [token2id.get(sym, 1) for sym in word[:MAX_LEN]]
        w = w + [0] * (MAX_LEN - len(w))
        ids.append(w)
    return jnp.asarray(ids, dtype=jnp.int32)


# ---------------- fused Pallas kernel: conv-as-matmul + max-pool + bias + ReLU ---
def _elmo_char_cnn_kernel(x_ref, w_ref, b_ref, out_ref, *,
                          kernel_sizes, n_filters, seq_len, n_pos):
    # x: (bn, L*E) bf16 | w: (L*E, n_pos*128) bf16 | b: (1, 128) f32 | out: (bn, 128) f32
    x = x_ref[...]
    w = w_ref[...]

    # ONE lane-dense 2-D matmul covering every (conv, position, filter) column.
    # Column layout: col = p*128 + c*n_filters + f  (each position p owns a full
    # 128-lane block, so all downstream slices are vreg-aligned).
    y = jnp.dot(x, w, preferred_element_type=jnp.float32)        # (bn, n_pos*128) f32

    lane = jax.lax.broadcasted_iota(jnp.int32, (1, 128), 1)
    F = n_filters

    def pos_block(p):
        blk = y[:, p * 128:(p + 1) * 128]        # 128-aligned static slice: free vreg select
        inv = None
        for c, k in enumerate(kernel_sizes):     # static trace-time condition
            if p >= seq_len - k + 1:             # this conv has no output at position p
                msk = (lane >= c * F) & (lane < (c + 1) * F)
                inv = msk if inv is None else (inv | msk)
        if inv is not None:                      # only the last (k_max - 1) blocks need this
            blk = jnp.where(inv, jnp.float32(-1e30), blk)
        return blk

    # Max-pool over positions = 128-aligned vreg maxes (no XLU rotates / masked selects).
    m = pos_block(0)
    for p in range(1, n_pos):
        m = jnp.maximum(m, pos_block(p))

    # Bias-add and ReLU commute with the positional max (both monotone non-decreasing),
    # so they run on the small (bn, 128) pooled slab, not the full matmul output.
    out_ref[...] = jnp.maximum(m + b_ref[...], 0.0)


def elmo_char_cnn_forward(embed_flat, w_cat, b_row, *, kernel_sizes, n_filters,
                          seq_len, bn=128):
    """embed_flat: (N, L*E) bf16; w_cat: (L*E, n_pos*128) bf16; b_row: (1, 128) f32.
    Returns (N, len(kernel_sizes) * n_filters) f32."""
    n, le = embed_flat.shape
    n_pos = seq_len - min(kernel_sizes) + 1
    p_cols = n_pos * 128
    assert w_cat.shape == (le, p_cols), w_cat.shape
    out_cols = len(kernel_sizes) * n_filters
    assert out_cols <= 128
    assert bn % 8 == 0

    n_pad = pl.cdiv(n, bn) * bn                      # pad batch instead of asserting
    if n_pad != n:
        embed_flat = jnp.pad(embed_flat, ((0, n_pad - n), (0, 0)))

    kernel = functools.partial(
        _elmo_char_cnn_kernel, kernel_sizes=tuple(kernel_sizes),
        n_filters=n_filters, seq_len=seq_len, n_pos=n_pos)

    out = pl.pallas_call(
        kernel,
        out_shape=jax.ShapeDtypeStruct((n_pad, 128), jnp.float32),
        grid_spec=pltpu.PrefetchScalarGridSpec(
            num_scalar_prefetch=0,
            grid=(n_pad // bn,),
            in_specs=[
                pl.BlockSpec((bn, le), lambda i: (i, 0)),        # (bn, 480) bf16
                pl.BlockSpec((le, p_cols), lambda i: (0, 0)),    # grid-invariant weight
                pl.BlockSpec((1, 128), lambda i: (0, 0)),        # grid-invariant bias
            ],
            out_specs=pl.BlockSpec((bn, 128), lambda i: (i, 0)), # lane-dense output
        ),
        compiler_params=pltpu.CompilerParams(
            dimension_semantics=("parallel",)),
    )(embed_flat, w_cat, b_row)
    return out[:n, :out_cols]


@functools.partial(jax.jit, static_argnames=("kernel_sizes", "n_filters", "seq_len", "bn"))
def elmo_char_cnn_apply(ids, emb_table_bf16, w_cat, b_row, *,
                        kernel_sizes, n_filters, seq_len, bn=128):
    """Gather + flatten + fused conv kernel in one XLA program (single launch)."""
    n = ids.shape[0]
    emb_dim = emb_table_bf16.shape[1]
    embed_flat = emb_table_bf16[ids].reshape(n, seq_len * emb_dim)   # (N, L*E) bf16
    return elmo_char_cnn_forward(embed_flat, w_cat, b_row,
                                 kernel_sizes=kernel_sizes, n_filters=n_filters,
                                 seq_len=seq_len, bn=bn)


# ------------------------------- the module ----------------------------------
class ELMOCharEncoderPallas:
    """Char-CNN token encoder of ELMo with conv + bias + ReLU + max-pool fused into
    one Pallas TPU kernel.  Parameters are randomly initialized (see TODOs above)."""

    def __init__(self, embedding_dim=32, n_filters=16, kernel_sizes=(2, 3, 4), key=None):
        self.token2id = build_vocab()
        self.vocab_size = len(self.token2id)             # 102
        self.embedding_dim = embedding_dim
        self.n_filters = n_filters
        self.kernel_sizes = tuple(kernel_sizes)
        self.n_convs = len(self.kernel_sizes)
        self.end_dim = n_filters * self.n_convs
        self.max_len = MAX_LEN

        keys = jax.random.split(key, 1 + 2 * self.n_convs)
        # nn.Embedding(vocab_size, embedding_dim): weight (V, E)
        self.emb_table = jax.random.normal(
            keys[0], (self.vocab_size, embedding_dim), jnp.float32)
        # nn.Conv2d(1, F, (k, E)): weight (F, 1, k, E), bias (F,)
        self.conv_w = []   # stored as (k, E, F)
        self.conv_b = []   # stored as (1, F)
        for i, k in enumerate(self.kernel_sizes):
            w_torch = 0.1 * jax.random.normal(
                keys[1 + 2 * i], (n_filters, 1, k, embedding_dim), jnp.float32)
            b_torch = 0.1 * jax.random.normal(
                keys[2 + 2 * i], (n_filters,), jnp.float32)
            self.conv_w.append(jnp.transpose(w_torch[:, 0, :, :], (1, 2, 0)))
            self.conv_b.append(b_torch.reshape(1, n_filters))

        # bf16 operands for the MXU path (all TPU generations); f32 master copies kept.
        self.emb_table_bf16 = self.emb_table.astype(jnp.bfloat16)
        self.w_cat, self.b_row = self._build_fused_params()

    def _build_fused_params(self):
        """Fused conv-as-matmul weight (L*E, n_pos*128) and bias row (1, 128).

        Column layout: col = p*128 + c*F + f; row = (p + j)*E + e, so one matmul
        produces every conv output at every position, with each position in its own
        128-aligned lane block.  Invalid (conv, position) columns are zero (masked
        to -1e30 in-kernel before the max)."""
        E, F, L = self.embedding_dim, self.n_filters, self.max_len
        n_pos = L - min(self.kernel_sizes) + 1
        W = np.zeros((L * E, n_pos * 128), np.float32)
        b = np.zeros((1, 128), np.float32)
        for c, k in enumerate(self.kernel_sizes):
            w_kef = np.asarray(self.conv_w[c])                        # (k, E, F)
            b[0, c * F:(c + 1) * F] = np.asarray(self.conv_b[c])[0]
            l_out = L - k + 1
            for p in range(l_out):
                for j in range(k):
                    W[(p + j) * E:(p + j + 1) * E,
                      p * 128 + c * F: p * 128 + (c + 1) * F] = w_kef[j]
        return jnp.asarray(W, jnp.bfloat16), jnp.asarray(b, jnp.float32)

    def __call__(self, sent):
        ids = make_vectors(sent, self.token2id)                 # (N, 15) int32
        return elmo_char_cnn_apply(
            ids, self.emb_table_bf16, self.w_cat, self.b_row,
            kernel_sizes=self.kernel_sizes, n_filters=self.n_filters,
            seq_len=self.max_len, bn=128)

    # pure-JAX f32 reference with PyTorch Conv2d/ReLU/max-pool semantics
    def reference(self, sent):
        ids = make_vectors(sent, self.token2id)
        embed = self.emb_table[ids]                             # f32
        n, seq_len, _ = embed.shape
        pooled = []
        for w, b, k in zip(self.conv_w, self.conv_b, self.kernel_sizes):
            l_out = seq_len - k + 1
            s = sum(jnp.einsum('nle,ef->nlf', embed[:, j:j + l_out, :], w[j])
                    for j in range(k)) + b[None, :, :]
            pooled.append(jnp.max(jnp.maximum(s, 0.0), axis=1))
        return jnp.concatenate(pooled, axis=-1)


# --------------------------------- main ---------------------------------------
if __name__ == "__main__":
    key = jax.random.PRNGKey(0)
    model = ELMOCharEncoderPallas(embedding_dim=32, n_filters=16,
                                  kernel_sizes=(2, 3, 4), key=key)

    # 512 deterministic small "words" -> batch tile 128 -> grid of 4 parallel steps
    # (>= 2 steps per TensorCore on v7x so the input DMA overlaps compute).
    base = ["hello", "world", "pallas", "tpu", "kernel", "elmo", "char", "cnn"]
    sent = [base[i % len(base)] + str(i % 97) for i in range(512)]

    out = jax.block_until_ready(model(sent))
    ref = model.reference(sent)

    assert out.shape == (len(sent), model.end_dim), out.shape
    assert bool(jnp.all(jnp.isfinite(out)))
    # bf16 operand storage bounds the deviation from the f32 reference well below 5e-2.
    assert jnp.allclose(out, ref, atol=5e-2, rtol=5e-2), \
        float(jnp.max(jnp.abs(out - ref)))

    print("KERNEL_OK")
</pallas_src>

<mosaic_0001>
module attributes {stable_mosaic.version = 11 : i64} {
  func.func @_elmo_char_cnn_kernel(%arg0: i32, %arg1: memref<128x480xbf16, #tpu.memory_space<vmem>>, %arg2: memref<480x1792xbf16, #tpu.memory_space<vmem>>, %arg3: memref<1x128xf32, #tpu.memory_space<vmem>>, %arg4: memref<128x128xf32, #tpu.memory_space<vmem>>) attributes {dimension_semantics = [#tpu.dimension_semantics<parallel>], iteration_bounds = array<i64: 4>, scalar_prefetch = 0 : i64, scratch_operands = 0 : i64, tpu.core_type = #tpu.core_type<tc>, window_params = [{transform_indices = @transform_0, window_bounds = array<i64: 128, 480>}, {pipeline_mode = #tpu.pipeline_mode<synchronous>, transform_indices = @transform_1, window_bounds = array<i64: 480, 1792>}, {pipeline_mode = #tpu.pipeline_mode<synchronous>, transform_indices = @transform_2, window_bounds = array<i64: 1, 128>}, {transform_indices = @transform_3, window_bounds = array<i64: 128, 128>}]} {
    %c0 = arith.constant 0 : index
    %c0_0 = arith.constant 0 : index
    %0 = vector.load %arg1[%c0, %c0_0] : memref<128x480xbf16, #tpu.memory_space<vmem>>, vector<128x480xbf16>
    %c0_1 = arith.constant 0 : index
    %c0_2 = arith.constant 0 : index
    %1 = vector.load %arg2[%c0_1, %c0_2] : memref<480x1792xbf16, #tpu.memory_space<vmem>>, vector<480x1792xbf16>
    %cst = arith.constant dense<0.000000e+00> : vector<128x1792xf32>
    %2 = tpu.matmul %0, %1, %cst {dimension_numbers = #tpu.dot_dimension_numbers<[1], [0], [0], [1], [0, 0, 1, 1], [], []>} : vector<128x480xbf16>, vector<480x1792xbf16>, vector<128x1792xf32> -> vector<128x1792xf32>
    %3 = tpu.iota {dimensions = array<i32: 1>} : vector<1x128xi32>
    %4 = vector.extract_strided_slice %2 {offsets = [0, 0], sizes = [128, 128], strides = [1, 1]} : vector<128x1792xf32> to vector<128x128xf32>
    %5 = vector.extract_strided_slice %2 {offsets = [0, 128], sizes = [128, 128], strides = [1, 1]} : vector<128x1792xf32> to vector<128x128xf32>
    %6 = arith.maximumf %4, %5 : vector<128x128xf32>
    %7 = vector.extract_strided_slice %2 {offsets = [0, 256], sizes = [128, 128], strides = [1, 1]} : vector<128x1792xf32> to vector<128x128xf32>
    %8 = arith.maximumf %6, %7 : vector<128x128xf32>
    %9 = vector.extract_strided_slice %2 {offsets = [0, 384], sizes = [128, 128], strides = [1, 1]} : vector<128x1792xf32> to vector<128x128xf32>
    %10 = arith.maximumf %8, %9 : vector<128x128xf32>
    %11 = vector.extract_strided_slice %2 {offsets = [0, 512], sizes = [128, 128], strides = [1, 1]} : vector<128x1792xf32> to vector<128x128xf32>
    %12 = arith.maximumf %10, %11 : vector<128x128xf32>
    %13 = vector.extract_strided_slice %2 {offsets = [0, 640], sizes = [128, 128], strides = [1, 1]} : vector<128x1792xf32> to vector<128x128xf32>
    %14 = arith.maximumf %12, %13 : vector<128x128xf32>
    %15 = vector.extract_strided_slice %2 {offsets = [0, 768], sizes = [128, 128], strides = [1, 1]} : vector<128x1792xf32> to vector<128x128xf32>
    %16 = arith.maximumf %14, %15 : vector<128x128xf32>
    %17 = vector.extract_strided_slice %2 {offsets = [0, 896], sizes = [128, 128], strides = [1, 1]} : vector<128x1792xf32> to vector<128x128xf32>
    %18 = arith.maximumf %16, %17 : vector<128x128xf32>
    %19 = vector.extract_strided_slice %2 {offsets = [0, 1024], sizes = [128, 128], strides = [1, 1]} : vector<128x1792xf32> to vector<128x128xf32>
    %20 = arith.maximumf %18, %19 : vector<128x128xf32>
    %21 = vector.extract_strided_slice %2 {offsets = [0, 1152], sizes = [128, 128], strides = [1, 1]} : vector<128x1792xf32> to vector<128x128xf32>
    %22 = arith.maximumf %20, %21 : vector<128x128xf32>
    %23 = vector.extract_strided_slice %2 {offsets = [0, 1280], sizes = [128, 128], strides = [1, 1]} : vector<128x1792xf32> to vector<128x128xf32>
    %24 = arith.maximumf %22, %23 : vector<128x128xf32>
    %25 = vector.extract_strided_slice %2 {offsets = [0, 1408], sizes = [128, 128], strides = [1, 1]} : vector<128x1792xf32> to vector<128x128xf32>
    %26 = arith.maximumf %24, %25 : vector<128x128xf32>
    %27 = vector.extract_strided_slice %2 {offsets = [0, 1536], sizes = [128, 128], strides = [1, 1]} : vector<128x1792xf32> to vector<128x128xf32>
    %c32_i32 = arith.constant 32 : i32
    %28 = vector.broadcast %c32_i32 : i32 to vector<1x128xi32>
    %29 = arith.cmpi sge, %3, %28 : vector<1x128xi32>
    %c48_i32 = arith.constant 48 : i32
    %30 = vector.broadcast %c48_i32 : i32 to vector<1x128xi32>
    %31 = arith.cmpi slt, %3, %30 : vector<1x128xi32>
    %32 = arith.andi %29, %31 : vector<1x128xi1>
    %cst_3 = arith.constant -1.000000e+30 : f32
    %33 = vector.shape_cast %32 : vector<1x128xi1> to vector<1x128xi1>
    %34 = vector.broadcast %33 : vector<1x128xi1> to vector<128x128xi1>
    %35 = vector.broadcast %cst_3 : f32 to vector<128x128xf32>
    %36 = arith.select %34, %35, %27 : vector<128x128xi1>, vector<128x128xf32>
    %37 = arith.maximumf %26, %36 : vector<128x128xf32>
    %38 = vector.extract_strided_slice %2 {offsets = [0, 1664], sizes = [128, 128], strides = [1, 1]} : vector<128x1792xf32> to vector<128x128xf32>
    %c16_i32 = arith.constant 16 : i32
    %39 = vector.broadcast %c16_i32 : i32 to vector<1x128xi32>
    %40 = arith.cmpi sge, %3, %39 : vector<1x128xi32>
    %c32_i32_4 = arith.constant 32 : i32
    %41 = vector.broadcast %c32_i32_4 : i32 to vector<1x128xi32>
    %42 = arith.cmpi slt, %3, %41 : vector<1x128xi32>
    %43 = arith.andi %40, %42 : vector<1x128xi1>
    %c32_i32_5 = arith.constant 32 : i32
    %44 = vector.broadcast %c32_i32_5 : i32 to vector<1x128xi32>
    %45 = arith.cmpi sge, %3, %44 : vector<1x128xi32>
    %c48_i32_6 = arith.constant 48 : i32
    %46 = vector.broadcast %c48_i32_6 : i32 to vector<1x128xi32>
    %47 = arith.cmpi slt, %3, %46 : vector<1x128xi32>
    %48 = arith.andi %45, %47 : vector<1x128xi1>
    %49 = arith.ori %43, %48 : vector<1x128xi1>
    %cst_7 = arith.constant -1.000000e+30 : f32
    %50 = vector.shape_cast %49 : vector<1x128xi1> to vector<1x128xi1>
    %51 = vector.broadcast %50 : vector<1x128xi1> to vector<128x128xi1>
    %52 = vector.broadcast %cst_7 : f32 to vector<128x128xf32>
    %53 = arith.select %51, %52, %38 : vector<128x128xi1>, vector<128x128xf32>
    %54 = arith.maximumf %37, %53 : vector<128x128xf32>
    %c0_8 = arith.constant 0 : index
    %c0_9 = arith.constant 0 : index
    %55 = vector.load %arg3[%c0_8, %c0_9] : memref<1x128xf32, #tpu.memory_space<vmem>>, vector<1x128xf32>
    %56 = vector.broadcast %55 : vector<1x128xf32> to vector<128x128xf32>
    %57 = arith.addf %54, %56 : vector<128x128xf32>
    %cst_10 = arith.constant 0.000000e+00 : f32
    %58 = vector.broadcast %cst_10 : f32 to vector<128x128xf32>
    %59 = arith.maximumf %57, %58 : vector<128x128xf32>
    %c0_11 = arith.constant 0 : index
    %c0_12 = arith.constant 0 : index
    %60 = vector.load %arg4[%c0_11, %c0_12] : memref<128x128xf32, #tpu.memory_space<vmem>>, vector<128x128xf32>
    tpu.vector_store %arg4[%c0_11, %c0_12], %59 {strides = array<i32>} : memref<128x128xf32, #tpu.memory_space<vmem>>, vector<128x128xf32>,
    return
  }
  func.func @transform_0(%arg0: i32) -> (i32, i32) {
    %c0_i32 = arith.constant 0 : i32
    %c0_i32_0 = arith.constant 0 : i32
    return %arg0, %c0_i32 : i32, i32
  }
  func.func @transform_1(%arg0: i32) -> (i32, i32) {
    %c0_i32 = arith.constant 0 : i32
    %c0_i32_0 = arith.constant 0 : i32
    %c0_i32_1 = arith.constant 0 : i32
    return %c0_i32, %c0_i32_0 : i32, i32
  }
  func.func @transform_2(%arg0: i32) -> (i32, i32) {
    %c0_i32 = arith.constant 0 : i32
    %c0_i32_0 = arith.constant 0 : i32
    %c0_i32_1 = arith.constant 0 : i32
    return %c0_i32, %c0_i32_0 : i32, i32
  }
  func.func @transform_3(%arg0: i32) -> (i32, i32) {
    %c0_i32 = arith.constant 0 : i32
    %c0_i32_0 = arith.constant 0 : i32
    return %arg0, %c0_i32 : i32, i32
  }
}

</mosaic_0001>

<bundles_post_ra>
// kernel: elmo_char_cnn_apply.1
= control target key start
LH: loop header
LB: loop body
LE: loop exit
PB: predicated region body
PF: predicated region fallthrough
CT: control target
= control target key end

     0   :  { %s6361_s12 = smov 0   ;;  %s8607_s0 = inlined_call_operand.vmem [shape: bf16[512,480], index: 0, kind: input, shape index: {}]   ;;  %s8608_s1 = inlined_call_operand.vmem [shape: bf16[480,1792], index: 1, kind: input, shape index: {}]   ;;  %s8609_s2 = inlined_call_operand.vmem [shape: f32[1,128], index: 2, kind: input, shape index: {}]   ;;  %s8610_s3 = inlined_call_operand.vmem [shape: f32[512,128], index: 3, kind: output, shape index: {}]  }
   0x1 LB: > { %s4853_s13 = sadd.s32 4294967295, %s6339_s12   ;;  %p4857_p0 = scmp.ge.s32.totalorder %s6339_s12, 1  ;;  %s6339_s12 = sphi %s6361_s12, %s13_s12  }
   0x2   : > { %p139_p1 = scmp.lt.s32.totalorder %s6339_s12, 5 }
   0x4   : > { %p140_p2 = pnand %p4857_p0, %p139_p1 }
   0x6   : > { %143 = sbr.rel (%p140_p2) target bundleno = 745 (0x2e9), region = 32 }
   0xd   : > { %v5607_v0 = vld [vmem:[%s8608_s1 + $0x4] ss:$56 sps:$4 sm:$0xff]   ;;  %v5611_v2 = vld [vmem:[%s8608_s1] ss:$56 sps:$4 sm:$0xff]   ;;  %v5613_v4 = vld [vmem:[%s8608_s1 + $0x74] ss:$56 sps:$4 sm:$0xff]  }
   0xe   : > { %v5609_v1 = vld [vmem:[%s8608_s1 + $0x704] ss:$56 sps:$4 sm:$0xff]   ;;  %2907 = vmatprep.subr.bf16.mxu1 %v5607_v0  ;;  %v5612_v3 = vld [vmem:[%s8608_s1 + $0x700] ss:$56 sps:$4 sm:$0xff]   ;;  %v5615_v5 = vld [vmem:[%s8608_s1 + $0x774] ss:$56 sps:$4 sm:$0xff]  }
   0xf   : > { %3020 = vmatprep.subr.bf16.mxu0 %v5609_v1  ;;  %2908 = vmatpush1.bf16.msra.mxu1 %v5611_v2  ;;  %v5617_v6 = vld [vmem:[%s8608_s1 + $0x70] ss:$56 sps:$4 sm:$0xff]   ;;  %v5619_v8 = vld [vmem:[%s8608_s1 + $0xe4] ss:$56 sps:$4 sm:$0xff]   ;;  %v5623_v10 = vld [vmem:[%s8608_s1 + $0xe0] ss:$56 sps:$4 sm:$0xff]  }
  0x10   : > { %3021 = vmatpush1.bf16.msra.mxu0 %v5612_v3  ;;  %2909 = vmatprep.subr.bf16.mxu1 %v5613_v4  ;;  %v5618_v7 = vld [vmem:[%s8608_s1 + $0x770] ss:$56 sps:$4 sm:$0xff]   ;;  %v5621_v9 = vld [vmem:[%s8608_s1 + $0x7e4] ss:$56 sps:$4 sm:$0xff]   ;;  %v5624_v11 = vld [vmem:[%s8608_s1 + $0x7e0] ss:$56 sps:$4 sm:$0xff]  }
  0x11   : > { %3022 = vmatprep.subr.bf16.mxu0 %v5615_v5  ;;  %v5625_v12 = vld [vmem:[%s8608_s1 + $0x154] ss:$56 sps:$4 sm:$0xff]   ;;  %v5629_v14 = vld [vmem:[%s8608_s1 + $0x150] ss:$56 sps:$4 sm:$0xff]   ;;  %v5631_v16 = vld [vmem:[%s8608_s1 + $0x1c4] ss:$56 sps:$4 sm:$0xff]  }
  0x12   : > { %v5627_v13 = vld [vmem:[%s8608_s1 + $0x854] ss:$56 sps:$4 sm:$0xff]   ;;  %v5630_v15 = vld [vmem:[%s8608_s1 + $0x850] ss:$56 sps:$4 sm:$0xff]   ;;  %v5633_v17 = vld [vmem:[%s8608_s1 + $0x8c4] ss:$56 sps:$4 sm:$0xff]  }
  0x13   : > { %2910 = vmatpush1.bf16.msra.mxu1 %v5617_v6  ;;  %v5635_v18 = vld [vmem:[%s8608_s1 + $0x1c0] ss:$56 sps:$4 sm:$0xff]   ;;  %v5637_v20 = vld [vmem:[%s8608_s1 + $0x234] ss:$56 sps:$4 sm:$0xff]   ;;  %v5641_v22 = vld [vmem:[%s8608_s1 + $0x230] ss:$56 sps:$4 sm:$0xff]  }
  0x14   : > { %3023 = vmatpush1.bf16.msra.mxu0 %v5618_v7  ;;  %2911 = vmatprep.subr.bf16.mxu1 %v5619_v8  ;;  %v5636_v19 = vld [vmem:[%s8608_s1 + $0x8c0] ss:$56 sps:$4 sm:$0xff]   ;;  %v5639_v21 = vld [vmem:[%s8608_s1 + $0x934] ss:$56 sps:$4 sm:$0xff]   ;;  %v5642_v23 = vld [vmem:[%s8608_s1 + $0x930] ss:$56 sps:$4 sm:$0xff]  }
  0x15   : > { %3024 = vmatprep.subr.bf16.mxu0 %v5621_v9  ;;  %v5643_v24 = vld [vmem:[%s8608_s1 + $0x2a4] ss:$56 sps:$4 sm:$0xff]   ;;  %s4858_s16 = sshll.u32 %s4853_s13, 4  ;;  %v5647_v26 = vld [vmem:[%s8608_s1 + $0x2a0] ss:$56 sps:$4 sm:$0xff]   ;;  %vm2882_vm0 = vcmask 785408  }
  0x16   : > { %v5645_v25 = vld [vmem:[%s8608_s1 + $0x9a4] ss:$56 sps:$4 sm:$0xff]   ;;  %v5648_v27 = vld [vmem:[%s8608_s1 + $0x9a0] ss:$56 sps:$4 sm:$0xff]   ;;  %v5649_v28 = vld [vmem:[%s8608_s1 + $0x314] ss:$56 sps:$4 sm:$0xff]  }
  0x17   : > { %2912 = vmatpush1.bf16.msra.mxu1 %v5623_v10  ;;  %p165_p3 = scmp.lt.s32.totalorder %s4858_s16, 63  ;;  %v5651_v29 = vld [vmem:[%s8608_s1 + $0xa14] ss:$56 sps:$4 sm:$0xff]   ;;  %v5653_v30 = vld [vmem:[%s8608_s1 + $0x310] ss:$56 sps:$4 sm:$0xff]  }
  0x18   : > { %3025 = vmatpush1.bf16.msra.mxu0 %v5624_v11  ;;  %2913 = vmatprep.subr.bf16.mxu1 %v5625_v12  ;;  %v5654_v31 = vld [vmem:[%s8608_s1 + $0xa10] ss:$56 sps:$4 sm:$0xff]   ;;  %v5655_v32 = vld [vmem:[%s8608_s1 + $0x384] ss:$56 sps:$4 sm:$0xff]   ;;  %v5659_v34 = vld [vmem:[%s8608_s1 + $0x380] ss:$56 sps:$4 sm:$0xff]  }
  0x19   : > { %3026 = vmatprep.subr.bf16.mxu0 %v5627_v13  ;;  %s8684_s16 = smov (!%p165_p3, %s4858_s16), 63  ;;  %v5657_v33 = vld [vmem:[%s8608_s1 + $0xa84] ss:$56 sps:$4 sm:$0xff]   ;;  %v5660_v35 = vld [vmem:[%s8608_s1 + $0xa80] ss:$56 sps:$4 sm:$0xff]  }
  0x1a   : > { %v5661_v36 = vld [vmem:[%s8608_s1 + $0x3f4] ss:$56 sps:$4 sm:$0xff]   ;;  %s5374_s11 = sshll.u32 %s8684_s16, 4  ;;  %v5665_v38 = vld [vmem:[%s8608_s1 + $0x3f0] ss:$56 sps:$4 sm:$0xff]   ;;  %s4862_s9 = sshll.u32 %s8684_s16, 3 }
  0x1b   : > { %2914 = vmatpush1.bf16.msra.mxu1 %v5629_v14  ;;  %v5663_v37 = vld [vmem:[%s8608_s1 + $0xaf4] ss:$56 sps:$4 sm:$0xff]   ;;  %s6494_s21 = scalar_lea.vmem %s8607_s0, %s5374_s11  ;;  %v5666_v39 = vld [vmem:[%s8608_s1 + $0xaf0] ss:$56 sps:$4 sm:$0xff]   ;;  %v5667_v40 = vld [vmem:[%s8608_s1 + $0x464] ss:$56 sps:$4 sm:$0xff]   ;;  %s8476_s16 = scalar_lea.vmem %s8610_s3, %s4862_s9 }
  0x1c   : > { %3027 = vmatpush1.bf16.msra.mxu0 %v5630_v15  ;;  %2915 = vmatprep.subr.bf16.mxu1 %v5631_v16  ;;  %v5669_v41 = vld [vmem:[%s8608_s1 + $0xb64] ss:$56 sps:$4 sm:$0xff]   ;;  %v5671_v43 = vld [vmem:[%s8608_s1 + $0x460] ss:$56 sps:$4 sm:$0xff]   ;;  %v5673_v45 = vld [vmem:[%s8608_s1 + $0x4d4] ss:$56 sps:$4 sm:$0xff]  }
  0x1d   : > { %3028 = vmatprep.subr.bf16.mxu0 %v5633_v17  ;;  %v5691_v42 = vld [vmem:[%s6494_s21 + $0xc] ss:$16 sps:$4 sm:$0xff]   ;;  %v5672_v44 = vld [vmem:[%s8608_s1 + $0xb60] ss:$56 sps:$4 sm:$0xff]   ;;  %v5677_v47 = vld [vmem:[%s8608_s1 + $0x4d0] ss:$56 sps:$4 sm:$0xff]  }
  0x1e   : > { %v5675_v46 = vld [vmem:[%s8608_s1 + $0xbd4] ss:$56 sps:$4 sm:$0xff]   ;;  %5315 = vmatprep.mubr.msk.bf16.mxu0 %vm2882_vm0, %v5691_v42  ;;  %v5678_v48 = vld [vmem:[%s8608_s1 + $0xbd0] ss:$56 sps:$4 sm:$0xff]   ;;  %v5679_v49 = vld [vmem:[%s8608_s1 + $0x544] ss:$56 sps:$4 sm:$0xff]  }
  0x1f   : > { %2916 = vmatpush1.bf16.msra.mxu1 %v5635_v18  ;;  %v6529_v50 = vld [vmem:[%s6494_s21 + $0x4] ss:$16 sps:$4 sm:$0xff]   ;;  %v5683_v52 = vld [vmem:[%s8608_s1 + $0x540] ss:$56 sps:$4 sm:$0xff]   ;;  %v5689_v56 = vld [vmem:[%s8608_s1 + $0x5b0] ss:$56 sps:$4 sm:$0xff]  }
  0x20   : > { %3029 = vmatpush1.bf16.msra.mxu0 %v5636_v19  ;;  %2917 = vmatprep.subr.bf16.mxu1 %v5637_v20  ;;  %v5681_v51 = vld [vmem:[%s8608_s1 + $0xc44] ss:$56 sps:$4 sm:$0xff]   ;;  %v5684_v53 = vld [vmem:[%s8608_s1 + $0xc40] ss:$56 sps:$4 sm:$0xff]   ;;  %v5685_v54 = vld [vmem:[%s8608_s1 + $0x5b4] ss:$56 sps:$4 sm:$0xff]  }
  0x21   : > { %3030 = vmatprep.subr.bf16.mxu0 %v5639_v21  ;;  %2939 = vmatprep.mubr.bf16.mxu1 %v6529_v50  ;;  %v5687_v55 = vld [vmem:[%s8608_s1 + $0xcb4] ss:$56 sps:$4 sm:$0xff]   ;;  %v5690_v57 = vld [vmem:[%s8608_s1 + $0xcb0] ss:$56 sps:$4 sm:$0xff]   ;;  %v5693_v58 = vld [vmem:[%s8608_s1 + $0x624] ss:$56 sps:$4 sm:$0xff]  }
  0x22   : > { %v5698_v59 = vld [vmem:[%s8608_s1 + $0x14] ss:$56 sps:$4 sm:$0xff]   ;;  %v5695_v60 = vld [vmem:[%s6494_s21 + $0x8] ss:$16 sps:$4 sm:$0xff]   ;;  %v5704_v0 = vld [vmem:[%s8608_s1 + $0x84] ss:$56 sps:$4 sm:$0xff]  }
  0x23   : > { %2918 = vmatpush1.bf16.msra.mxu1 %v5641_v22  ;;  %v5696_v61 = vld [vmem:[%s8608_s1 + $0x10] ss:$56 sps:$4 sm:$0xff]   ;;  %v5699_v62 = vld [vmem:[%s8608_s1 + $0x620] ss:$56 sps:$4 sm:$0xff]   ;;  %v5700_v63 = vld [vmem:[%s8608_s1 + $0x694] ss:$56 sps:$4 sm:$0xff]  }
  0x24   : > { %3031 = vmatpush1.bf16.msra.mxu0 %v5642_v23  ;;  %2919 = vmatprep.subr.bf16.mxu1 %v5643_v24  ;;  %v5708_v1 = vld [vmem:[%s6494_s21 + $0x2c] ss:$16 sps:$4 sm:$0xff]   ;;  %v5702_v2 = vld [vmem:[%s8608_s1 + $0x80] ss:$56 sps:$4 sm:$0xff]   ;;  %v5705_v3 = vld [vmem:[%s8608_s1 + $0x690] ss:$56 sps:$4 sm:$0xff]  }
  0x25   : > { %3032 = vmatprep.subr.bf16.mxu0 %v5645_v25  ;;  %v5714_v4 = vld [vmem:[%s8608_s1 + $0xc] ss:$56 sps:$4 sm:$0xff]   ;;  %v6587_v6 = vld [vmem:[%s6494_s21] ss:$16 sps:$4 sm:$0xff]   ;;  %v5711_v7 = vld [vmem:[%s6494_s21 + $0x28] ss:$16 sps:$4 sm:$0xff]  }
  0x26   : > { %v5717_v5 = vld [vmem:[%s8608_s1 + $0xf4] ss:$56 sps:$4 sm:$0xff]   ;;  %v5712_v8 = vld [vmem:[%s8608_s1 + $0x8] ss:$56 sps:$4 sm:$0xff]   ;;  %v5723_v11 = vld [vmem:[%s8608_s1 + $0x164] ss:$56 sps:$4 sm:$0xff]  }
  0x27   : > { %2920 = vmatpush1.bf16.msra.mxu1 %v5647_v26  ;;  %v5715_v9 = vld [vmem:[%s8608_s1 + $0xf0] ss:$56 sps:$4 sm:$0xff]   ;;  %v5720_v10 = vld [vmem:[%s8608_s1 + $0x7c] ss:$56 sps:$4 sm:$0xff]   ;;  %v5721_v15 = vld [vmem:[%s8608_s1 + $0x160] ss:$56 sps:$4 sm:$0xff]  }
  0x28   : > { %3033 = vmatpush1.bf16.msra.mxu0 %v5648_v27  ;;  %2921 = vmatprep.subr.bf16.mxu1 %v5649_v28  ;;  %v6603_v12 = vld [vmem:[%s6494_s21 + $0x24] ss:$16 sps:$4 sm:$0xff]   ;;  %v5726_v13 = vld [vmem:[%s6494_s21 + $0x4c] ss:$16 sps:$4 sm:$0xff]   ;;  %v5718_v14 = vld [vmem:[%s8608_s1 + $0x78] ss:$56 sps:$4 sm:$0xff]  }
  0x29   : > { %3034 = vmatprep.subr.bf16.mxu0 %v5651_v29  ;;  %v5732_v16 = vld [vmem:[%s8608_s1 + $0xec] ss:$56 sps:$4 sm:$0xff]   ;;  %v6622_v18 = vld [vmem:[%s6494_s21 + $0x20] ss:$16 sps:$4 sm:$0xff]   ;;  %v5729_v19 = vld [vmem:[%s6494_s21 + $0x48] ss:$16 sps:$4 sm:$0xff]  }
  0x2a   : > { %v5735_v17 = vld [vmem:[%s8608_s1 + $0x1d4] ss:$56 sps:$4 sm:$0xff]   ;;  %v5730_v20 = vld [vmem:[%s8608_s1 + $0xe8] ss:$56 sps:$4 sm:$0xff]   ;;  %v5741_v23 = vld [vmem:[%s8608_s1 + $0x244] ss:$56 sps:$4 sm:$0xff]  }
  0x2b   : > { %2922 = vmatpush1.bf16.msra.mxu1 %v5653_v30  ;;  %v5733_v21 = vld [vmem:[%s8608_s1 + $0x1d0] ss:$56 sps:$4 sm:$0xff]   ;;  %v5738_v22 = vld [vmem:[%s8608_s1 + $0x15c] ss:$56 sps:$4 sm:$0xff]   ;;  %v5739_v27 = vld [vmem:[%s8608_s1 + $0x240] ss:$56 sps:$4 sm:$0xff]  }
  0x2c   : > { %3035 = vmatpush1.bf16.msra.mxu0 %v5654_v31  ;;  %2923 = vmatprep.subr.bf16.mxu1 %v5655_v32  ;;  %v6638_v24 = vld [vmem:[%s6494_s21 + $0x44] ss:$16 sps:$4 sm:$0xff]   ;;  %v5744_v25 = vld [vmem:[%s6494_s21 + $0x6c] ss:$16 sps:$4 sm:$0xff]   ;;  %v5736_v26 = vld [vmem:[%s8608_s1 + $0x158] ss:$56 sps:$4 sm:$0xff]  }
  0x2d   : > { %3036 = vmatprep.subr.bf16.mxu0 %v5657_v33  ;;  %v5750_v28 = vld [vmem:[%s8608_s1 + $0x1cc] ss:$56 sps:$4 sm:$0xff]   ;;  %v6657_v30 = vld [vmem:[%s6494_s21 + $0x40] ss:$16 sps:$4 sm:$0xff]   ;;  %v5747_v31 = vld [vmem:[%s6494_s21 + $0x68] ss:$16 sps:$4 sm:$0xff]  }
  0x2e   : > { %v5753_v29 = vld [vmem:[%s8608_s1 + $0x2b4] ss:$56 sps:$4 sm:$0xff]   ;;  %v5748_v32 = vld [vmem:[%s8608_s1 + $0x1c8] ss:$56 sps:$4 sm:$0xff]  }
  0x2f   : > { %2924 = vmatpush1.bf16.msra.mxu1 %v5659_v34  ;;  %v5751_v33 = vld [vmem:[%s8608_s1 + $0x2b0] ss:$56 sps:$4 sm:$0xff]   ;;  %v5756_v34 = vld [vmem:[%s8608_s1 + $0x23c] ss:$56 sps:$4 sm:$0xff]  }
  0x30   : > { %3037 = vmatpush1.bf16.msra.mxu0 %v5660_v35  ;;  %2925 = vmatprep.subr.bf16.mxu1 %v5661_v36  ;;  %v5759_v35 = vld [vmem:[%s8608_s1 + $0x324] ss:$56 sps:$4 sm:$0xff]   ;;  %v6692_v42 = vld [vmem:[%s6494_s21 + $0x60] ss:$16 sps:$4 sm:$0xff]  }
  0x31   : > { %3038 = vmatprep.subr.bf16.mxu0 %v5663_v37  ;;  %v6673_v36 = vld [vmem:[%s6494_s21 + $0x64] ss:$16 sps:$4 sm:$0xff]   ;;  %v5762_v37 = vld [vmem:[%s6494_s21 + $0x8c] ss:$16 sps:$4 sm:$0xff]  }
  0x33   : > { %2926 = vmatpush1.bf16.msra.mxu1 %v5665_v38  ;;  %v5754_v38 = vld [vmem:[%s8608_s1 + $0x238] ss:$56 sps:$4 sm:$0xff]  }
  0x34   : > { %3039 = vmatpush1.bf16.msra.mxu0 %v5666_v39  ;;  %2927 = vmatprep.subr.bf16.mxu1 %v5667_v40  ;;  %v5757_v39 = vld [vmem:[%s8608_s1 + $0x320] ss:$56 sps:$4 sm:$0xff]   ;;  %v5768_v40 = vld [vmem:[%s8608_s1 + $0x2ac] ss:$56 sps:$4 sm:$0xff]  }
  0x35   : > { %3040 = vmatprep.subr.bf16.mxu0 %v5669_v41  ;;  %v5771_v41 = vld [vmem:[%s8608_s1 + $0x394] ss:$56 sps:$4 sm:$0xff]  }
  0x37   : > { %2928 = vmatpush1.bf16.msra.mxu1 %v5671_v43  ;;  %v5765_v43 = vld [vmem:[%s6494_s21 + $0x88] ss:$16 sps:$4 sm:$0xff]  }
  0x38   : > { %3041 = vmatpush1.bf16.msra.mxu0 %v5672_v44  ;;  %2929 = vmatprep.subr.bf16.mxu1 %v5673_v45  ;;  %v5766_v44 = vld [vmem:[%s8608_s1 + $0x2a8] ss:$56 sps:$4 sm:$0xff]  }
  0x39   : > { %3042 = vmatprep.subr.bf16.mxu0 %v5675_v46  ;;  %v5769_v45 = vld [vmem:[%s8608_s1 + $0x390] ss:$56 sps:$4 sm:$0xff]   ;;  %v5774_v46 = vld [vmem:[%s8608_s1 + $0x31c] ss:$56 sps:$4 sm:$0xff]  }
  0x3b   : > { %2930 = vmatpush1.bf16.msra.mxu1 %v5677_v47  ;;  %v5777_v47 = vld [vmem:[%s8608_s1 + $0x404] ss:$56 sps:$4 sm:$0xff]  }
  0x3c   : > { %3043 = vmatpush1.bf16.msra.mxu0 %v5678_v48  ;;  %2931 = vmatprep.subr.bf16.mxu1 %v5679_v49  ;;  %v6708_v48 = vld [vmem:[%s6494_s21 + $0x84] ss:$16 sps:$4 sm:$0xff]   ;;  %v5780_v49 = vld [vmem:[%s6494_s21 + $0xac] ss:$16 sps:$4 sm:$0xff]  }
  0x3d   : > { %3044 = vmatprep.subr.bf16.mxu0 %v5681_v51  ;;  %v5772_v51 = vld [vmem:[%s8608_s1 + $0x318] ss:$56 sps:$4 sm:$0xff]  }
  0x3f   : > { %2932 = vmatpush1.bf16.msra.mxu1 %v5683_v52  ;;  %v5775_v52 = vld [vmem:[%s8608_s1 + $0x400] ss:$56 sps:$4 sm:$0xff]  }
  0x40   : > { %3045 = vmatpush1.bf16.msra.mxu0 %v5684_v53  ;;  %2933 = vmatprep.subr.bf16.mxu1 %v5685_v54  ;;  %v5786_v53 = vld [vmem:[%s8608_s1 + $0x38c] ss:$56 sps:$4 sm:$0xff]  }
  0x41   : > { %3046 = vmatprep.subr.bf16.mxu0 %v5687_v55  ;;  %v5789_v54 = vld [vmem:[%s8608_s1 + $0x474] ss:$56 sps:$4 sm:$0xff]   ;;  %v6727_v55 = vld [vmem:[%s6494_s21 + $0x80] ss:$16 sps:$4 sm:$0xff]  }
  0x43   : > { %2934 = vmatpush1.bf16.msra.mxu1 %v5689_v56  ;;  %v5783_v56 = vld [vmem:[%s6494_s21 + $0xa8] ss:$16 sps:$4 sm:$0xff]  }
  0x44   : > { %3047 = vmatpush1.bf16.msra.mxu0 %v5690_v57  ;;  %2935 = vmatprep.subr.bf16.mxu1 %v5693_v58  ;;  %v5784_v57 = vld [vmem:[%s8608_s1 + $0x388] ss:$56 sps:$4 sm:$0xff]  }
  0x45   : > { %3359 = vmatprep.subr.bf16.mxu0 %v5698_v59  ;;  %v5787_v58 = vld [vmem:[%s8608_s1 + $0x470] ss:$56 sps:$4 sm:$0xff]   ;;  %v5792_v59 = vld [vmem:[%s8608_s1 + $0x3fc] ss:$56 sps:$4 sm:$0xff]  }
  0x47   : > { %3053 = vmatmul.mubr.bf16.vlgmr.msra.gmra.mrb[0].mxu0 %v5695_v60  ;;  %2936 = vmatpush1.bf16.msra.mxu1 %v5699_v62  ;;  %v5795_v60 = vld [vmem:[%s8608_s1 + $0x4e4] ss:$56 sps:$4 sm:$0xff]  }
  0x48   : > { %3360 = vmatpush1.bf16.msra.mxu0 %v5696_v61  ;;  %2937 = vmatprep.subr.bf16.mxu1 %v5700_v63  ;;  %v6743_v61 = vld [vmem:[%s6494_s21 + $0xa4] ss:$16 sps:$4 sm:$0xff]   ;;  %v5798_v62 = vld [vmem:[%s6494_s21 + $0xcc] ss:$16 sps:$4 sm:$0xff]   ;;  %v5790_v63 = vld [vmem:[%s8608_s1 + $0x3f8] ss:$56 sps:$4 sm:$0xff]  }
  0x49   : > { %3361 = vmatprep.subr.bf16.mxu0 %v5704_v0  ;;  %5316 = vmatprep.mubr.msk.bf16.mxu0 %vm2882_vm0, %v5708_v1  ;;  %v5793_v0 = vld [vmem:[%s8608_s1 + $0x4e0] ss:$56 sps:$4 sm:$0xff]   ;;  %v5804_v1 = vld [vmem:[%s8608_s1 + $0x46c] ss:$56 sps:$4 sm:$0xff]  }
  0x4b   : > { %2938 = vmatpush1.bf16.msra.mxu1 %v5705_v3  ;;  %v6762_v3 = vld [vmem:[%s6494_s21 + $0xa0] ss:$16 sps:$4 sm:$0xff]  }
  0x4c   : > { %3362 = vmatpush1.bf16.msra.mxu0 %v5702_v2  ;;  %3133 = vmatprep.subr.bf16.mxu1 %v5714_v4  ;;  %v5807_v2 = vld [vmem:[%s8608_s1 + $0x554] ss:$56 sps:$4 sm:$0xff]   ;;  %v5801_v4 = vld [vmem:[%s6494_s21 + $0xc8] ss:$16 sps:$4 sm:$0xff]  }
  0x4d   : > { %3363 = vmatprep.subr.bf16.mxu0 %v5717_v5  ;;  %v5802_v5 = vld [vmem:[%s8608_s1 + $0x468] ss:$56 sps:$4 sm:$0xff]  }
  0x4e   : > { %2940 = vmatmul.mubr.bf16.vlgmr.msra.gmra.mrb[0].mxu1 %v6587_v6 }
  0x4f   : > { %3063 = vmatmul.mubr.bf16.gmra.mrb[4].mxu0 %v5711_v7  ;;  %3134 = vmatpush1.bf16.msra.mxu1 %v5712_v8  ;;  %v5805_v7 = vld [vmem:[%s8608_s1 + $0x550] ss:$56 sps:$4 sm:$0xff]   ;;  %v5810_v8 = vld [vmem:[%s8608_s1 + $0x4dc] ss:$56 sps:$4 sm:$0xff]  }
  0x50   : > { %3364 = vmatpush1.bf16.msra.mxu0 %v5715_v9  ;;  %3135 = vmatprep.subr.bf16.mxu1 %v5720_v10  ;;  %v5813_v9 = vld [vmem:[%s8608_s1 + $0x5c4] ss:$56 sps:$4 sm:$0xff]  }
  0x51   : > { %3365 = vmatprep.subr.bf16.mxu0 %v5723_v11  ;;  %2949 = vmatprep.mubr.bf16.mxu1 %v6603_v12  ;;  %v6778_v10 = vld [vmem:[%s6494_s21 + $0xc4] ss:$16 sps:$4 sm:$0xff]   ;;  %v5816_v11 = vld [vmem:[%s6494_s21 + $0xec] ss:$16 sps:$4 sm:$0xff]  }
  0x52   : > { %5317 = vmatprep.mubr.msk.bf16.mxu0 %vm2882_vm0, %v5726_v13  ;;  %v5808_v13 = vld [vmem:[%s8608_s1 + $0x4d8] ss:$56 sps:$4 sm:$0xff]  }
  0x53   : > { %3136 = vmatpush1.bf16.msra.mxu1 %v5718_v14  ;;  %v5811_v14 = vld [vmem:[%s8608_s1 + $0x5c0] ss:$56 sps:$4 sm:$0xff]  }
  0x54   : > { %3366 = vmatpush1.bf16.msra.mxu0 %v5721_v15  ;;  %3137 = vmatprep.subr.bf16.mxu1 %v5732_v16  ;;  %v5822_v15 = vld [vmem:[%s8608_s1 + $0x54c] ss:$56 sps:$4 sm:$0xff]  }
  0x55   : > { %3367 = vmatprep.subr.bf16.mxu0 %v5735_v17  ;;  %v5825_v16 = vld [vmem:[%s8608_s1 + $0x634] ss:$56 sps:$4 sm:$0xff]   ;;  %v6797_v17 = vld [vmem:[%s6494_s21 + $0xc0] ss:$16 sps:$4 sm:$0xff]  }
  0x56   : > { %2950 = vmatmul.mubr.bf16.gmra.mrb[4].mxu1 %v6622_v18 }
  0x57   : > { %3073 = vmatmul.mubr.bf16.gmra.mrb[8].mxu0 %v5729_v19  ;;  %3138 = vmatpush1.bf16.msra.mxu1 %v5730_v20  ;;  %v5819_v19 = vld [vmem:[%s6494_s21 + $0xe8] ss:$16 sps:$4 sm:$0xff]  }
  0x58   : > { %3368 = vmatpush1.bf16.msra.mxu0 %v5733_v21  ;;  %3139 = vmatprep.subr.bf16.mxu1 %v5738_v22  ;;  %v5820_v20 = vld [vmem:[%s8608_s1 + $0x548] ss:$56 sps:$4 sm:$0xff]   ;;  %v5828_v22 = vld [vmem:[%s8608_s1 + $0x5bc] ss:$56 sps:$4 sm:$0xff]  }
  0x59   : > { %3369 = vmatprep.subr.bf16.mxu0 %v5741_v23  ;;  %2959 = vmatprep.mubr.bf16.mxu1 %v6638_v24  ;;  %v5823_v21 = vld [vmem:[%s8608_s1 + $0x630] ss:$56 sps:$4 sm:$0xff]   ;;  %v5831_v23 = vld [vmem:[%s8608_s1 + $0x6a4] ss:$56 sps:$4 sm:$0xff]  }
  0x5a   : > { %5318 = vmatprep.mubr.msk.bf16.mxu0 %vm2882_vm0, %v5744_v25  ;;  %v6813_v25 = vld [vmem:[%s6494_s21 + $0xe4] ss:$16 sps:$4 sm:$0xff]  }
  0x5b   : > { %3140 = vmatpush1.bf16.msra.mxu1 %v5736_v26  ;;  %v5826_v26 = vld [vmem:[%s8608_s1 + $0x5b8] ss:$56 sps:$4 sm:$0xff]  }
  0x5c   : > { %3370 = vmatpush1.bf16.msra.mxu0 %v5739_v27  ;;  %3141 = vmatprep.subr.bf16.mxu1 %v5750_v28  ;;  %v5829_v27 = vld [vmem:[%s8608_s1 + $0x6a0] ss:$56 sps:$4 sm:$0xff]   ;;  %v5837_v28 = vld [vmem:[%s8608_s1 + $0x62c] ss:$56 sps:$4 sm:$0xff]  }
  0x5d   : > { %3371 = vmatprep.subr.bf16.mxu0 %v5753_v29  ;;  %v5846_v29 = vld [vmem:[%s8608_s1 + $0x714] ss:$56 sps:$4 sm:$0xff]  }
  0x5e   : > { %2960 = vmatmul.mubr.bf16.gmra.mrb[8].mxu1 %v6657_v30 }
  0x5f   : > { %3083 = vmatmul.mubr.bf16.gmra.mrb[12].mxu0 %v5747_v31  ;;  %3142 = vmatpush1.bf16.msra.mxu1 %v5748_v32  ;;  %v6831_v31 = vld [vmem:[%s6494_s21 + $0xe0] ss:$16 sps:$4 sm:$0xff]  }
  0x60   : > { %3372 = vmatpush1.bf16.msra.mxu0 %v5751_v33  ;;  %3143 = vmatprep.subr.bf16.mxu1 %v5756_v34  ;;  %v5835_v32 = vld [vmem:[%s8608_s1 + $0x628] ss:$56 sps:$4 sm:$0xff]   ;;  %v5840_v33 = vld [vmem:[%s8608_s1 + $0x69c] ss:$56 sps:$4 sm:$0xff]  }
  0x61   : > { %3373 = vmatprep.subr.bf16.mxu0 %v5759_v35  ;;  %2969 = vmatprep.mubr.bf16.mxu1 %v6673_v36  ;;  %v5844_v34 = vld [vmem:[%s8608_s1 + $0x710] ss:$56 sps:$4 sm:$0xff]   ;;  %v5849_v35 = vld [vmem:[%s8608_s1 + $0x784] ss:$56 sps:$4 sm:$0xff]  }
  0x62   : > { %5319 = vmatprep.mubr.msk.bf16.mxu0 %vm2882_vm0, %v5762_v37  ;;  %v5838_v37 = vld [vmem:[%s8608_s1 + $0x698] ss:$56 sps:$4 sm:$0xff]  }
  0x63   : > { %3144 = vmatpush1.bf16.msra.mxu1 %v5754_v38  ;;  %v5843_v38 = vld [vmem:[%s8608_s1 + $0x70c] ss:$56 sps:$4 sm:$0xff]  }
  0x64   : > { %3374 = vmatpush1.bf16.msra.mxu0 %v5757_v39  ;;  %3145 = vmatprep.subr.bf16.mxu1 %v5768_v40  ;;  %v5847_v39 = vld [vmem:[%s8608_s1 + $0x780] ss:$56 sps:$4 sm:$0xff]  }
  0x65   : > { %3375 = vmatprep.subr.bf16.mxu0 %v5771_v41  ;;  %v5841_v40 = vld [vmem:[%s8608_s1 + $0x708] ss:$56 sps:$4 sm:$0xff]   ;;  %v5855_v41 = vld [vmem:[%s8608_s1 + $0x7f4] ss:$56 sps:$4 sm:$0xff]  }
  0x66   : > { %2970 = vmatmul.mubr.bf16.gmra.mrb[12].mxu1 %v6692_v42 }
  0x67   : > { %3093 = vmatmul.mubr.bf16.gmra.mrb[16].mxu0 %v5765_v43  ;;  %3146 = vmatpush1.bf16.msra.mxu1 %v5766_v44  ;;  %v5850_v43 = vld [vmem:[%s8608_s1 + $0x778] ss:$56 sps:$4 sm:$0xff]  }
  0x68   : > { %3376 = vmatpush1.bf16.msra.mxu0 %v5769_v45  ;;  %3147 = vmatprep.subr.bf16.mxu1 %v5774_v46  ;;  %v5853_v44 = vld [vmem:[%s8608_s1 + $0x7f0] ss:$56 sps:$4 sm:$0xff]   ;;  %v5861_v45 = vld [vmem:[%s8608_s1 + $0x864] ss:$56 sps:$4 sm:$0xff]  }
  0x69   : > { %3377 = vmatprep.subr.bf16.mxu0 %v5777_v47  ;;  %2979 = vmatprep.mubr.bf16.mxu1 %v6708_v48  ;;  %v5856_v46 = vld [vmem:[%s8608_s1 + $0x7e8] ss:$56 sps:$4 sm:$0xff]   ;;  %v5864_v47 = vld [vmem:[%s8608_s1 + $0x85c] ss:$56 sps:$4 sm:$0xff]  }
  0x6a   : > { %5320 = vmatprep.mubr.msk.bf16.mxu0 %vm2882_vm0, %v5780_v49  ;;  %v5867_v49 = vld [vmem:[%s8608_s1 + $0x8d4] ss:$56 sps:$4 sm:$0xff]  }
  0x6b   : > { %3148 = vmatpush1.bf16.msra.mxu1 %v5772_v51  ;;  %v5862_v51 = vld [vmem:[%s8608_s1 + $0x858] ss:$56 sps:$4 sm:$0xff]  }
  0x6c   : > { %3378 = vmatpush1.bf16.msra.mxu0 %v5775_v52  ;;  %3149 = vmatprep.subr.bf16.mxu1 %v5786_v53  ;;  %v5865_v52 = vld [vmem:[%s8608_s1 + $0x8d0] ss:$56 sps:$4 sm:$0xff]   ;;  %v5870_v53 = vld [vmem:[%s8608_s1 + $0x8cc] ss:$56 sps:$4 sm:$0xff]  }
  0x6d   : > { %3379 = vmatprep.subr.bf16.mxu0 %v5789_v54  ;;  %v5868_v54 = vld [vmem:[%s8608_s1 + $0x8c8] ss:$56 sps:$4 sm:$0xff]  }
  0x6e   : > { %2980 = vmatmul.mubr.bf16.gmra.mrb[16].mxu1 %v6727_v55 }
  0x6f   : > { %3103 = vmatmul.mubr.bf16.gmra.mrb[20].mxu0 %v5783_v56  ;;  %3150 = vmatpush1.bf16.msra.mxu1 %v5784_v57  ;;  %v5871_v56 = vld [vmem:[%s8608_s1 + $0x940] ss:$56 sps:$4 sm:$0xff]   ;;  %v5879_v57 = vld [vmem:[%s8608_s1 + $0x9b4] ss:$56 sps:$4 sm:$0xff]  }
  0x70   : > { %3380 = vmatpush1.bf16.msra.mxu0 %v5787_v58  ;;  %3151 = vmatprep.subr.bf16.mxu1 %v5792_v59  ;;  %v5874_v58 = vld [vmem:[%s8608_s1 + $0x938] ss:$56 sps:$4 sm:$0xff]  }
  0x71   : > { %3381 = vmatprep.subr.bf16.mxu0 %v5795_v60  ;;  %2989 = vmatprep.mubr.bf16.mxu1 %v6743_v61  ;;  %v5877_v59 = vld [vmem:[%s8608_s1 + $0x9b0] ss:$56 sps:$4 sm:$0xff]   ;;  %v5882_v60 = vld [vmem:[%s8608_s1 + $0x9ac] ss:$56 sps:$4 sm:$0xff]  }
  0x72   : > { %5321 = vmatprep.mubr.msk.bf16.mxu0 %vm2882_vm0, %v5798_v62  ;;  %v5880_v62 = vld [vmem:[%s8608_s1 + $0x9a8] ss:$56 sps:$4 sm:$0xff]  }
  0x73   : > { %3152 = vmatpush1.bf16.msra.mxu1 %v5790_v63  ;;  %v5883_v63 = vld [vmem:[%s8608_s1 + $0xa20] ss:$56 sps:$4 sm:$0xff]  }
  0x74   : > { %3382 = vmatpush1.bf16.msra.mxu0 %v5793_v0  ;;  %3153 = vmatprep.subr.bf16.mxu1 %v5804_v1  ;;  %v5891_v0 = vld [vmem:[%s8608_s1 + $0xa94] ss:$56 sps:$4 sm:$0xff]   ;;  %v5886_v1 = vld [vmem:[%s8608_s1 + $0xa18] ss:$56 sps:$4 sm:$0xff]  }
  0x75   : > { %3383 = vmatprep.subr.bf16.mxu0 %v5807_v2  ;;  %v5889_v2 = vld [vmem:[%s8608_s1 + $0xa90] ss:$56 sps:$4 sm:$0xff]  }
  0x76   : > { %2990 = vmatmul.mubr.bf16.gmra.mrb[20].mxu1 %v6762_v3 }
  0x77   : > { %3113 = vmatmul.mubr.bf16.gmra.mrb[24].mxu0 %v5801_v4  ;;  %3154 = vmatpush1.bf16.msra.mxu1 %v5802_v5  ;;  %v5894_v4 = vld [vmem:[%s8608_s1 + $0xb04] ss:$56 sps:$4 sm:$0xff]   ;;  %v5892_v5 = vld [vmem:[%s8608_s1 + $0xb00] ss:$56 sps:$4 sm:$0xff]  }
  0x78   : > { %3384 = vmatpush1.bf16.msra.mxu0 %v5805_v7  ;;  %3155 = vmatprep.subr.bf16.mxu1 %v5810_v8  ;;  %v5895_v7 = vld [vmem:[%s8608_s1 + $0xa88] ss:$56 sps:$4 sm:$0xff]   ;;  %v5903_v8 = vld [vmem:[%s8608_s1 + $0xafc] ss:$56 sps:$4 sm:$0xff]  }
  0x79   : > { %3385 = vmatprep.subr.bf16.mxu0 %v5813_v9  ;;  %2999 = vmatprep.mubr.bf16.mxu1 %v6778_v10  ;;  %v5898_v9 = vld [vmem:[%s8608_s1 + $0xb70] ss:$56 sps:$4 sm:$0xff]  }
  0x7a   : > { %5322 = vmatprep.mubr.msk.bf16.mxu0 %vm2882_vm0, %v5816_v11  ;;  %v5901_v11 = vld [vmem:[%s8608_s1 + $0xaf8] ss:$56 sps:$4 sm:$0xff]  }
  0x7b   : > { %3156 = vmatpush1.bf16.msra.mxu1 %v5808_v13  ;;  %v5906_v13 = vld [vmem:[%s8608_s1 + $0xbe4] ss:$56 sps:$4 sm:$0xff]  }
  0x7c   : > { %3386 = vmatpush1.bf16.msra.mxu0 %v5811_v14  ;;  %3157 = vmatprep.subr.bf16.mxu1 %v5822_v15  ;;  %v5904_v14 = vld [vmem:[%s8608_s1 + $0xbe0] ss:$56 sps:$4 sm:$0xff]  }
  0x7d   : > { %3387 = vmatprep.subr.bf16.mxu0 %v5825_v16  ;;  %v5907_v15 = vld [vmem:[%s8608_s1 + $0xb68] ss:$56 sps:$4 sm:$0xff]   ;;  %v5915_v16 = vld [vmem:[%s8608_s1 + $0xbdc] ss:$56 sps:$4 sm:$0xff]  }
  0x7e   : > { %3000 = vmatmul.mubr.bf16.gmra.mrb[24].mxu1 %v6797_v17 }
  0x7f   : > { %3123 = vmatmul.mubr.bf16.gmra.mrb[28].mxu0 %v5819_v19  ;;  %3158 = vmatpush1.bf16.msra.mxu1 %v5820_v20  ;;  %v5910_v19 = vld [vmem:[%s8608_s1 + $0xc50] ss:$56 sps:$4 sm:$0xff]  }
  0x80   : > { %3388 = vmatpush1.bf16.msra.mxu0 %v5823_v21  ;;  %3159 = vmatprep.subr.bf16.mxu1 %v5828_v22  ;;  %v5913_v20 = vld [vmem:[%s8608_s1 + $0xbd8] ss:$56 sps:$4 sm:$0xff]   ;;  %v5921_v21 = vld [vmem:[%s8608_s1 + $0xc4c] ss:$56 sps:$4 sm:$0xff]   ;;  %v5919_v22 = vld [vmem:[%s8608_s1 + $0xc48] ss:$56 sps:$4 sm:$0xff]  }
  0x81   : > { %3389 = vmatprep.subr.bf16.mxu0 %v5831_v23  ;;  %3009 = vmatprep.mubr.bf16.mxu1 %v6813_v25  ;;  %v5924_v23 = vld [vmem:[%s8608_s1 + $0x24] ss:$56 sps:$4 sm:$0xff]  }
  0x82   : > { %3391 = vmatprep.mubr.bf16.mxu0 %v6529_v50 }
  0x83   : > { %3160 = vmatpush1.bf16.msra.mxu1 %v5826_v26  ;;  %v5927_v26 = vld [vmem:[%s8608_s1 + $0xcbc] ss:$56 sps:$4 sm:$0xff]  }
  0x84   : > { %3390 = vmatpush1.bf16.msra.mxu0 %v5829_v27  ;;  %3161 = vmatprep.subr.bf16.mxu1 %v5837_v28  ;;  %v6285_v27 = vld [vmem:[%s6494_s21 + $0xc] ss:$16 sps:$4 sm:$0xff]   ;;  %v5925_v28 = vld [vmem:[%s8608_s1 + $0xcb8] ss:$56 sps:$4 sm:$0xff]  }
  0x85   : > { %3472 = vmatprep.subr.bf16.mxu0 %v5846_v29  ;;  %v5922_v29 = vld [vmem:[%s8608_s1 + $0x20] ss:$56 sps:$4 sm:$0xff]  }
  0x86   : > { %3010 = vmatmul.mubr.bf16.gmra.mrb[28].mxu1 %v6831_v31 }
  0x87   : > { %3392 = vmatmul.mubr.bf16.vlgmr.msra.gmra.mrb[32].mxu0 %v6587_v6  ;;  %3162 = vmatpush1.bf16.msra.mxu1 %v5835_v32  ;;  %v6286_v32 = vld [vmem:[%s6494_s21 + $0x8] ss:$16 sps:$4 sm:$0xff]  }
  0x88   : > { %3165 = vmatprep.mubr.bf16.mxu1 %v6529_v50  ;;  %3163 = vmatprep.subr.bf16.mxu1 %v5840_v33  ;;  %v5852_v50 = vld [vmem:[%s8608_s1 + $0x77c] ss:$56 sps:$4 sm:$0xff]   ;;  %v5928_v33 = vld [vmem:[%s8608_s1 + $0x90] ss:$56 sps:$4 sm:$0xff]  }
  0x89   : > { %3401 = vmatprep.mubr.bf16.mxu0 %v6603_v12  ;;  %3473 = vmatpush1.bf16.msra.mxu0 %v5844_v34  ;;  %v6287_v34 = vld [vmem:[%s6494_s21 + $0x2c] ss:$16 sps:$4 sm:$0xff]  }
  0x8a   : > { %3474 = vmatprep.subr.bf16.mxu0 %v5849_v35  ;;  %v5936_v35 = vld [vmem:[%s8608_s1 + $0x104] ss:$56 sps:$4 sm:$0xff]  }
  0x8b   : > { %3164 = vmatpush1.bf16.msra.mxu1 %v5838_v37  ;;  %v5934_v37 = vld [vmem:[%s8608_s1 + $0x100] ss:$56 sps:$4 sm:$0xff]  }
  0x8c   : > { %3246 = vmatprep.subr.bf16.mxu1 %v5843_v38  ;;  %v5939_v38 = vld [vmem:[%s8608_s1 + $0x8c] ss:$56 sps:$4 sm:$0xff]  }
  0x8d   : > { %3475 = vmatpush1.bf16.msra.mxu0 %v5847_v39  ;;  %v5942_v39 = vld [vmem:[%s8608_s1 + $0x174] ss:$56 sps:$4 sm:$0xff]  }
  0x8e   : > { %3166 = vmatmul.mubr.bf16.vlgmr.msra.gmra.mrb[32].mxu1 %v6587_v6  ;;  %v5858_v6 = vld [vmem:[%s8608_s1 + $0x7ec] ss:$56 sps:$4 sm:$0xff]   ;;  %3476 = vmatprep.subr.bf16.mxu0 %v5855_v41  ;;  %v5940_v41 = vld [vmem:[%s8608_s1 + $0x170] ss:$56 sps:$4 sm:$0xff]  }
  0x8f   : > { %3402 = vmatmul.mubr.bf16.gmra.mrb[36].mxu0 %v6622_v18  ;;  %3247 = vmatpush1.bf16.msra.mxu1 %v5841_v40  ;;  %v6288_v40 = vld [vmem:[%s6494_s21 + $0x28] ss:$16 sps:$4 sm:$0xff]  }
  0x90   : > { %3175 = vmatprep.mubr.bf16.mxu1 %v6603_v12  ;;  %3248 = vmatprep.subr.bf16.mxu1 %v5852_v50  ;;  %v5859_v12 = vld [vmem:[%s8608_s1 + $0x860] ss:$56 sps:$4 sm:$0xff]  }
  0x91   : > { %3411 = vmatprep.mubr.bf16.mxu0 %v6638_v24  ;;  %3477 = vmatpush1.bf16.msra.mxu0 %v5853_v44  ;;  %v5937_v50 = vld [vmem:[%s8608_s1 + $0x88] ss:$56 sps:$4 sm:$0xff]   ;;  %v5948_v44 = vld [vmem:[%s8608_s1 + $0x1e4] ss:$56 sps:$4 sm:$0xff]  }
  0x92   : > { %3478 = vmatprep.subr.bf16.mxu0 %v5861_v45  ;;  %v6289_v45 = vld [vmem:[%s6494_s21 + $0x4c] ss:$16 sps:$4 sm:$0xff]  }
  0x93   : > { %3249 = vmatpush1.bf16.msra.mxu1 %v5850_v43  ;;  %v5945_v43 = vld [vmem:[%s8608_s1 + $0xfc] ss:$56 sps:$4 sm:$0xff]  }
  0x94   : > { %3250 = vmatprep.subr.bf16.mxu1 %v5858_v6  ;;  %v5943_v6 = vld [vmem:[%s8608_s1 + $0xf8] ss:$56 sps:$4 sm:$0xff]  }
  0x95   : > { %3479 = vmatpush1.bf16.msra.mxu0 %v5859_v12  ;;  %v5951_v12 = vld [vmem:[%s8608_s1 + $0x16c] ss:$56 sps:$4 sm:$0xff]  }
  0x96   : > { %3176 = vmatmul.mubr.bf16.gmra.mrb[36].mxu1 %v6622_v18  ;;  %v5873_v18 = vld [vmem:[%s8608_s1 + $0x944] ss:$56 sps:$4 sm:$0xff]   ;;  %3480 = vmatprep.subr.bf16.mxu0 %v5867_v49  ;;  %v6290_v49 = vld [vmem:[%s6494_s21 + $0x48] ss:$16 sps:$4 sm:$0xff]  }
  0x97   : > { %3412 = vmatmul.mubr.bf16.gmra.mrb[40].mxu0 %v6657_v30  ;;  %3251 = vmatpush1.bf16.msra.mxu1 %v5856_v46  ;;  %v5946_v46 = vld [vmem:[%s8608_s1 + $0x1e0] ss:$56 sps:$4 sm:$0xff]  }
  0x98   : > { %3252 = vmatprep.subr.bf16.mxu1 %v5864_v47  ;;  %3185 = vmatprep.mubr.bf16.mxu1 %v6638_v24  ;;  %v5876_v24 = vld [vmem:[%s8608_s1 + $0x93c] ss:$56 sps:$4 sm:$0xff]  }
  0x99   : > { %3421 = vmatprep.mubr.bf16.mxu0 %v6673_v36  ;;  %3481 = vmatpush1.bf16.msra.mxu0 %v5865_v52  ;;  %v5954_v47 = vld [vmem:[%s8608_s1 + $0x254] ss:$56 sps:$4 sm:$0xff]   ;;  %v5952_v52 = vld [vmem:[%s8608_s1 + $0x250] ss:$56 sps:$4 sm:$0xff]  }
  0x9a   : > { %3482 = vmatprep.subr.bf16.mxu0 %v5873_v18  ;;  %v5960_v18 = vld [vmem:[%s8608_s1 + $0x2c4] ss:$56 sps:$4 sm:$0xff]  }
  0x9b   : > { %3253 = vmatpush1.bf16.msra.mxu1 %v5862_v51  ;;  %v5949_v51 = vld [vmem:[%s8608_s1 + $0x168] ss:$56 sps:$4 sm:$0xff]  }
  0x9c   : > { %3254 = vmatprep.subr.bf16.mxu1 %v5870_v53  ;;  %v5957_v53 = vld [vmem:[%s8608_s1 + $0x1dc] ss:$56 sps:$4 sm:$0xff]  }
  0x9d   : > { %3483 = vmatpush1.bf16.msra.mxu0 %v5871_v56  ;;  %v5955_v56 = vld [vmem:[%s8608_s1 + $0x1d8] ss:$56 sps:$4 sm:$0xff]  }
  0x9e   : > { %3186 = vmatmul.mubr.bf16.gmra.mrb[40].mxu1 %v6657_v30  ;;  %v5885_v30 = vld [vmem:[%s8608_s1 + $0xa24] ss:$56 sps:$4 sm:$0xff]   ;;  %3484 = vmatprep.subr.bf16.mxu0 %v5879_v57 }
  0x9f   : > { %3422 = vmatmul.mubr.bf16.gmra.mrb[44].mxu0 %v6692_v42  ;;  %3255 = vmatpush1.bf16.msra.mxu1 %v5868_v54  ;;  %v6291_v54 = vld [vmem:[%s6494_s21 + $0x6c] ss:$16 sps:$4 sm:$0xff]  }
  0xa0   : > { %3195 = vmatprep.mubr.bf16.mxu1 %v6673_v36  ;;  %3256 = vmatprep.subr.bf16.mxu1 %v5876_v24  ;;  %v5888_v36 = vld [vmem:[%s8608_s1 + $0xa1c] ss:$56 sps:$4 sm:$0xff]   ;;  %v5958_v24 = vld [vmem:[%s8608_s1 + $0x2c0] ss:$56 sps:$4 sm:$0xff]   ;;  %v5963_v57 = vld [vmem:[%s8608_s1 + $0x24c] ss:$56 sps:$4 sm:$0xff]  }
  0xa1   : > { %3431 = vmatprep.mubr.bf16.mxu0 %v6708_v48  ;;  %3485 = vmatpush1.bf16.msra.mxu0 %v5877_v59  ;;  %v6292_v59 = vld [vmem:[%s6494_s21 + $0x68] ss:$16 sps:$4 sm:$0xff]  }
  0xa2   : > { %3486 = vmatprep.subr.bf16.mxu0 %v5885_v30  ;;  %v5964_v30 = vld [vmem:[%s8608_s1 + $0x330] ss:$56 sps:$4 sm:$0xff]  }
  0xa3   : > { %3257 = vmatpush1.bf16.msra.mxu1 %v5874_v58  ;;  %v5966_v58 = vld [vmem:[%s8608_s1 + $0x334] ss:$56 sps:$4 sm:$0xff]  }
  0xa4   : > { %3258 = vmatprep.subr.bf16.mxu1 %v5882_v60  ;;  %v5961_v60 = vld [vmem:[%s8608_s1 + $0x248] ss:$56 sps:$4 sm:$0xff]  }
  0xa5   : > { %3487 = vmatpush1.bf16.msra.mxu0 %v5883_v63  ;;  %v5972_v63 = vld [vmem:[%s8608_s1 + $0x3a4] ss:$56 sps:$4 sm:$0xff]  }
  0xa6   : > { %3196 = vmatmul.mubr.bf16.gmra.mrb[44].mxu1 %v6692_v42  ;;  %v5897_v42 = vld [vmem:[%s8608_s1 + $0xa8c] ss:$56 sps:$4 sm:$0xff]   ;;  %3488 = vmatprep.subr.bf16.mxu0 %v5891_v0  ;;  %v5967_v0 = vld [vmem:[%s8608_s1 + $0x2b8] ss:$56 sps:$4 sm:$0xff]  }
  0xa7   : > { %3432 = vmatmul.mubr.bf16.gmra.mrb[48].mxu0 %v6727_v55  ;;  %3259 = vmatpush1.bf16.msra.mxu1 %v5880_v62  ;;  %v5969_v62 = vld [vmem:[%s8608_s1 + $0x2bc] ss:$56 sps:$4 sm:$0xff]  }
  0xa8   : > { %3205 = vmatprep.mubr.bf16.mxu1 %v6708_v48  ;;  %3441 = vmatprep.mubr.bf16.mxu0 %v6743_v61  ;;  %v5900_v48 = vld [vmem:[%s8608_s1 + $0xb74] ss:$56 sps:$4 sm:$0xff]  }
  0xa9   : > { %3260 = vmatprep.subr.bf16.mxu1 %v5888_v36  ;;  %3489 = vmatpush1.bf16.msra.mxu0 %v5889_v2  ;;  %v6293_v36 = vld [vmem:[%s6494_s21 + $0x8c] ss:$16 sps:$4 sm:$0xff]  }
  0xaa   : > { %3490 = vmatprep.subr.bf16.mxu0 %v5894_v4  ;;  %v5975_v2 = vld [vmem:[%s8608_s1 + $0x32c] ss:$56 sps:$4 sm:$0xff]  }
  0xab   : > { %3261 = vmatpush1.bf16.msra.mxu1 %v5886_v1  ;;  %v5970_v1 = vld [vmem:[%s8608_s1 + $0x3a0] ss:$56 sps:$4 sm:$0xff]   ;;  %v5978_v4 = vld [vmem:[%s8608_s1 + $0x414] ss:$56 sps:$4 sm:$0xff]  }
  0xac   : > { %3262 = vmatprep.subr.bf16.mxu1 %v5897_v42  ;;  %v6294_v42 = vld [vmem:[%s6494_s21 + $0x88] ss:$16 sps:$4 sm:$0xff]  }
  0xad   : > { %3491 = vmatpush1.bf16.msra.mxu0 %v5892_v5  ;;  %v5973_v5 = vld [vmem:[%s8608_s1 + $0x328] ss:$56 sps:$4 sm:$0xff]  }
  0xae   : > { %3206 = vmatmul.mubr.bf16.gmra.mrb[48].mxu1 %v6727_v55  ;;  %v5909_v55 = vld [vmem:[%s8608_s1 + $0xb6c] ss:$56 sps:$4 sm:$0xff]   ;;  %3492 = vmatprep.subr.bf16.mxu0 %v5900_v48  ;;  %v5981_v48 = vld [vmem:[%s8608_s1 + $0x39c] ss:$56 sps:$4 sm:$0xff]  }
  0xaf   : > { %3442 = vmatmul.mubr.bf16.gmra.mrb[52].mxu0 %v6762_v3  ;;  %3263 = vmatpush1.bf16.msra.mxu1 %v5895_v7  ;;  %v5976_v7 = vld [vmem:[%s8608_s1 + $0x410] ss:$56 sps:$4 sm:$0xff]  }
  0xb0   : > { %3215 = vmatprep.mubr.bf16.mxu1 %v6743_v61  ;;  %3451 = vmatprep.mubr.bf16.mxu0 %v6778_v10  ;;  %v5912_v61 = vld [vmem:[%s8608_s1 + $0xc54] ss:$56 sps:$4 sm:$0xff]  }
  0xb1   : > { %3264 = vmatprep.subr.bf16.mxu1 %v5903_v8  ;;  %3493 = vmatpush1.bf16.msra.mxu0 %v5898_v9  ;;  %v5984_v8 = vld [vmem:[%s8608_s1 + $0x484] ss:$56 sps:$4 sm:$0xff]  }
  0xb2   : > { %3494 = vmatprep.subr.bf16.mxu0 %v5906_v13  ;;  %v6295_v9 = vld [vmem:[%s6494_s21 + $0xac] ss:$16 sps:$4 sm:$0xff]   ;;  %v5982_v13 = vld [vmem:[%s8608_s1 + $0x480] ss:$56 sps:$4 sm:$0xff]  }
  0xb3   : > { %3265 = vmatpush1.bf16.msra.mxu1 %v5901_v11  ;;  %v5979_v11 = vld [vmem:[%s8608_s1 + $0x398] ss:$56 sps:$4 sm:$0xff]  }
  0xb4   : > { %3266 = vmatprep.subr.bf16.mxu1 %v5909_v55  ;;  %v5987_v55 = vld [vmem:[%s8608_s1 + $0x40c] ss:$56 sps:$4 sm:$0xff]  }
  0xb5   : > { %3495 = vmatpush1.bf16.msra.mxu0 %v5904_v14  ;;  %v5990_v14 = vld [vmem:[%s8608_s1 + $0x4f4] ss:$56 sps:$4 sm:$0xff]  }
  0xb6   : > { %3216 = vmatmul.mubr.bf16.gmra.mrb[52].mxu1 %v6762_v3  ;;  %v5918_v3 = vld [vmem:[%s8608_s1 + $0xcc4] ss:$56 sps:$4 sm:$0xff]   ;;  %3496 = vmatprep.subr.bf16.mxu0 %v5912_v61  ;;  %v5985_v61 = vld [vmem:[%s8608_s1 + $0x408] ss:$56 sps:$4 sm:$0xff]  }
  0xb7   : > { %3452 = vmatmul.mubr.bf16.gmra.mrb[56].mxu0 %v6797_v17  ;;  %3225 = vmatprep.mubr.bf16.mxu1 %v6778_v10  ;;  %v5916_v10 = vld [vmem:[%s8608_s1 + $0xcc0] ss:$56 sps:$4 sm:$0xff]  }
  0xb8   : > { %3267 = vmatpush1.bf16.msra.mxu1 %v5907_v15  ;;  %3461 = vmatprep.mubr.bf16.mxu0 %v6813_v25  ;;  %v6296_v15 = vld [vmem:[%s6494_s21 + $0xa8] ss:$16 sps:$4 sm:$0xff]  }
  0xb9   : > { %3268 = vmatprep.subr.bf16.mxu1 %v5915_v16  ;;  %3497 = vmatpush1.bf16.msra.mxu0 %v5910_v19  ;;  %v5988_v16 = vld [vmem:[%s8608_s1 + $0x4f0] ss:$56 sps:$4 sm:$0xff]   ;;  %v5993_v19 = vld [vmem:[%s8608_s1 + $0x47c] ss:$56 sps:$4 sm:$0xff]  }
  0xba   : > { %3498 = vmatprep.subr.bf16.mxu0 %v5918_v3  ;;  %v6297_v3 = vld [vmem:[%s6494_s21 + $0xcc] ss:$16 sps:$4 sm:$0xff]  }
  0xbc   : > { %3269 = vmatpush1.bf16.msra.mxu1 %v5913_v20  ;;  %v5996_v20 = vld [vmem:[%s8608_s1 + $0x564] ss:$56 sps:$4 sm:$0xff]  }
  0xbd   : > { %3270 = vmatprep.subr.bf16.mxu1 %v5921_v21  ;;  %3499 = vmatpush1.bf16.msra.mxu0 %v5916_v10  ;;  %v5991_v21 = vld [vmem:[%s8608_s1 + $0x478] ss:$56 sps:$4 sm:$0xff]  }
  0xbe   : > { %3226 = vmatmul.mubr.bf16.gmra.mrb[56].mxu1 %v6797_v17  ;;  %3811 = vmatprep.subr.bf16.mxu0 %v5924_v23  ;;  %v5933_v17 = vld [vmem:[%s8608_s1 + $0x1c] ss:$56 sps:$4 sm:$0xff]   ;;  %v5994_v10 = vld [vmem:[%s8608_s1 + $0x560] ss:$56 sps:$4 sm:$0xff]  }
  0xbf   : > { %3462 = vmatmul.mubr.bf16.gmra.mrb[60].mxu0 %v6831_v31  ;;  %3235 = vmatprep.mubr.bf16.mxu1 %v6813_v25  ;;  %v5930_v25 = vld [vmem:[%s8608_s1 + $0x94] ss:$56 sps:$4 sm:$0xff]  }
  0xc0   : > { %5331 = vmatprep.mubr.msk.bf16.mxu0 %vm2882_vm0, %v6285_v27  ;;  %3271 = vmatpush1.bf16.msra.mxu1 %v5919_v22  ;;  %v5999_v22 = vld [vmem:[%s8608_s1 + $0x4ec] ss:$56 sps:$4 sm:$0xff]  }
  0xc1   : > { %3272 = vmatprep.subr.bf16.mxu1 %v5927_v26  ;;  %v6002_v23 = vld [vmem:[%s8608_s1 + $0x5d4] ss:$56 sps:$4 sm:$0xff]   ;;  %v6298_v26 = vld [vmem:[%s6494_s21 + $0xc8] ss:$16 sps:$4 sm:$0xff]  }
  0xc4   : > { %3273 = vmatpush1.bf16.msra.mxu1 %v5925_v28  ;;  %v6000_v28 = vld [vmem:[%s8608_s1 + $0x5d0] ss:$56 sps:$4 sm:$0xff]  }
  0xc5   : > { %3585 = vmatprep.subr.bf16.mxu1 %v5933_v17  ;;  %v6005_v17 = vld [vmem:[%s8608_s1 + $0x55c] ss:$56 sps:$4 sm:$0xff]  }
  0xc6   : > { %3236 = vmatmul.mubr.bf16.gmra.mrb[60].mxu1 %v6831_v31  ;;  %v5931_v31 = vld [vmem:[%s8608_s1 + $0x18] ss:$56 sps:$4 sm:$0xff]  }
  0xc7   : > { %3505 = vmatmul.mubr.bf16.vlgmr.msra.gmra.mrb[32].mxu0 %v6286_v32  ;;  %5323 = vmatprep.mubr.msk.bf16.mxu1 %vm2882_vm0, %v6285_v27  ;;  %v5997_v27 = vld [vmem:[%s8608_s1 + $0x4e8] ss:$56 sps:$4 sm:$0xff]  }
  0xc8   : > { %3812 = vmatpush1.bf16.msra.mxu0 %v5922_v29  ;;  %5332 = vmatprep.mubr.msk.bf16.mxu0 %vm2882_vm0, %v6287_v34  ;;  %v6008_v29 = vld [vmem:[%s8608_s1 + $0x644] ss:$56 sps:$4 sm:$0xff]  }
  0xc9   : > { %3813 = vmatprep.subr.bf16.mxu0 %v5930_v25  ;;  %v7230_v25 = vld [vmem:[%s6494_s21 + $0xec] ss:$16 sps:$4 sm:$0xff]  }
  0xcc   : > { %3814 = vmatpush1.bf16.msra.mxu0 %v5928_v33  ;;  %v6006_v33 = vld [vmem:[%s8608_s1 + $0x640] ss:$56 sps:$4 sm:$0xff]  }
  0xcd   : > { %3815 = vmatprep.subr.bf16.mxu0 %v5936_v35  ;;  %v6014_v35 = vld [vmem:[%s8608_s1 + $0x6b4] ss:$56 sps:$4 sm:$0xff]  }
  0xce   : > { %3279 = vmatmul.mubr.bf16.vlgmr.msra.gmra.mrb[32].mxu1 %v6286_v32  ;;  %v6003_v32 = vld [vmem:[%s8608_s1 + $0x558] ss:$56 sps:$4 sm:$0xff]  }
  0xcf   : > { %3515 = vmatmul.mubr.bf16.gmra.mrb[36].mxu0 %v6288_v40  ;;  %3586 = vmatpush1.bf16.msra.mxu1 %v5931_v31  ;;  %v7247_v31 = vld [vmem:[%s6494_s21 + $0xe8] ss:$16 sps:$4 sm:$0xff]  }
  0xd0   : > { %3816 = vmatpush1.bf16.msra.mxu0 %v5934_v37  ;;  %3587 = vmatprep.subr.bf16.mxu1 %v5939_v38  ;;  %v6009_v37 = vld [vmem:[%s8608_s1 + $0x5c8] ss:$56 sps:$4 sm:$0xff]  }
  0xd1   : > { %3817 = vmatprep.subr.bf16.mxu0 %v5942_v39  ;;  %5324 = vmatprep.mubr.msk.bf16.mxu1 %vm2882_vm0, %v6287_v34  ;;  %v6011_v34 = vld [vmem:[%s8608_s1 + $0x5cc] ss:$56 sps:$4 sm:$0xff]   ;;  %v6012_v38 = vld [vmem:[%s8608_s1 + $0x6b0] ss:$56 sps:$4 sm:$0xff]   ;;  %v6017_v39 = vld [vmem:[%s8608_s1 + $0x63c] ss:$56 sps:$4 sm:$0xff]  }
  0xd2   : > { %5333 = vmatprep.mubr.msk.bf16.mxu0 %vm2882_vm0, %v6289_v45 }
  0xd3   : > { %3588 = vmatpush1.bf16.msra.mxu1 %v5937_v50  ;;  %v7265_v50 = vld [vmem:[%s6494_s21 + $0x4] ss:$16 sps:$4 sm:$0xff]  }
  0xd4   : > { %3818 = vmatpush1.bf16.msra.mxu0 %v5940_v41  ;;  %3589 = vmatprep.subr.bf16.mxu1 %v5945_v43  ;;  %v6015_v41 = vld [vmem:[%s8608_s1 + $0x638] ss:$56 sps:$4 sm:$0xff]   ;;  %v6020_v43 = vld [vmem:[%s8608_s1 + $0x6ac] ss:$56 sps:$4 sm:$0xff]  }
  0xd5   : > { %3819 = vmatprep.subr.bf16.mxu0 %v5948_v44  ;;  %v6024_v44 = vld [vmem:[%s8608_s1 + $0x720] ss:$56 sps:$4 sm:$0xff]  }
  0xd6   : > { %3289 = vmatmul.mubr.bf16.gmra.mrb[36].mxu1 %v6288_v40  ;;  %v6026_v40 = vld [vmem:[%s8608_s1 + $0x724] ss:$56 sps:$4 sm:$0xff]  }
  0xd7   : > { %3525 = vmatmul.mubr.bf16.gmra.mrb[40].mxu0 %v6290_v49  ;;  %3590 = vmatpush1.bf16.msra.mxu1 %v5943_v6  ;;  %v6029_v6 = vld [vmem:[%s8608_s1 + $0x794] ss:$56 sps:$4 sm:$0xff]  }
  0xd8   : > { %3820 = vmatpush1.bf16.msra.mxu0 %v5946_v46  ;;  %3591 = vmatprep.subr.bf16.mxu1 %v5951_v12  ;;  %v6018_v46 = vld [vmem:[%s8608_s1 + $0x6a8] ss:$56 sps:$4 sm:$0xff]   ;;  %v7290_v12 = vld [vmem:[%s6494_s21 + $0x24] ss:$16 sps:$4 sm:$0xff]  }
  0xd9   : > { %3821 = vmatprep.subr.bf16.mxu0 %v5954_v47  ;;  %5325 = vmatprep.mubr.msk.bf16.mxu1 %vm2882_vm0, %v6289_v45  ;;  %v7279_v45 = vld [vmem:[%s6494_s21] ss:$16 sps:$4 sm:$0xff]   ;;  %v6023_v47 = vld [vmem:[%s8608_s1 + $0x71c] ss:$56 sps:$4 sm:$0xff]  }
  0xda   : > { %5334 = vmatprep.mubr.msk.bf16.mxu0 %vm2882_vm0, %v6291_v54 }
  0xdb   : > { %3592 = vmatpush1.bf16.msra.mxu1 %v5949_v51  ;;  %v6021_v51 = vld [vmem:[%s8608_s1 + $0x718] ss:$56 sps:$4 sm:$0xff]  }
  0xdc   : > { %3822 = vmatpush1.bf16.msra.mxu0 %v5952_v52  ;;  %3593 = vmatprep.subr.bf16.mxu1 %v5957_v53  ;;  %v6032_v52 = vld [vmem:[%s8608_s1 + $0x78c] ss:$56 sps:$4 sm:$0xff]  }
  0xdd   : > { %3823 = vmatprep.subr.bf16.mxu0 %v5960_v18  ;;  %v6035_v53 = vld [vmem:[%s8608_s1 + $0x804] ss:$56 sps:$4 sm:$0xff]   ;;  %v7310_v18 = vld [vmem:[%s6494_s21 + $0x20] ss:$16 sps:$4 sm:$0xff]  }
  0xde   : > { %3299 = vmatmul.mubr.bf16.gmra.mrb[40].mxu1 %v6290_v49  ;;  %v6027_v49 = vld [vmem:[%s8608_s1 + $0x790] ss:$56 sps:$4 sm:$0xff]  }
  0xdf   : > { %3535 = vmatmul.mubr.bf16.gmra.mrb[44].mxu0 %v6292_v59  ;;  %3594 = vmatpush1.bf16.msra.mxu1 %v5955_v56  ;;  %v6033_v56 = vld [vmem:[%s8608_s1 + $0x800] ss:$56 sps:$4 sm:$0xff]  }
  0xe0   : > { %3824 = vmatpush1.bf16.msra.mxu0 %v5958_v24  ;;  %3595 = vmatprep.subr.bf16.mxu1 %v5963_v57  ;;  %v6041_v24 = vld [vmem:[%s8608_s1 + $0x874] ss:$56 sps:$4 sm:$0xff]  }
  0xe1   : > { %3825 = vmatprep.subr.bf16.mxu0 %v5966_v58  ;;  %5326 = vmatprep.mubr.msk.bf16.mxu1 %vm2882_vm0, %v6291_v54  ;;  %v6030_v54 = vld [vmem:[%s8608_s1 + $0x788] ss:$56 sps:$4 sm:$0xff]   ;;  %v7324_v57 = vld [vmem:[%s6494_s21 + $0x44] ss:$16 sps:$4 sm:$0xff]  }
  0xe2   : > { %5335 = vmatprep.mubr.msk.bf16.mxu0 %vm2882_vm0, %v6293_v36  ;;  %v6038_v58 = vld [vmem:[%s8608_s1 + $0x7fc] ss:$56 sps:$4 sm:$0xff]  }
  0xe3   : > { %3596 = vmatpush1.bf16.msra.mxu1 %v5961_v60  ;;  %v6039_v60 = vld [vmem:[%s8608_s1 + $0x870] ss:$56 sps:$4 sm:$0xff]  }
  0xe4   : > { %3826 = vmatpush1.bf16.msra.mxu0 %v5964_v30  ;;  %3597 = vmatprep.subr.bf16.mxu1 %v5969_v62  ;;  %v6044_v30 = vld [vmem:[%s8608_s1 + $0x86c] ss:$56 sps:$4 sm:$0xff]  }
  0xe5   : > { %3827 = vmatprep.subr.bf16.mxu0 %v5972_v63  ;;  %v6047_v62 = vld [vmem:[%s8608_s1 + $0x8e4] ss:$56 sps:$4 sm:$0xff]   ;;  %v7344_v63 = vld [vmem:[%s6494_s21 + $0x40] ss:$16 sps:$4 sm:$0xff]  }
  0xe6   : > { %3309 = vmatmul.mubr.bf16.gmra.mrb[44].mxu1 %v6292_v59  ;;  %v6036_v59 = vld [vmem:[%s8608_s1 + $0x7f8] ss:$56 sps:$4 sm:$0xff]  }
  0xe7   : > { %3545 = vmatmul.mubr.bf16.gmra.mrb[48].mxu0 %v6294_v42  ;;  %3598 = vmatpush1.bf16.msra.mxu1 %v5967_v0  ;;  %v6045_v0 = vld [vmem:[%s8608_s1 + $0x8e0] ss:$56 sps:$4 sm:$0xff]  }
  0xe8   : > { %3828 = vmatpush1.bf16.msra.mxu0 %v5970_v1  ;;  %3599 = vmatprep.subr.bf16.mxu1 %v5975_v2  ;;  %v6050_v1 = vld [vmem:[%s8608_s1 + $0x8dc] ss:$56 sps:$4 sm:$0xff]  }
  0xe9   : > { %3829 = vmatprep.subr.bf16.mxu0 %v5978_v4  ;;  %5327 = vmatprep.mubr.msk.bf16.mxu1 %vm2882_vm0, %v6293_v36  ;;  %v6042_v36 = vld [vmem:[%s8608_s1 + $0x868] ss:$56 sps:$4 sm:$0xff]   ;;  %v6053_v2 = vld [vmem:[%s8608_s1 + $0x954] ss:$56 sps:$4 sm:$0xff]  }
  0xea   : > { %5336 = vmatprep.mubr.msk.bf16.mxu0 %vm2882_vm0, %v6295_v9  ;;  %v7361_v4 = vld [vmem:[%s6494_s21 + $0x64] ss:$16 sps:$4 sm:$0xff]  }
  0xeb   : > { %3600 = vmatpush1.bf16.msra.mxu1 %v5973_v5  ;;  %v6048_v5 = vld [vmem:[%s8608_s1 + $0x8d8] ss:$56 sps:$4 sm:$0xff]  }
  0xec   : > { %3830 = vmatpush1.bf16.msra.mxu0 %v5976_v7  ;;  %3601 = vmatprep.subr.bf16.mxu1 %v5981_v48  ;;  %v6051_v48 = vld [vmem:[%s8608_s1 + $0x950] ss:$56 sps:$4 sm:$0xff]  }
  0xed   : > { %3831 = vmatprep.subr.bf16.mxu0 %v5984_v8 }
  0xee   : > { %3319 = vmatmul.mubr.bf16.gmra.mrb[48].mxu1 %v6294_v42 }
  0xef   : > { %3555 = vmatmul.mubr.bf16.gmra.mrb[52].mxu0 %v6296_v15  ;;  %3602 = vmatpush1.bf16.msra.mxu1 %v5979_v11  ;;  %v6056_v11 = vld [vmem:[%s8608_s1 + $0x94c] ss:$56 sps:$4 sm:$0xff]  }
  0xf0   : > { %3832 = vmatpush1.bf16.msra.mxu0 %v5982_v13  ;;  %3603 = vmatprep.subr.bf16.mxu1 %v5987_v55  ;;  %v6054_v13 = vld [vmem:[%s8608_s1 + $0x948] ss:$56 sps:$4 sm:$0xff]   ;;  %v6059_v55 = vld [vmem:[%s8608_s1 + $0x9c4] ss:$56 sps:$4 sm:$0xff]  }
  0xf1   : > { %3833 = vmatprep.subr.bf16.mxu0 %v5990_v14  ;;  %5328 = vmatprep.mubr.msk.bf16.mxu1 %vm2882_vm0, %v6295_v9  ;;  %v7381_v14 = vld [vmem:[%s6494_s21 + $0x60] ss:$16 sps:$4 sm:$0xff]  }
  0xf2   : > { %5337 = vmatprep.mubr.msk.bf16.mxu0 %vm2882_vm0, %v6297_v3 }
  0xf3   : > { %3604 = vmatpush1.bf16.msra.mxu1 %v5985_v61  ;;  %v6062_v61 = vld [vmem:[%s8608_s1 + $0x9bc] ss:$56 sps:$4 sm:$0xff]  }
  0xf4   : > { %3834 = vmatpush1.bf16.msra.mxu0 %v5988_v16  ;;  %3605 = vmatprep.subr.bf16.mxu1 %v5993_v19  ;;  %v6065_v16 = vld [vmem:[%s8608_s1 + $0xa34] ss:$56 sps:$4 sm:$0xff]  }
  0xf5   : > { %3835 = vmatprep.subr.bf16.mxu0 %v5996_v20  ;;  %v7395_v20 = vld [vmem:[%s6494_s21 + $0x84] ss:$16 sps:$4 sm:$0xff]  }
  0xf6   : > { %3329 = vmatmul.mubr.bf16.gmra.mrb[52].mxu1 %v6296_v15  ;;  %v6057_v15 = vld [vmem:[%s8608_s1 + $0x9c0] ss:$56 sps:$4 sm:$0xff]  }
  0xf7   : > { %3565 = vmatmul.mubr.bf16.gmra.mrb[56].mxu0 %v6298_v26  ;;  %3606 = vmatpush1.bf16.msra.mxu1 %v5991_v21 }
  0xf8   : > { %3836 = vmatpush1.bf16.msra.mxu0 %v5994_v10  ;;  %3607 = vmatprep.subr.bf16.mxu1 %v5999_v22 }
  0xf9   : > { %3837 = vmatprep.subr.bf16.mxu0 %v6002_v23  ;;  %5329 = vmatprep.mubr.msk.bf16.mxu1 %vm2882_vm0, %v6297_v3  ;;  %v6060_v23 = vld [vmem:[%s8608_s1 + $0x9b8] ss:$56 sps:$4 sm:$0xff]  }
  0xfa   : > { %5338 = vmatprep.mubr.msk.bf16.mxu0 %vm2882_vm0, %v7230_v25 }
  0xfb   : > { %3608 = vmatpush1.bf16.msra.mxu1 %v5997_v27 }
  0xfc   : > { %3838 = vmatpush1.bf16.msra.mxu0 %v6000_v28  ;;  %3609 = vmatprep.subr.bf16.mxu1 %v6005_v17 }
  0xfd   : > { %3839 = vmatprep.subr.bf16.mxu0 %v6008_v29 }
  0xfe   : > { %3339 = vmatmul.mubr.bf16.gmra.mrb[56].mxu1 %v6298_v26  ;;  %v6063_v26 = vld [vmem:[%s8608_s1 + $0xa30] ss:$56 sps:$4 sm:$0xff]  }
  0xff   : > { %3575 = vmatmul.mubr.bf16.gmra.mrb[60].mxu0 %v7247_v31  ;;  %3610 = vmatpush1.bf16.msra.mxu1 %v6003_v32 }
 0x100   : > { %3840 = vmatpush1.bf16.msra.mxu0 %v6006_v33  ;;  %3611 = vmatprep.subr.bf16.mxu1 %v6011_v34  ;;  %v6068_v34 = vld [vmem:[%s8608_s1 + $0xa2c] ss:$56 sps:$4 sm:$0xff]  }
 0x101   : > { %3841 = vmatprep.subr.bf16.mxu0 %v6014_v35  ;;  %5330 = vmatprep.mubr.msk.bf16.mxu1 %vm2882_vm0, %v7230_v25 }
 0x102   : > { %3843 = vmatprep.mubr.bf16.mxu0 %v7265_v50 }
 0x103   : > { %3612 = vmatpush1.bf16.msra.mxu1 %v6009_v37  ;;  %v6066_v37 = vld [vmem:[%s8608_s1 + $0xa28] ss:$56 sps:$4 sm:$0xff]  }
 0x104   : > { %3842 = vmatpush1.bf16.msra.mxu0 %v6012_v38  ;;  %3613 = vmatprep.subr.bf16.mxu1 %v6017_v39  ;;  %v6069_v38 = vld [vmem:[%s8608_s1 + $0xaa0] ss:$56 sps:$4 sm:$0xff]   ;;  %v6071_v39 = vld [vmem:[%s8608_s1 + $0xaa4] ss:$56 sps:$4 sm:$0xff]  }
 0x105   : > { %3924 = vmatprep.subr.bf16.mxu0 %v6026_v40  ;;  %v6126_v40 = vld [vmem:[%s8608_s1 + $0x1f0] ss:$56 sps:$4 sm:$0xff]  }
 0x106   : > { %3349 = vmatmul.mubr.bf16.gmra.mrb[60].mxu1 %v7247_v31 }
 0x107   : > { %3844 = vmatmul.mubr.bf16.vlgmr.msra.gmra.mrb[64].mxu0 %v7279_v45  ;;  %3614 = vmatpush1.bf16.msra.mxu1 %v6015_v41  ;;  %v7428_v41 = vld [vmem:[%s6494_s21 + $0x80] ss:$16 sps:$4 sm:$0xff]  }
 0x108   : > { %3617 = vmatprep.mubr.bf16.mxu1 %v7265_v50  ;;  %3615 = vmatprep.subr.bf16.mxu1 %v6020_v43  ;;  %v6123_v43 = vld [vmem:[%s8608_s1 + $0x108] ss:$56 sps:$4 sm:$0xff]  }
 0x109   : > { %3853 = vmatprep.mubr.bf16.mxu0 %v7290_v12  ;;  %3925 = vmatpush1.bf16.msra.mxu0 %v6024_v44  ;;  %v7435_v44 = vld [vmem:[%s6494_s21 + $0xa4] ss:$16 sps:$4 sm:$0xff]  }
 0x10a   : > { %3926 = vmatprep.subr.bf16.mxu0 %v6029_v6  ;;  %v6074_v6 = vld [vmem:[%s8608_s1 + $0xb14] ss:$56 sps:$4 sm:$0xff]  }
 0x10b   : > { %3616 = vmatpush1.bf16.msra.mxu1 %v6018_v46  ;;  %v6077_v46 = vld [vmem:[%s8608_s1 + $0xa9c] ss:$56 sps:$4 sm:$0xff]  }
 0x10c   : > { %3698 = vmatprep.subr.bf16.mxu1 %v6023_v47 }
 0x10d   : > { %3927 = vmatpush1.bf16.msra.mxu0 %v6027_v49 }
 0x10e   : > { %3618 = vmatmul.mubr.bf16.vlgmr.msra.gmra.mrb[64].mxu1 %v7279_v45  ;;  %3928 = vmatprep.subr.bf16.mxu0 %v6035_v53 }
 0x10f   : > { %3854 = vmatmul.mubr.bf16.gmra.mrb[68].mxu0 %v7310_v18  ;;  %3699 = vmatpush1.bf16.msra.mxu1 %v6021_v51  ;;  %v6072_v51 = vld [vmem:[%s8608_s1 + $0xb10] ss:$56 sps:$4 sm:$0xff]  }
 0x110   : > { %3627 = vmatprep.mubr.bf16.mxu1 %v7290_v12  ;;  %3700 = vmatprep.subr.bf16.mxu1 %v6032_v52  ;;  %v6075_v52 = vld [vmem:[%s8608_s1 + $0xa98] ss:$56 sps:$4 sm:$0xff]  }
 0x111   : > { %3863 = vmatprep.mubr.bf16.mxu0 %v7324_v57  ;;  %3929 = vmatpush1.bf16.msra.mxu0 %v6033_v56 }
 0x112   : > { %3930 = vmatprep.subr.bf16.mxu0 %v6041_v24 }
 0x113   : > { %3701 = vmatpush1.bf16.msra.mxu1 %v6030_v54 }
 0x114   : > { %3702 = vmatprep.subr.bf16.mxu1 %v6038_v58 }
 0x115   : > { %3931 = vmatpush1.bf16.msra.mxu0 %v6039_v60 }
 0x116   : > { %3628 = vmatmul.mubr.bf16.gmra.mrb[68].mxu1 %v7310_v18  ;;  %3932 = vmatprep.subr.bf16.mxu0 %v6047_v62 }
 0x117   : > { %3864 = vmatmul.mubr.bf16.gmra.mrb[72].mxu0 %v7344_v63  ;;  %3703 = vmatpush1.bf16.msra.mxu1 %v6036_v59 }
 0x118   : > { %3704 = vmatprep.subr.bf16.mxu1 %v6044_v30  ;;  %3637 = vmatprep.mubr.bf16.mxu1 %v7324_v57 }
 0x119   : > { %3873 = vmatprep.mubr.bf16.mxu0 %v7361_v4  ;;  %3933 = vmatpush1.bf16.msra.mxu0 %v6045_v0 }
 0x11a   : > { %v3054_v42 = vpop.f32.mrb[0].mxu0  ;;  %3934 = vmatprep.subr.bf16.mxu0 %v6053_v2  ;;  %v6081_v2 = vld [vmem:[%s8608_s1 + $0xb08] ss:$56 sps:$4 sm:$0xff]  }
 0x11b   : > { %v3056_v7 = vpop.f32.mrb[1].mxu0  ;;  %3705 = vmatpush1.bf16.msra.mxu1 %v6042_v36  ;;  %v6080_v36 = vld [vmem:[%s8608_s1 + $0xb84] ss:$56 sps:$4 sm:$0xff]  }
 0x11c   : > { %v3058_v8 = vpop.f32.mrb[2].mxu0  ;;  %3706 = vmatprep.subr.bf16.mxu1 %v6050_v1  ;;  %v6078_v1 = vld [vmem:[%s8608_s1 + $0xb80] ss:$56 sps:$4 sm:$0xff]  }
 0x11d   : > { %v3060_v9 = vpop.f32.mrb[3].mxu0  ;;  %3935 = vmatpush1.bf16.msra.mxu0 %v6051_v48 }
 0x11e   : > { %3638 = vmatmul.mubr.bf16.gmra.mrb[72].mxu1 %v7344_v63  ;;  %3936 = vmatprep.subr.bf16.mxu0 %v6059_v55 }
 0x11f   : > { %3874 = vmatmul.mubr.bf16.gmra.mrb[76].mxu0 %v7381_v14  ;;  %3707 = vmatpush1.bf16.msra.mxu1 %v6048_v5 }
 0x120   : > { %3647 = vmatprep.mubr.bf16.mxu1 %v7361_v4  ;;  %3708 = vmatprep.subr.bf16.mxu1 %v6056_v11  ;;  %v6089_v11 = vld [vmem:[%s8608_s1 + $0xb7c] ss:$56 sps:$4 sm:$0xff]  }
 0x121   : > { %v2941_v19 = vpop.f32.mrb[0].mxu1  ;;  %3883 = vmatprep.mubr.bf16.mxu0 %v7395_v20  ;;  %3937 = vmatpush1.bf16.msra.mxu0 %v6057_v15 }
 0x122   : > { %v3064_v3 = vpop.f32.mrb[4].mxu0  ;;  %v7398_v21 = vadd.f32 %v3054_v42, %v2941_v19  ;;  %v2943_v10 = vpop.f32.mrb[1].mxu1  ;;  %3938 = vmatprep.subr.bf16.mxu0 %v6065_v16  ;;  %v6083_v42 = vld [vmem:[%s8608_s1 + $0xb0c] ss:$56 sps:$4 sm:$0xff]  }
 0x123   : > { %v3066_v22 = vpop.f32.mrb[5].mxu0  ;;  %v7406_v27 = vadd.f32 %v3056_v7, %v2943_v10  ;;  %v2945_v28 = vpop.f32.mrb[2].mxu1  ;;  %3709 = vmatpush1.bf16.msra.mxu1 %v6054_v13  ;;  %v7474_v7 = vld [vmem:[%s6494_s21 + $0xa0] ss:$16 sps:$4 sm:$0xff]  }
 0x124   : > { %v3068_v17 = vpop.f32.mrb[6].mxu0  ;;  %v7408_v29 = vadd.f32 %v3058_v8, %v2945_v28  ;;  %v2947_v32 = vpop.f32.mrb[3].mxu1  ;;  %3710 = vmatprep.subr.bf16.mxu1 %v6062_v61  ;;  %v7481_v8 = vld [vmem:[%s6494_s21 + $0xc4] ss:$16 sps:$4 sm:$0xff]   ;;  %v6084_v10 = vld [vmem:[%s8608_s1 + $0xbf0] ss:$56 sps:$4 sm:$0xff]  }
 0x125   : > { %v3070_v33 = vpop.f32.mrb[7].mxu0  ;;  %v7413_v35 = vadd.f32 %v3060_v9, %v2947_v32  ;;  %3939 = vmatpush1.bf16.msra.mxu0 %v6063_v26  ;;  %v6086_v9 = vld [vmem:[%s8608_s1 + $0xbf4] ss:$56 sps:$4 sm:$0xff]  }
 0x126   : > { %3648 = vmatmul.mubr.bf16.gmra.mrb[76].mxu1 %v7381_v14  ;;  %3940 = vmatprep.subr.bf16.mxu0 %v6071_v39  ;;  %v6090_v39 = vld [vmem:[%s8608_s1 + $0xc60] ss:$56 sps:$4 sm:$0xff]  }
 0x127   : > { %3884 = vmatmul.mubr.bf16.gmra.mrb[80].mxu0 %v7428_v41  ;;  %3711 = vmatpush1.bf16.msra.mxu1 %v6060_v23 }
 0x128   : > { %3657 = vmatprep.mubr.bf16.mxu1 %v7395_v20  ;;  %3893 = vmatprep.mubr.bf16.mxu0 %v7435_v44 }
 0x129   : > { %v2951_v47 = vpop.f32.mrb[4].mxu1  ;;  %3712 = vmatprep.subr.bf16.mxu1 %v6068_v34  ;;  %3941 = vmatpush1.bf16.msra.mxu0 %v6069_v38  ;;  %v6095_v34 = vld [vmem:[%s8608_s1 + $0xbec] ss:$56 sps:$4 sm:$0xff]   ;;  %v7514_v38 = vld [vmem:[%s6494_s21 + $0xc0] ss:$16 sps:$4 sm:$0xff]  }
 0x12a   : > { %v3074_v49 = vpop.f32.mrb[8].mxu0  ;;  %v7450_v53 = vadd.f32 %v3064_v3, %v2951_v47  ;;  %v2953_v54 = vpop.f32.mrb[5].mxu1  ;;  %3942 = vmatprep.subr.bf16.mxu0 %v6074_v6  ;;  %v6093_v47 = vld [vmem:[%s8608_s1 + $0xbe8] ss:$56 sps:$4 sm:$0xff]   ;;  %v7657_v6 = vld [vmem:[%s6494_s21 + $0x4c] ss:$16 sps:$4 sm:$0xff]  }
 0x12b   : > { %v3076_v56 = vpop.f32.mrb[9].mxu0  ;;  %v7452_v24 = vadd.f32 %v3066_v22, %v2953_v54  ;;  %v2955_v58 = vpop.f32.mrb[6].mxu1  ;;  %3713 = vmatpush1.bf16.msra.mxu1 %v6066_v37  ;;  %v6101_v54 = vld [vmem:[%s8608_s1 + $0xc5c] ss:$56 sps:$4 sm:$0xff]  }
 0x12c   : > { %v3078_v59 = vpop.f32.mrb[10].mxu0  ;;  %v7454_v60 = vadd.f32 %v3068_v17, %v2955_v58  ;;  %v2957_v30 = vpop.f32.mrb[7].mxu1  ;;  %3714 = vmatprep.subr.bf16.mxu1 %v6077_v46  ;;  %v6087_v17 = vld [vmem:[%s8608_s1 + $0xb78] ss:$56 sps:$4 sm:$0xff]   ;;  %v7524_v46 = vld [vmem:[%s6494_s21 + $0xe4] ss:$16 sps:$4 sm:$0xff]  }
 0x12d   : > { %v3080_v62 = vpop.f32.mrb[11].mxu0  ;;  %v7459_v0 = vadd.f32 %v3070_v33, %v2957_v30  ;;  %3943 = vmatpush1.bf16.msra.mxu0 %v6072_v51  ;;  %v6092_v33 = vld [vmem:[%s8608_s1 + $0xc64] ss:$56 sps:$4 sm:$0xff]  }
 0x12e   : > { %3658 = vmatmul.mubr.bf16.gmra.mrb[80].mxu1 %v7428_v41  ;;  %3944 = vmatprep.subr.bf16.mxu0 %v6080_v36  ;;  %v6096_v36 = vld [vmem:[%s8608_s1 + $0xcd0] ss:$56 sps:$4 sm:$0xff]  }
 0x12f   : > { %3894 = vmatmul.mubr.bf16.gmra.mrb[84].mxu0 %v7474_v7  ;;  %3715 = vmatpush1.bf16.msra.mxu1 %v6075_v52 }
 0x130   : > { %3667 = vmatprep.mubr.bf16.mxu1 %v7435_v44  ;;  %3903 = vmatprep.mubr.bf16.mxu0 %v7481_v8 }
 0x131   : > { %v2961_v13 = vpop.f32.mrb[8].mxu1  ;;  %3716 = vmatprep.subr.bf16.mxu1 %v6083_v42  ;;  %3945 = vmatpush1.bf16.msra.mxu0 %v6078_v1 }
 0x132   : > { %v3084_v55 = vpop.f32.mrb[12].mxu0  ;;  %v7490_v15 = vadd.f32 %v3074_v49, %v2961_v13  ;;  %v2963_v61 = vpop.f32.mrb[9].mxu1  ;;  %3946 = vmatprep.subr.bf16.mxu0 %v6086_v9  ;;  %v6098_v49 = vld [vmem:[%s8608_s1 + $0xcd4] ss:$56 sps:$4 sm:$0xff]  }
 0x133   : > { %v3086_v16 = vpop.f32.mrb[13].mxu0  ;;  %v7492_v19 = vadd.f32 %v3076_v56, %v2963_v61  ;;  %v2965_v3 = vpop.f32.mrb[10].mxu1  ;;  %3717 = vmatpush1.bf16.msra.mxu1 %v6081_v2  ;;  %v6107_v61 = vld [vmem:[%s8608_s1 + $0xccc] ss:$56 sps:$4 sm:$0xff]  }
 0x134   : > { %v3088_v22 = vpop.f32.mrb[14].mxu0  ;;  %v7497_v23 = vadd.f32 %v3078_v59, %v2965_v3  ;;  %v2967_v26 = vpop.f32.mrb[11].mxu1  ;;  %3718 = vmatprep.subr.bf16.mxu1 %v6089_v11  ;;  %v6099_v11 = vld [vmem:[%s8608_s1 + $0xc58] ss:$56 sps:$4 sm:$0xff]  }
 0x135   : > { %v3090_v28 = vpop.f32.mrb[15].mxu0  ;;  %v7502_v32 = vadd.f32 %v3080_v62, %v2967_v26  ;;  %3947 = vmatpush1.bf16.msra.mxu0 %v6084_v10  ;;  %v7560_v3 = vld [vmem:[%s6494_s21 + $0xe0] ss:$16 sps:$4 sm:$0xff]  }
 0x136   : > { %3668 = vmatmul.mubr.bf16.gmra.mrb[84].mxu1 %v7474_v7  ;;  %3948 = vmatprep.subr.bf16.mxu0 %v6092_v33  ;;  %v6105_v26 = vld [vmem:[%s8608_s1 + $0xcc8] ss:$56 sps:$4 sm:$0xff]   ;;  %v6113_v33 = vld [vmem:[%s8608_s1 + $0x2c] ss:$56 sps:$4 sm:$0xff]  }
 0x137   : > { %3904 = vmatmul.mubr.bf16.gmra.mrb[88].mxu0 %v7514_v38  ;;  %3677 = vmatprep.mubr.bf16.mxu1 %v7481_v8 }
 0x138   : > { %3719 = vmatpush1.bf16.msra.mxu1 %v6087_v17  ;;  %3913 = vmatprep.mubr.bf16.mxu0 %v7524_v46 }
 0x139   : > { %v2971_v51 = vpop.f32.mrb[12].mxu1  ;;  %3720 = vmatprep.subr.bf16.mxu1 %v6095_v34  ;;  %3949 = vmatpush1.bf16.msra.mxu0 %v6090_v39 }
 0x13a   : > { %v3094_v52 = vpop.f32.mrb[16].mxu0  ;;  %v7536_v56 = vadd.f32 %v3084_v55, %v2971_v51  ;;  %v2973_v58 = vpop.f32.mrb[13].mxu1  ;;  %3950 = vmatprep.subr.bf16.mxu0 %v6098_v49  ;;  %v6104_v55 = vld [vmem:[%s8608_s1 + $0x34] ss:$56 sps:$4 sm:$0xff]  }
 0x13b   : > { %v3096_v59 = vpop.f32.mrb[17].mxu0  ;;  %v7538_v30 = vadd.f32 %v3086_v16, %v2973_v58  ;;  %v2975_v62 = vpop.f32.mrb[14].mxu1 }
 0x13c   : > { %v3098_v1 = vpop.f32.mrb[18].mxu0  ;;  %v7543_v2 = vadd.f32 %v3088_v22, %v2975_v62  ;;  %v2977_v42 = vpop.f32.mrb[15].mxu1  ;;  %3721 = vmatpush1.bf16.msra.mxu1 %v6093_v47  ;;  %v7567_v22 = vld [vmem:[%s6494_s21 + $0xc] ss:$16 sps:$4 sm:$0xff]  }
 0x13d   : > { %v3100_v9 = vpop.f32.mrb[19].mxu0  ;;  %v7548_v13 = vadd.f32 %v3090_v28, %v2977_v42  ;;  %3722 = vmatprep.subr.bf16.mxu1 %v6101_v54  ;;  %3951 = vmatpush1.bf16.msra.mxu0 %v6096_v36  ;;  %v6102_v54 = vld [vmem:[%s8608_s1 + $0x30] ss:$56 sps:$4 sm:$0xff]  }
 0x13e   : > { %3678 = vmatmul.mubr.bf16.gmra.mrb[88].mxu1 %v7514_v38  ;;  %4263 = vmatprep.subr.bf16.mxu0 %v6104_v55  ;;  %v7595_v55 = vld [vmem:[%s6494_s21 + $0x8] ss:$16 sps:$4 sm:$0xff]  }
 0x13f   : > { %3914 = vmatmul.mubr.bf16.gmra.mrb[92].mxu0 %v7560_v3  ;;  %3687 = vmatprep.mubr.bf16.mxu1 %v7524_v46 }
 0x140   : > { %5347 = vmatprep.mubr.msk.bf16.mxu0 %vm2882_vm0, %v7567_v22  ;;  %3723 = vmatpush1.bf16.msra.mxu1 %v6099_v11 }
 0x141   : > { %v2981_v28 = vpop.f32.mrb[16].mxu1  ;;  %3724 = vmatprep.subr.bf16.mxu1 %v6107_v61  ;;  %v7606_v61 = vld [vmem:[%s6494_s21 + $0x2c] ss:$16 sps:$4 sm:$0xff]  }
 0x142   : > { %v3104_v17 = vpop.f32.mrb[20].mxu0  ;;  %v7577_v34 = vadd.f32 %v3094_v52, %v2981_v28  ;;  %v2983_v39 = vpop.f32.mrb[17].mxu1  ;;  %v6110_v52 = vld [vmem:[%s8608_s1 + $0xa4] ss:$56 sps:$4 sm:$0xff]  }
 0x143   : > { %v3106_v47 = vpop.f32.mrb[21].mxu0  ;;  %v7579_v49 = vadd.f32 %v3096_v59, %v2983_v39  ;;  %v2985_v51 = vpop.f32.mrb[18].mxu1  ;;  %v6114_v59 = vld [vmem:[%s8608_s1 + $0x110] ss:$56 sps:$4 sm:$0xff]  }
 0x144   : > { %v3108_v58 = vpop.f32.mrb[22].mxu0  ;;  %v7584_v62 = vadd.f32 %v3098_v1, %v2985_v51  ;;  %v2987_v36 = vpop.f32.mrb[19].mxu1  ;;  %3725 = vmatpush1.bf16.msra.mxu1 %v6105_v26  ;;  %v6108_v1 = vld [vmem:[%s8608_s1 + $0xa0] ss:$56 sps:$4 sm:$0xff]   ;;  %v6116_v26 = vld [vmem:[%s8608_s1 + $0x114] ss:$56 sps:$4 sm:$0xff]  }
 0x145   : > { %v3110_v42 = vpop.f32.mrb[23].mxu0  ;;  %v7589_v11 = vadd.f32 %v3100_v9, %v2987_v36  ;;  %4037 = vmatprep.subr.bf16.mxu1 %v6113_v33 }
 0x146   : > { %3688 = vmatmul.mubr.bf16.gmra.mrb[92].mxu1 %v7560_v3 }
 0x147   : > { %3957 = vmatmul.mubr.bf16.vlgmr.msra.gmra.mrb[64].mxu0 %v7595_v55  ;;  %5339 = vmatprep.mubr.msk.bf16.mxu1 %vm2882_vm0, %v7567_v22 }
 0x148   : > { %4264 = vmatpush1.bf16.msra.mxu0 %v6102_v54  ;;  %5348 = vmatprep.mubr.msk.bf16.mxu0 %vm2882_vm0, %v7606_v61 }
 0x149   : > { %4265 = vmatprep.subr.bf16.mxu0 %v6110_v52  ;;  %v2991_v28 = vpop.f32.mrb[20].mxu1  ;;  %v6111_v52 = vld [vmem:[%s8608_s1 + $0x28] ss:$56 sps:$4 sm:$0xff]  }
 0x14a   : > { %v3114_v33 = vpop.f32.mrb[24].mxu0  ;;  %v7613_v39 = vadd.f32 %v3104_v17, %v2991_v28  ;;  %v2993_v51 = vpop.f32.mrb[21].mxu1 }
 0x14b   : > { %v3116_v54 = vpop.f32.mrb[25].mxu0  ;;  %v7615_v36 = vadd.f32 %v3106_v47, %v2993_v51  ;;  %v2995_v9 = vpop.f32.mrb[22].mxu1  ;;  %v6119_v47 = vld [vmem:[%s8608_s1 + $0x9c] ss:$56 sps:$4 sm:$0xff]  }
 0x14c   : > { %4266 = vmatpush1.bf16.msra.mxu0 %v6108_v1  ;;  %v3118_v10 = vpop.f32.mrb[26].mxu0  ;;  %v7623_v16 = vadd.f32 %v3108_v58, %v2995_v9  ;;  %v2997_v17 = vpop.f32.mrb[23].mxu1  ;;  %v6122_v1 = vld [vmem:[%s8608_s1 + $0x184] ss:$56 sps:$4 sm:$0xff]   ;;  %v7637_v58 = vld [vmem:[%s6494_s21 + $0x28] ss:$16 sps:$4 sm:$0xff]  }
 0x14d   : > { %4267 = vmatprep.subr.bf16.mxu0 %v6116_v26  ;;  %v3120_v28 = vpop.f32.mrb[27].mxu0  ;;  %v7631_v51 = vadd.f32 %v3110_v42, %v2997_v17  ;;  %v6117_v9 = vld [vmem:[%s8608_s1 + $0x98] ss:$56 sps:$4 sm:$0xff]   ;;  %v6125_v17 = vld [vmem:[%s8608_s1 + $0x10c] ss:$56 sps:$4 sm:$0xff]  }
 0x14e   : > { %8631 = vst [vmem:[#allocation2_spill] sm:$0xff] %v7623_v16  ;;  %3731 = vmatmul.mubr.bf16.vlgmr.msra.gmra.mrb[64].mxu1 %v7595_v55  ;;  %v6120_v42 = vld [vmem:[%s8608_s1 + $0x180] ss:$56 sps:$4 sm:$0xff]  }
 0x14f   : > { %8632 = vst [vmem:[#allocation3_spill] sm:$0xff] %v7631_v51  ;;  %3967 = vmatmul.mubr.bf16.gmra.mrb[68].mxu0 %v7637_v58  ;;  %4038 = vmatpush1.bf16.msra.mxu1 %v6111_v52 }
 0x150   : > { %4268 = vmatpush1.bf16.msra.mxu0 %v6114_v59  ;;  %4039 = vmatprep.subr.bf16.mxu1 %v6119_v47  ;;  %v6128_v59 = vld [vmem:[%s8608_s1 + $0x1f4] ss:$56 sps:$4 sm:$0xff]  }
 0x151   : > { %4269 = vmatprep.subr.bf16.mxu0 %v6122_v1  ;;  %v3001_v52 = vpop.f32.mrb[24].mxu1  ;;  %5340 = vmatprep.mubr.msk.bf16.mxu1 %vm2882_vm0, %v7606_v61 }
 0x152   : > { %5349 = vmatprep.mubr.msk.bf16.mxu0 %vm2882_vm0, %v7657_v6  ;;  %v3124_v26 = vpop.f32.mrb[28].mxu0  ;;  %v7661_v47 = vadd.f32 %v3114_v33, %v3001_v52  ;;  %v3003_v1 = vpop.f32.mrb[25].mxu1 }
 0x153   : > { %v3126_v37 = vpop.f32.mrb[29].mxu0  ;;  %v7663_v48 = vadd.f32 %v3116_v54, %v3003_v1  ;;  %v3005_v5 = vpop.f32.mrb[26].mxu1  ;;  %4040 = vmatpush1.bf16.msra.mxu1 %v6117_v9  ;;  %v6131_v54 = vld [vmem:[%s8608_s1 + $0x17c] ss:$56 sps:$4 sm:$0xff]  }
 0x154   : > { %8633 = vst [vmem:[#allocation4_spill] sm:$0xff] %v7661_v47  ;;  %4270 = vmatpush1.bf16.msra.mxu0 %v6120_v42  ;;  %v3128_v51 = vpop.f32.mrb[30].mxu0  ;;  %v7671_v16 = vadd.f32 %v3118_v10, %v3005_v5  ;;  %v3007_v33 = vpop.f32.mrb[27].mxu1  ;;  %4041 = vmatprep.subr.bf16.mxu1 %v6125_v17  ;;  %v6134_v9 = vld [vmem:[%s8608_s1 + $0x264] ss:$56 sps:$4 sm:$0xff]  }
 0x155   : > { %8634 = vst [vmem:[#allocation5_spill] sm:$0xff] %v7663_v48  ;;  %4271 = vmatprep.subr.bf16.mxu0 %v6128_v59  ;;  %v3130_v42 = vpop.f32.mrb[31].mxu0  ;;  %v7679_v52 = vadd.f32 %v3120_v28, %v3007_v33  ;;  %v7685_v5 = vld [vmem:[%s6494_s21 + $0x48] ss:$16 sps:$4 sm:$0xff]   ;;  %v6137_v59 = vld [vmem:[%s8608_s1 + $0x1ec] ss:$56 sps:$4 sm:$0xff]  }
 0x156   : > { %8635 = vst [vmem:[#allocation6_spill] sm:$0xff] %v7671_v16  ;;  %3741 = vmatmul.mubr.bf16.gmra.mrb[68].mxu1 %v7637_v58  ;;  %v6129_v10 = vld [vmem:[%s8608_s1 + $0x178] ss:$56 sps:$4 sm:$0xff]   ;;  %v7705_v33 = vld [vmem:[%s6494_s21 + $0x6c] ss:$16 sps:$4 sm:$0xff]  }
 0x157   : > { %8636 = vst [vmem:[#allocation7_spill] sm:$0xff] %v7679_v52  ;;  %3977 = vmatmul.mubr.bf16.gmra.mrb[72].mxu0 %v7685_v5  ;;  %4042 = vmatpush1.bf16.msra.mxu1 %v6123_v43  ;;  %v6132_v28 = vld [vmem:[%s8608_s1 + $0x260] ss:$56 sps:$4 sm:$0xff]   ;;  %v6138_v16 = vld [vmem:[%s8608_s1 + $0x2d0] ss:$56 sps:$4 sm:$0xff]  }
 0x158   : > { %4272 = vmatpush1.bf16.msra.mxu0 %v6126_v40  ;;  %4043 = vmatprep.subr.bf16.mxu1 %v6131_v54  ;;  %v6140_v40 = vld [vmem:[%s8608_s1 + $0x2d4] ss:$56 sps:$4 sm:$0xff]   ;;  %v6135_v52 = vld [vmem:[%s8608_s1 + $0x1e8] ss:$56 sps:$4 sm:$0xff]  }
 0x159   : > { %4273 = vmatprep.subr.bf16.mxu0 %v6134_v9  ;;  %v3011_v43 = vpop.f32.mrb[28].mxu1  ;;  %5341 = vmatprep.mubr.msk.bf16.mxu1 %vm2882_vm0, %v7657_v6 }
 0x15a   : > { %5350 = vmatprep.mubr.msk.bf16.mxu0 %vm2882_vm0, %v7705_v33  ;;  %v7709_v17 = vadd.f32 %v3124_v26, %v3011_v43  ;;  %v3013_v54 = vpop.f32.mrb[29].mxu1  ;;  %v6146_v26 = vld [vmem:[%s8608_s1 + $0x344] ss:$56 sps:$4 sm:$0xff]   ;;  %v6150_v43 = vld [vmem:[%s8608_s1 + $0x3b0] ss:$56 sps:$4 sm:$0xff]  }
 0x15b   : > { %v7711_v9 = vadd.f32 %v3126_v37, %v3013_v54  ;;  %v3015_v1 = vpop.f32.mrb[30].mxu1  ;;  %4044 = vmatpush1.bf16.msra.mxu1 %v6129_v10  ;;  %v6143_v37 = vld [vmem:[%s8608_s1 + $0x25c] ss:$56 sps:$4 sm:$0xff]  }
 0x15c   : > { %4274 = vmatpush1.bf16.msra.mxu0 %v6132_v28  ;;  %v7719_v48 = vadd.f32 %v3128_v51, %v3015_v1  ;;  %v3017_v47 = vpop.f32.mrb[31].mxu1  ;;  %4045 = vmatprep.subr.bf16.mxu1 %v6137_v59  ;;  %v7733_v51 = vld [vmem:[%s6494_s21 + $0x68] ss:$16 sps:$4 sm:$0xff]   ;;  %v6149_v59 = vld [vmem:[%s8608_s1 + $0x2cc] ss:$56 sps:$4 sm:$0xff]  }
 0x15d   : > { %4275 = vmatprep.subr.bf16.mxu0 %v6140_v40  ;;  %v7727_v10 = vadd.f32 %v3130_v42, %v3017_v47  ;;  %v6141_v1 = vld [vmem:[%s8608_s1 + $0x258] ss:$56 sps:$4 sm:$0xff]   ;;  %v6147_v40 = vld [vmem:[%s8608_s1 + $0x2c8] ss:$56 sps:$4 sm:$0xff]   ;;  %v6155_v54 = vld [vmem:[%s8608_s1 + $0x33c] ss:$56 sps:$4 sm:$0xff]  }
 0x15e   : > { %3751 = vmatmul.mubr.bf16.gmra.mrb[72].mxu1 %v7685_v5  ;;  %v6144_v47 = vld [vmem:[%s8608_s1 + $0x340] ss:$56 sps:$4 sm:$0xff]   ;;  %v6173_v42 = vld [vmem:[%s8608_s1 + $0x48c] ss:$56 sps:$4 sm:$0xff]   ;;  %v6179_v28 = vld [vmem:[%s8608_s1 + $0x4fc] ss:$56 sps:$4 sm:$0xff]  }
 0x15f   : > { %3987 = vmatmul.mubr.bf16.gmra.mrb[76].mxu0 %v7733_v51  ;;  %4046 = vmatpush1.bf16.msra.mxu1 %v6135_v52  ;;  %v7753_v52 = vld [vmem:[%s6494_s21 + $0x8c] ss:$16 sps:$4 sm:$0xff]  }
 0x160   : > { %4276 = vmatpush1.bf16.msra.mxu0 %v6138_v16  ;;  %4047 = vmatprep.subr.bf16.mxu1 %v6143_v37  ;;  %v6152_v16 = vld [vmem:[%s8608_s1 + $0x3b4] ss:$56 sps:$4 sm:$0xff]   ;;  %v6158_v37 = vld [vmem:[%s8608_s1 + $0x424] ss:$56 sps:$4 sm:$0xff]  }
 0x161   : > { %4277 = vmatprep.subr.bf16.mxu0 %v6146_v26  ;;  %5342 = vmatprep.mubr.msk.bf16.mxu1 %vm2882_vm0, %v7705_v33  ;;  %v7771_v26 = vld [vmem:[%s6494_s21 + $0x88] ss:$16 sps:$4 sm:$0xff]  }
 0x162   : > { %5351 = vmatprep.mubr.msk.bf16.mxu0 %vm2882_vm0, %v7753_v52  ;;  %8637 = vst [vmem:[#allocation8_spill] sm:$0xff] %v7771_v26 }
 0x163   : > { %4048 = vmatpush1.bf16.msra.mxu1 %v6141_v1  ;;  %v6153_v1 = vld [vmem:[%s8608_s1 + $0x338] ss:$56 sps:$4 sm:$0xff]  }
 0x164   : > { %4278 = vmatpush1.bf16.msra.mxu0 %v6144_v47  ;;  %4049 = vmatprep.subr.bf16.mxu1 %v6149_v59  ;;  %v6156_v47 = vld [vmem:[%s8608_s1 + $0x420] ss:$56 sps:$4 sm:$0xff]   ;;  %v6161_v59 = vld [vmem:[%s8608_s1 + $0x3ac] ss:$56 sps:$4 sm:$0xff]  }
 0x165   : > { %4279 = vmatprep.subr.bf16.mxu0 %v6152_v16  ;;  %v6164_v16 = vld [vmem:[%s8608_s1 + $0x494] ss:$56 sps:$4 sm:$0xff]  }
 0x166   : > { %3761 = vmatmul.mubr.bf16.gmra.mrb[76].mxu1 %v7733_v51 }
 0x167   : > { %3997 = vmatmul.mubr.bf16.gmra.mrb[80].mxu0 %v7771_v26  ;;  %4050 = vmatpush1.bf16.msra.mxu1 %v6147_v40  ;;  %v7789_v40 = vld [vmem:[%s6494_s21 + $0xac] ss:$16 sps:$4 sm:$0xff]  }
 0x168   : > { %4280 = vmatpush1.bf16.msra.mxu0 %v6150_v43  ;;  %4051 = vmatprep.subr.bf16.mxu1 %v6155_v54  ;;  %8638 = vst [vmem:[#allocation9_spill] sm:$0xff] %v7789_v40  ;;  %v6159_v43 = vld [vmem:[%s8608_s1 + $0x3a8] ss:$56 sps:$4 sm:$0xff]  }
 0x169   : > { %4281 = vmatprep.subr.bf16.mxu0 %v6158_v37  ;;  %5343 = vmatprep.mubr.msk.bf16.mxu1 %vm2882_vm0, %v7753_v52  ;;  %v6162_v54 = vld [vmem:[%s8608_s1 + $0x490] ss:$56 sps:$4 sm:$0xff]   ;;  %v6167_v37 = vld [vmem:[%s8608_s1 + $0x41c] ss:$56 sps:$4 sm:$0xff]  }
 0x16a   : > { %5352 = vmatprep.mubr.msk.bf16.mxu0 %vm2882_vm0, %v7789_v40 }
 0x16b   : > { %4052 = vmatpush1.bf16.msra.mxu1 %v6153_v1  ;;  %v6170_v1 = vld [vmem:[%s8608_s1 + $0x504] ss:$56 sps:$4 sm:$0xff]  }
 0x16c   : > { %4282 = vmatpush1.bf16.msra.mxu0 %v6156_v47  ;;  %4053 = vmatprep.subr.bf16.mxu1 %v6161_v59  ;;  %v7807_v47 = vld [vmem:[%s6494_s21 + $0xa8] ss:$16 sps:$4 sm:$0xff]  }
 0x16d   : > { %4283 = vmatprep.subr.bf16.mxu0 %v6164_v16  ;;  %8639 = vst [vmem:[#allocation10_spill] sm:$0xff] %v7807_v47  ;;  %v6165_v59 = vld [vmem:[%s8608_s1 + $0x418] ss:$56 sps:$4 sm:$0xff]  }
 0x16e   : > { %3771 = vmatmul.mubr.bf16.gmra.mrb[80].mxu1 %v7771_v26  ;;  %v6168_v16 = vld [vmem:[%s8608_s1 + $0x500] ss:$56 sps:$4 sm:$0xff]  }
 0x16f   : > { %4007 = vmatmul.mubr.bf16.gmra.mrb[84].mxu0 %v7807_v47  ;;  %4054 = vmatpush1.bf16.msra.mxu1 %v6159_v43  ;;  %v6176_v43 = vld [vmem:[%s8608_s1 + $0x574] ss:$56 sps:$4 sm:$0xff]  }
 0x170   : > { %4284 = vmatpush1.bf16.msra.mxu0 %v6162_v54  ;;  %4055 = vmatprep.subr.bf16.mxu1 %v6167_v37  ;;  %v7825_v54 = vld [vmem:[%s6494_s21 + $0xcc] ss:$16 sps:$4 sm:$0xff]   ;;  %v6171_v37 = vld [vmem:[%s8608_s1 + $0x488] ss:$56 sps:$4 sm:$0xff]  }
 0x171   : > { %4285 = vmatprep.subr.bf16.mxu0 %v6170_v1  ;;  %5344 = vmatprep.mubr.msk.bf16.mxu1 %vm2882_vm0, %v7789_v40  ;;  %8640 = vst [vmem:[#allocation11_spill] sm:$0xff] %v7825_v54  ;;  %v6174_v1 = vld [vmem:[%s8608_s1 + $0x570] ss:$56 sps:$4 sm:$0xff]   ;;  %v6182_v40 = vld [vmem:[%s8608_s1 + $0x5e4] ss:$56 sps:$4 sm:$0xff]  }
 0x172   : > { %5353 = vmatprep.mubr.msk.bf16.mxu0 %vm2882_vm0, %v7825_v54 }
 0x173   : > { %4056 = vmatpush1.bf16.msra.mxu1 %v6165_v59  ;;  %v7843_v59 = vld [vmem:[%s6494_s21 + $0xc8] ss:$16 sps:$4 sm:$0xff]  }
 0x174   : > { %4286 = vmatpush1.bf16.msra.mxu0 %v6168_v16  ;;  %4057 = vmatprep.subr.bf16.mxu1 %v6173_v42  ;;  %8641 = vst [vmem:[#allocation12_spill] sm:$0xff] %v7843_v59  ;;  %v6177_v42 = vld [vmem:[%s8608_s1 + $0x4f8] ss:$56 sps:$4 sm:$0xff]  }
 0x175   : > { %4287 = vmatprep.subr.bf16.mxu0 %v6176_v43  ;;  %v6180_v16 = vld [vmem:[%s8608_s1 + $0x5e0] ss:$56 sps:$4 sm:$0xff]   ;;  %v6185_v43 = vld [vmem:[%s8608_s1 + $0x56c] ss:$56 sps:$4 sm:$0xff]  }
 0x176   : > { %3781 = vmatmul.mubr.bf16.gmra.mrb[84].mxu1 %v7807_v47  ;;  %v6188_v47 = vld [vmem:[%s8608_s1 + $0x654] ss:$56 sps:$4 sm:$0xff]  }
 0x177   : > { %4017 = vmatmul.mubr.bf16.gmra.mrb[88].mxu0 %v7843_v59  ;;  %4058 = vmatpush1.bf16.msra.mxu1 %v6171_v37  ;;  %v6191_v37 = vld [vmem:[%s8608_s1 + $0x5dc] ss:$56 sps:$4 sm:$0xff]  }
 0x178   : > { %4288 = vmatpush1.bf16.msra.mxu0 %v6174_v1  ;;  %4059 = vmatprep.subr.bf16.mxu1 %v6179_v28  ;;  %v6183_v28 = vld [vmem:[%s8608_s1 + $0x568] ss:$56 sps:$4 sm:$0xff]   ;;  %v6189_v1 = vld [vmem:[%s8608_s1 + $0x5d8] ss:$56 sps:$4 sm:$0xff]  }
 0x179   : > { %4289 = vmatprep.subr.bf16.mxu0 %v6182_v40  ;;  %5345 = vmatprep.mubr.msk.bf16.mxu1 %vm2882_vm0, %v7825_v54  ;;  %v6186_v40 = vld [vmem:[%s8608_s1 + $0x650] ss:$56 sps:$4 sm:$0xff]   ;;  %v6243_v54 = vld [vmem:[%s8608_s1 + $0xa40] ss:$56 sps:$4 sm:$0xff]  }
 0x17a   : > { %5354 = vmatprep.mubr.msk.bf16.mxu0 %vm2882_vm0, %v7230_v25  ;;  %v6194_v25 = vld [vmem:[%s8608_s1 + $0x6c4] ss:$56 sps:$4 sm:$0xff]  }
 0x17b   : > { %4060 = vmatpush1.bf16.msra.mxu1 %v6177_v42  ;;  %v6197_v42 = vld [vmem:[%s8608_s1 + $0x64c] ss:$56 sps:$4 sm:$0xff]  }
 0x17c   : > { %4290 = vmatpush1.bf16.msra.mxu0 %v6180_v16  ;;  %4061 = vmatprep.subr.bf16.mxu1 %v6185_v43  ;;  %v7889_v16 = vld [vmem:[%s6494_s21 + $0xec] ss:$16 sps:$4 sm:$0xff]   ;;  %v6195_v43 = vld [vmem:[%s8608_s1 + $0x648] ss:$56 sps:$4 sm:$0xff]  }
 0x17d   : > { %4291 = vmatprep.subr.bf16.mxu0 %v6188_v47  ;;  %v6192_v47 = vld [vmem:[%s8608_s1 + $0x6c0] ss:$56 sps:$4 sm:$0xff]   ;;  %8642 = vst [vmem:[#allocation13_spill] sm:$0xff] %v7889_v16 }
 0x17e   : > { %3791 = vmatmul.mubr.bf16.gmra.mrb[88].mxu1 %v7843_v59  ;;  %v6240_v59 = vld [vmem:[%s8608_s1 + $0x9c8] ss:$56 sps:$4 sm:$0xff]  }
 0x17f   : > { %4027 = vmatmul.mubr.bf16.gmra.mrb[92].mxu0 %v7247_v31  ;;  %4062 = vmatpush1.bf16.msra.mxu1 %v6183_v28  ;;  %v6206_v31 = vld [vmem:[%s8608_s1 + $0x734] ss:$56 sps:$4 sm:$0xff]  }
 0x180   : > { %4292 = vmatpush1.bf16.msra.mxu0 %v6186_v40  ;;  %4063 = vmatprep.subr.bf16.mxu1 %v6191_v37  ;;  %v6200_v28 = vld [vmem:[%s8608_s1 + $0x6bc] ss:$56 sps:$4 sm:$0xff]   ;;  %v6204_v40 = vld [vmem:[%s8608_s1 + $0x730] ss:$56 sps:$4 sm:$0xff]  }
 0x181   : > { %4293 = vmatprep.subr.bf16.mxu0 %v6194_v25  ;;  %5346 = vmatprep.mubr.msk.bf16.mxu1 %vm2882_vm0, %v7889_v16  ;;  %v7904_v37 = vld [vmem:[%s6494_s21 + $0xe8] ss:$16 sps:$4 sm:$0xff]   ;;  %v6209_v25 = vld [vmem:[%s8608_s1 + $0x7a4] ss:$56 sps:$4 sm:$0xff]  }
 0x182   : > { %4295 = vmatprep.mubr.bf16.mxu0 %v7265_v50  ;;  %8643 = vst [vmem:[#allocation14_spill] sm:$0xff] %v7904_v37 }
 0x183   : > { %4064 = vmatpush1.bf16.msra.mxu1 %v6189_v1  ;;  %v6198_v1 = vld [vmem:[%s8608_s1 + $0x6b8] ss:$56 sps:$4 sm:$0xff]  }
 0x184   : > { %4294 = vmatpush1.bf16.msra.mxu0 %v6192_v47  ;;  %4065 = vmatprep.subr.bf16.mxu1 %v6197_v42  ;;  %v6203_v47 = vld [vmem:[%s8608_s1 + $0x72c] ss:$56 sps:$4 sm:$0xff]   ;;  %v6207_v42 = vld [vmem:[%s8608_s1 + $0x7a0] ss:$56 sps:$4 sm:$0xff]  }
 0x185   : > { %4376 = vmatprep.subr.bf16.mxu0 %v6206_v31  ;;  %v6201_v31 = vld [vmem:[%s8608_s1 + $0x728] ss:$56 sps:$4 sm:$0xff]  }
 0x186   : > { %3801 = vmatmul.mubr.bf16.gmra.mrb[92].mxu1 %v7904_v37 }
 0x187   : > { %4296 = vmatmul.mubr.bf16.vlgmr.msra.gmra.mrb[96].mxu0 %v7279_v45  ;;  %4066 = vmatpush1.bf16.msra.mxu1 %v6195_v43  ;;  %v6215_v43 = vld [vmem:[%s8608_s1 + $0x814] ss:$56 sps:$4 sm:$0xff]  }
 0x188   : > { %4069 = vmatprep.mubr.bf16.mxu1 %v7265_v50  ;;  %4067 = vmatprep.subr.bf16.mxu1 %v6200_v28  ;;  %v6212_v50 = vld [vmem:[%s8608_s1 + $0x79c] ss:$56 sps:$4 sm:$0xff]   ;;  %v6213_v28 = vld [vmem:[%s8608_s1 + $0x810] ss:$56 sps:$4 sm:$0xff]  }
 0x189   : > { %4305 = vmatprep.mubr.bf16.mxu0 %v7290_v12  ;;  %4377 = vmatpush1.bf16.msra.mxu0 %v6204_v40  ;;  %v6210_v40 = vld [vmem:[%s8608_s1 + $0x798] ss:$56 sps:$4 sm:$0xff]  }
 0x18a   : > { %4378 = vmatprep.subr.bf16.mxu0 %v6209_v25  ;;  %v6221_v25 = vld [vmem:[%s8608_s1 + $0x884] ss:$56 sps:$4 sm:$0xff]  }
 0x18b   : > { %4068 = vmatpush1.bf16.msra.mxu1 %v6198_v1  ;;  %v6216_v1 = vld [vmem:[%s8608_s1 + $0x808] ss:$56 sps:$4 sm:$0xff]  }
 0x18c   : > { %4150 = vmatprep.subr.bf16.mxu1 %v6203_v47  ;;  %v6224_v47 = vld [vmem:[%s8608_s1 + $0x87c] ss:$56 sps:$4 sm:$0xff]  }
 0x18d   : > { %4379 = vmatpush1.bf16.msra.mxu0 %v6207_v42  ;;  %v6227_v42 = vld [vmem:[%s8608_s1 + $0x8f4] ss:$56 sps:$4 sm:$0xff]  }
 0x18e   : > { %4070 = vmatmul.mubr.bf16.vlgmr.msra.gmra.mrb[96].mxu1 %v7279_v45  ;;  %v6218_v45 = vld [vmem:[%s8608_s1 + $0x80c] ss:$56 sps:$4 sm:$0xff]   ;;  %4380 = vmatprep.subr.bf16.mxu0 %v6215_v43 }
 0x18f   : > { %4306 = vmatmul.mubr.bf16.gmra.mrb[100].mxu0 %v7310_v18  ;;  %4151 = vmatpush1.bf16.msra.mxu1 %v6201_v31  ;;  %v6222_v31 = vld [vmem:[%s8608_s1 + $0x878] ss:$56 sps:$4 sm:$0xff]   ;;  %v6230_v43 = vld [vmem:[%s8608_s1 + $0x8ec] ss:$56 sps:$4 sm:$0xff]  }
 0x190   : > { %4079 = vmatprep.mubr.bf16.mxu1 %v7290_v12  ;;  %4152 = vmatprep.subr.bf16.mxu1 %v6212_v50  ;;  %v6219_v12 = vld [vmem:[%s8608_s1 + $0x880] ss:$56 sps:$4 sm:$0xff]   ;;  %v6225_v50 = vld [vmem:[%s8608_s1 + $0x8f0] ss:$56 sps:$4 sm:$0xff]  }
 0x191   : > { %4315 = vmatprep.mubr.bf16.mxu0 %v7324_v57  ;;  %4381 = vmatpush1.bf16.msra.mxu0 %v6213_v28 }
 0x192   : > { %4382 = vmatprep.subr.bf16.mxu0 %v6221_v25 }
 0x193   : > { %4153 = vmatpush1.bf16.msra.mxu1 %v6210_v40 }
 0x194   : > { %4154 = vmatprep.subr.bf16.mxu1 %v6218_v45  ;;  %v6231_v45 = vld [vmem:[%s8608_s1 + $0x960] ss:$56 sps:$4 sm:$0xff]  }
 0x195   : > { %4383 = vmatpush1.bf16.msra.mxu0 %v6219_v12  ;;  %v6236_v12 = vld [vmem:[%s8608_s1 + $0x95c] ss:$56 sps:$4 sm:$0xff]  }
 0x196   : > { %4080 = vmatmul.mubr.bf16.gmra.mrb[100].mxu1 %v7310_v18  ;;  %v6233_v18 = vld [vmem:[%s8608_s1 + $0x964] ss:$56 sps:$4 sm:$0xff]   ;;  %4384 = vmatprep.subr.bf16.mxu0 %v6227_v42  ;;  %v6234_v42 = vld [vmem:[%s8608_s1 + $0x958] ss:$56 sps:$4 sm:$0xff]  }
 0x197   : > { %4316 = vmatmul.mubr.bf16.gmra.mrb[104].mxu0 %v7344_v63  ;;  %4155 = vmatpush1.bf16.msra.mxu1 %v6216_v1 }
 0x198   : > { %4156 = vmatprep.subr.bf16.mxu1 %v6224_v47  ;;  %4089 = vmatprep.mubr.bf16.mxu1 %v7324_v57  ;;  %v6228_v57 = vld [vmem:[%s8608_s1 + $0x8e8] ss:$56 sps:$4 sm:$0xff]   ;;  %v6239_v47 = vld [vmem:[%s8608_s1 + $0x9d4] ss:$56 sps:$4 sm:$0xff]  }
 0x199   : > { %4325 = vmatprep.mubr.bf16.mxu0 %v7361_v4  ;;  %4385 = vmatpush1.bf16.msra.mxu0 %v6225_v50  ;;  %v6242_v50 = vld [vmem:[%s8608_s1 + $0x9cc] ss:$56 sps:$4 sm:$0xff]  }
 0x19a   : > { %v3506_v28 = vpop.f32.mrb[32].mxu0  ;;  %4386 = vmatprep.subr.bf16.mxu0 %v6233_v18 }
 0x19b   : > { %v7975_v40 = vpop.f32.mrb[33].mxu0  ;;  %4157 = vmatpush1.bf16.msra.mxu1 %v6222_v31  ;;  %v6237_v31 = vld [vmem:[%s8608_s1 + $0x9d0] ss:$56 sps:$4 sm:$0xff]  }
 0x19c   : > { %v3510_v25 = vpop.f32.mrb[34].mxu0  ;;  %4158 = vmatprep.subr.bf16.mxu1 %v6230_v43 }
 0x19d   : > { %v7983_v1 = vpop.f32.mrb[35].mxu0  ;;  %4387 = vmatpush1.bf16.msra.mxu0 %v6231_v45 }
 0x19e   : > { %4090 = vmatmul.mubr.bf16.gmra.mrb[104].mxu1 %v7344_v63  ;;  %v6245_v63 = vld [vmem:[%s8608_s1 + $0xa44] ss:$56 sps:$4 sm:$0xff]   ;;  %4388 = vmatprep.subr.bf16.mxu0 %v6239_v47 }
 0x19f   : > { %4326 = vmatmul.mubr.bf16.gmra.mrb[108].mxu0 %v7381_v14  ;;  %4159 = vmatpush1.bf16.msra.mxu1 %v6228_v57  ;;  %v8644_v57 = vmax.f32 %v7398_v21, %v7406_v27  ;;  %v8645_v21 = vmax.f32 %v7408_v29, %v7413_v35  ;;  %v6246_v29 = vld [vmem:[%s8608_s1 + $0xa38] ss:$56 sps:$4 sm:$0xff]  }
 0x1a0   : > { %4099 = vmatprep.mubr.bf16.mxu1 %v7361_v4  ;;  %4160 = vmatprep.subr.bf16.mxu1 %v6236_v12  ;;  %v6249_v35 = vld [vmem:[%s8608_s1 + $0xab0] ss:$56 sps:$4 sm:$0xff]  }
 0x1a1   : > { %v3280_v43 = vpop.f32.mrb[32].mxu1  ;;  %4335 = vmatprep.mubr.bf16.mxu0 %v7395_v20  ;;  %4389 = vmatpush1.bf16.msra.mxu0 %v6237_v31  ;;  %v6251_v31 = vld [vmem:[%s8608_s1 + $0xab4] ss:$56 sps:$4 sm:$0xff]  }
 0x1a2   : > { %v3516_v18 = vpop.f32.mrb[36].mxu0  ;;  %v4507_v45 = vmax.f32 %v8644_v57, %v3280_v43  ;;  %v3282_v37 = vpop.f32.mrb[33].mxu1  ;;  %4390 = vmatprep.subr.bf16.mxu0 %v6245_v63 }
 0x1a3   : > { %v8010_v4 = vpop.f32.mrb[37].mxu0  ;;  %v3284_v12 = vpop.f32.mrb[34].mxu1  ;;  %4161 = vmatpush1.bf16.msra.mxu1 %v6234_v42  ;;  %v6248_v42 = vld [vmem:[%s8608_s1 + $0xa3c] ss:$56 sps:$4 sm:$0xff]  }
 0x1a4   : > { %v3520_v16 = vpop.f32.mrb[38].mxu0  ;;  %v4523_v47 = vmax.f32 %v4507_v45, %v3282_v37  ;;  %v4508_v27 = vmax.f32 %v8645_v21, %v3284_v12  ;;  %v3286_v43 = vpop.f32.mrb[35].mxu1  ;;  %4162 = vmatprep.subr.bf16.mxu1 %v6242_v50 }
 0x1a5   : > { %v8021_v57 = vpop.f32.mrb[39].mxu0  ;;  %4391 = vmatpush1.bf16.msra.mxu0 %v6243_v54  ;;  %v6257_v54 = vld [vmem:[%s8608_s1 + $0xaac] ss:$56 sps:$4 sm:$0xff]  }
 0x1a6   : > { %v8029_v26 = vmax.f32 %v4523_v47, %v3506_v28  ;;  %v4524_v37 = vmax.f32 %v4508_v27, %v3286_v43  ;;  %4100 = vmatmul.mubr.bf16.gmra.mrb[108].mxu1 %v7381_v14  ;;  %v6254_v14 = vld [vmem:[%s8608_s1 + $0xb24] ss:$56 sps:$4 sm:$0xff]   ;;  %4392 = vmatprep.subr.bf16.mxu0 %v6251_v31  ;;  %v6252_v43 = vld [vmem:[%s8608_s1 + $0xb20] ss:$56 sps:$4 sm:$0xff]  }
 0x1a7   : > { %4336 = vmatmul.mubr.bf16.gmra.mrb[112].mxu0 %v7428_v41  ;;  %4163 = vmatpush1.bf16.msra.mxu1 %v6240_v59 }
 0x1a8   : > { %v8039_v50 = vmax.f32 %v4524_v37, %v3510_v25  ;;  %4109 = vmatprep.mubr.bf16.mxu1 %v7395_v20  ;;  %4345 = vmatprep.mubr.bf16.mxu0 %v7435_v44  ;;  %v4555_v59 = vmax.f32 %v8029_v26, %v7975_v40  ;;  %v8646_v20 = vmax.f32 %v7450_v53, %v7452_v24 }
 0x1a9   : > { %v3290_v28 = vpop.f32.mrb[36].mxu1  ;;  %4164 = vmatprep.subr.bf16.mxu1 %v6248_v42  ;;  %4393 = vmatpush1.bf16.msra.mxu0 %v6249_v35  ;;  %v6255_v42 = vld [vmem:[%s8608_s1 + $0xaa8] ss:$56 sps:$4 sm:$0xff]   ;;  %v8647_v24 = vmax.f32 %v7454_v60, %v7459_v0  ;;  %v6263_v35 = vld [vmem:[%s8608_s1 + $0xb1c] ss:$56 sps:$4 sm:$0xff]  }
 0x1aa   : > { %v3526_v63 = vpop.f32.mrb[40].mxu0  ;;  %v4509_v25 = vmax.f32 %v8646_v20, %v3290_v28  ;;  %v3292_v45 = vpop.f32.mrb[37].mxu1  ;;  %v4556_v47 = vmax.f32 %v8039_v50, %v7983_v1  ;;  %4394 = vmatprep.subr.bf16.mxu0 %v6254_v14  ;;  %v6258_v60 = vld [vmem:[%s8608_s1 + $0xb90] ss:$56 sps:$4 sm:$0xff]  }
 0x1ab   : > { %v8054_v12 = vpop.f32.mrb[41].mxu0  ;;  %v3294_v21 = vpop.f32.mrb[38].mxu1  ;;  %4165 = vmatpush1.bf16.msra.mxu1 %v6246_v29  ;;  %v6260_v29 = vld [vmem:[%s8608_s1 + $0xb94] ss:$56 sps:$4 sm:$0xff]   ;;  %v6261_v0 = vld [vmem:[%s8608_s1 + $0xb18] ss:$56 sps:$4 sm:$0xff]  }
 0x1ac   : > { %v3530_v27 = vpop.f32.mrb[42].mxu0  ;;  %v4525_v53 = vmax.f32 %v4509_v25, %v3292_v45  ;;  %v4510_v31 = vmax.f32 %v8647_v24, %v3294_v21  ;;  %v3296_v37 = vpop.f32.mrb[39].mxu1  ;;  %4166 = vmatprep.subr.bf16.mxu1 %v6257_v54 }
 0x1ad   : > { %v8067_v28 = vpop.f32.mrb[43].mxu0  ;;  %4395 = vmatpush1.bf16.msra.mxu0 %v6252_v43 }
 0x1ae   : > { %v8075_v20 = vmax.f32 %v4525_v53, %v3516_v18  ;;  %v4526_v25 = vmax.f32 %v4510_v31, %v3296_v37  ;;  %4110 = vmatmul.mubr.bf16.gmra.mrb[112].mxu1 %v7428_v41  ;;  %v6266_v41 = vld [vmem:[%s8608_s1 + $0xc04] ss:$56 sps:$4 sm:$0xff]   ;;  %4396 = vmatprep.subr.bf16.mxu0 %v6260_v29  ;;  %v6264_v37 = vld [vmem:[%s8608_s1 + $0xc00] ss:$56 sps:$4 sm:$0xff]  }
 0x1af   : > { %4346 = vmatmul.mubr.bf16.gmra.mrb[116].mxu0 %v7474_v7  ;;  %4167 = vmatpush1.bf16.msra.mxu1 %v6255_v42  ;;  %v6269_v18 = vld [vmem:[%s8608_s1 + $0xb8c] ss:$56 sps:$4 sm:$0xff]  }
 0x1b0   : > { %v8085_v14 = vmax.f32 %v4526_v25, %v3520_v16  ;;  %4119 = vmatprep.mubr.bf16.mxu1 %v7435_v44  ;;  %4355 = vmatprep.mubr.bf16.mxu0 %v7481_v8  ;;  %v4557_v54 = vmax.f32 %v8075_v20, %v8010_v4  ;;  %v8648_v44 = vmax.f32 %v7490_v15, %v7492_v19 }
 0x1b1   : > { %v3300_v45 = vpop.f32.mrb[40].mxu1  ;;  %4168 = vmatprep.subr.bf16.mxu1 %v6263_v35  ;;  %4397 = vmatpush1.bf16.msra.mxu0 %v6258_v60  ;;  %v8649_v35 = vmax.f32 %v7497_v23, %v7502_v32  ;;  %v6272_v60 = vld [vmem:[%s8608_s1 + $0xc74] ss:$56 sps:$4 sm:$0xff]   ;;  %v6270_v32 = vld [vmem:[%s8608_s1 + $0xc70] ss:$56 sps:$4 sm:$0xff]  }
 0x1b2   : > { %v3536_v21 = vpop.f32.mrb[44].mxu0  ;;  %v4511_v16 = vmax.f32 %v8648_v44, %v3300_v45  ;;  %v3302_v43 = vpop.f32.mrb[41].mxu1  ;;  %v4558_v53 = vmax.f32 %v8085_v14, %v8021_v57  ;;  %4398 = vmatprep.subr.bf16.mxu0 %v6266_v41  ;;  %v6267_v45 = vld [vmem:[%s8608_s1 + $0xb88] ss:$56 sps:$4 sm:$0xff]  }
 0x1b3   : > { %v8100_v42 = vpop.f32.mrb[45].mxu0  ;;  %v3304_v24 = vpop.f32.mrb[42].mxu1  ;;  %4169 = vmatpush1.bf16.msra.mxu1 %v6261_v0  ;;  %v6275_v0 = vld [vmem:[%s8608_s1 + $0xbfc] ss:$56 sps:$4 sm:$0xff]  }
 0x1b4   : > { %v3540_v31 = vpop.f32.mrb[46].mxu0  ;;  %v4527_v29 = vmax.f32 %v4511_v16, %v3302_v43  ;;  %v4512_v15 = vmax.f32 %v8649_v35, %v3304_v24  ;;  %v3306_v19 = vpop.f32.mrb[43].mxu1  ;;  %4170 = vmatprep.subr.bf16.mxu1 %v6269_v18  ;;  %v8650_v43 = vmax.f32 %v7536_v56, %v7538_v30 }
 0x1b5   : > { %v8110_v25 = vpop.f32.mrb[47].mxu0  ;;  %4399 = vmatpush1.bf16.msra.mxu0 %v6264_v37 }
 0x1b6   : > { %v8121_v44 = vmax.f32 %v4527_v29, %v3526_v63  ;;  %v4528_v23 = vmax.f32 %v4512_v15, %v3306_v19  ;;  %4120 = vmatmul.mubr.bf16.gmra.mrb[116].mxu1 %v7474_v7  ;;  %v6273_v63 = vld [vmem:[%s8608_s1 + $0xbf8] ss:$56 sps:$4 sm:$0xff]   ;;  %v6278_v7 = vld [vmem:[%s8608_s1 + $0xce4] ss:$56 sps:$4 sm:$0xff]   ;;  %4400 = vmatprep.subr.bf16.mxu0 %v6272_v60 }
 0x1b7   : > { %4356 = vmatmul.mubr.bf16.gmra.mrb[120].mxu0 %v7514_v38  ;;  %4129 = vmatprep.mubr.bf16.mxu1 %v7481_v8 }
 0x1b8   : > { %v8129_v41 = vmax.f32 %v4528_v23, %v3530_v27  ;;  %4171 = vmatpush1.bf16.msra.mxu1 %v6267_v45  ;;  %4365 = vmatprep.mubr.bf16.mxu0 %v7524_v46  ;;  %v4559_v8 = vmax.f32 %v8121_v44, %v8054_v12  ;;  %v6281_v27 = vld [vmem:[%s8608_s1 + $0xc6c] ss:$56 sps:$4 sm:$0xff]   ;;  %v6276_v45 = vld [vmem:[%s8608_s1 + $0xce0] ss:$56 sps:$4 sm:$0xff]  }
 0x1b9   : > { %v3310_v18 = vpop.f32.mrb[44].mxu1  ;;  %4172 = vmatprep.subr.bf16.mxu1 %v6275_v0  ;;  %4401 = vmatpush1.bf16.msra.mxu0 %v6270_v32  ;;  %v8651_v0 = vmax.f32 %v7543_v2, %v7548_v13  ;;  %v6284_v32 = vld [vmem:[%s8608_s1 + $0xcdc] ss:$56 sps:$4 sm:$0xff]   ;;  %v6282_v13 = vld [vmem:[%s8608_s1 + $0xcd8] ss:$56 sps:$4 sm:$0xff]  }
 0x1ba   : > { %v3546_v16 = vpop.f32.mrb[48].mxu0  ;;  %v4513_v24 = vmax.f32 %v8650_v43, %v3310_v18  ;;  %v3312_v37 = vpop.f32.mrb[45].mxu1  ;;  %v4560_v35 = vmax.f32 %v8129_v41, %v8067_v28  ;;  %4402 = vmatprep.subr.bf16.mxu0 %v6278_v7  ;;  %v6279_v18 = vld [vmem:[%s8608_s1 + $0xc68] ss:$56 sps:$4 sm:$0xff]   ;;  %v8652_v7 = vmax.f32 %v7577_v34, %v7579_v49 }
 0x1bb   : > { %v8146_v29 = vpop.f32.mrb[49].mxu0  ;;  %v3314_v15 = vpop.f32.mrb[46].mxu1 }
 0x1bc   : > { %v3550_v19 = vpop.f32.mrb[50].mxu0  ;;  %v4529_v60 = vmax.f32 %v4513_v24, %v3312_v37  ;;  %v4514_v23 = vmax.f32 %v8651_v0, %v3314_v15  ;;  %v3316_v56 = vpop.f32.mrb[47].mxu1  ;;  %4173 = vmatpush1.bf16.msra.mxu1 %v6273_v63  ;;  %v8653_v0 = vmax.f32 %v7584_v62, %v7589_v11 }
 0x1bd   : > { %v8156_v30 = vpop.f32.mrb[51].mxu0  ;;  %4174 = vmatprep.subr.bf16.mxu1 %v6281_v27  ;;  %4403 = vmatpush1.bf16.msra.mxu0 %v6276_v45 }
 0x1be   : > { %v8164_v43 = vmax.f32 %v4529_v60, %v3536_v21  ;;  %v4530_v24 = vmax.f32 %v4514_v23, %v3316_v56  ;;  %4130 = vmatmul.mubr.bf16.gmra.mrb[120].mxu1 %v7514_v38 }
 0x1bf   : > { %4366 = vmatmul.mubr.bf16.gmra.mrb[124].mxu0 %v7560_v3  ;;  %4139 = vmatprep.mubr.bf16.mxu1 %v7524_v46 }
 0x1c0   : > { %v8169_v2 = vmax.f32 %v4530_v24, %v3540_v31  ;;  %5363 = vmatprep.mubr.msk.bf16.mxu0 %vm2882_vm0, %v7567_v22  ;;  %4175 = vmatpush1.bf16.msra.mxu1 %v6279_v18  ;;  %v4561_v21 = vmax.f32 %v8164_v43, %v8100_v42 }
 0x1c1   : > { %v3320_v63 = vpop.f32.mrb[48].mxu1  ;;  %4176 = vmatprep.subr.bf16.mxu1 %v6284_v32 }
 0x1c2   : > { %v3556_v38 = vpop.f32.mrb[52].mxu0  ;;  %v4515_v46 = vmax.f32 %v8652_v7, %v3320_v63  ;;  %v3322_v31 = vpop.f32.mrb[49].mxu1 }
 0x1c3   : > { %v8181_v27 = vpop.f32.mrb[53].mxu0  ;;  %v3324_v15 = vpop.f32.mrb[50].mxu1 }
 0x1c4   : > { %v3560_v45 = vpop.f32.mrb[54].mxu0  ;;  %v4531_v60 = vmax.f32 %v4515_v46, %v3322_v31  ;;  %v4516_v23 = vmax.f32 %v8653_v0, %v3324_v15  ;;  %v3326_v56 = vpop.f32.mrb[51].mxu1  ;;  %4177 = vmatpush1.bf16.msra.mxu1 %v6282_v13  ;;  %v8656_v15 = vld [vmem:[#allocation3_spill] sm:$0xff] }
 0x1c5   : > { %v8188_v18 = vpop.f32.mrb[55].mxu0 }
 0x1c6   : > { %v8190_v32 = vmax.f32 %v4531_v60, %v3546_v16  ;;  %v4532_v34 = vmax.f32 %v4516_v23, %v3326_v56  ;;  %4140 = vmatmul.mubr.bf16.gmra.mrb[124].mxu1 %v7560_v3  ;;  %v8654_v16 = vmax.f32 %v7613_v39, %v7615_v36 }
 0x1c7   : > { %4409 = vmatmul.mubr.bf16.vlgmr.msra.gmra.mrb[96].mxu0 %v7595_v55  ;;  %5355 = vmatprep.mubr.msk.bf16.mxu1 %vm2882_vm0, %v7567_v22 }
 0x1c8   : > { %5364 = vmatprep.mubr.msk.bf16.mxu0 %vm2882_vm0, %v7606_v61  ;;  %v8198_v49 = vmax.f32 %v4532_v34, %v3550_v19  ;;  %v8655_v19 = vld [vmem:[#allocation2_spill] sm:$0xff] }
 0x1c9   : > { %v3330_v11 = vpop.f32.mrb[52].mxu1  ;;  %v8657_v60 = vmax.f32 %v8655_v19, %v8656_v15 }
 0x1ca   : > { %v3566_v24 = vpop.f32.mrb[56].mxu0  ;;  %v4517_v13 = vmax.f32 %v8654_v16, %v3330_v11  ;;  %v3332_v3 = vpop.f32.mrb[53].mxu1 }
 0x1cb   : > { %v8205_v63 = vpop.f32.mrb[57].mxu0  ;;  %v3334_v7 = vpop.f32.mrb[54].mxu1 }
 0x1cc   : > { %v3570_v46 = vpop.f32.mrb[58].mxu0  ;;  %v4533_v31 = vmax.f32 %v4517_v13, %v3332_v3  ;;  %v4518_v0 = vmax.f32 %v8657_v60, %v3334_v7  ;;  %v3336_v23 = vpop.f32.mrb[55].mxu1  ;;  %v8659_v3 = vld [vmem:[#allocation5_spill] sm:$0xff] }
 0x1cd   : > { %v8212_v56 = vpop.f32.mrb[59].mxu0 }
 0x1ce   : > { %v8214_v34 = vmax.f32 %v4533_v31, %v3556_v38  ;;  %v4534_v39 = vmax.f32 %v4518_v0, %v3336_v23  ;;  %4183 = vmatmul.mubr.bf16.vlgmr.msra.gmra.mrb[96].mxu1 %v7595_v55  ;;  %v8658_v38 = vld [vmem:[#allocation4_spill] sm:$0xff]  ;;  %v8662_v23 = vld [vmem:[#allocation7_spill] sm:$0xff] }
 0x1cf   : > { %4419 = vmatmul.mubr.bf16.gmra.mrb[100].mxu0 %v7637_v58  ;;  %5356 = vmatprep.mubr.msk.bf16.mxu1 %vm2882_vm0, %v7606_v61  ;;  %v8660_v7 = vmax.f32 %v8658_v38, %v8659_v3 }
 0x1d0   : > { %5365 = vmatprep.mubr.msk.bf16.mxu0 %vm2882_vm0, %v7657_v6  ;;  %v8222_v36 = vmax.f32 %v4534_v39, %v3560_v45  ;;  %v8661_v45 = vld [vmem:[#allocation6_spill] sm:$0xff] }
 0x1d1   : > { %v3340_v16 = vpop.f32.mrb[56].mxu1  ;;  %v8663_v39 = vmax.f32 %v8661_v45, %v8662_v23 }
 0x1d2   : > { %v3576_v13 = vpop.f32.mrb[60].mxu0  ;;  %v4519_v31 = vmax.f32 %v8660_v7, %v3340_v16  ;;  %v3342_v55 = vpop.f32.mrb[57].mxu1  ;;  %v4566_v61 = vmax.f32 %v8222_v36, %v8188_v18 }
 0x1d3   : > { %v8229_v19 = vpop.f32.mrb[61].mxu0  ;;  %v3344_v15 = vpop.f32.mrb[58].mxu1 }
 0x1d4   : > { %v3580_v60 = vpop.f32.mrb[62].mxu0  ;;  %v4535_v0 = vmax.f32 %v4519_v31, %v3342_v55  ;;  %v4520_v22 = vmax.f32 %v8663_v39, %v3344_v15  ;;  %v3346_v11 = vpop.f32.mrb[59].mxu1 }
 0x1d5   : > { %v8236_v62 = vpop.f32.mrb[63].mxu0 }
 0x1d6   : > { %v8238_v37 = vmax.f32 %v4535_v0, %v3566_v24  ;;  %v4536_v38 = vmax.f32 %v4520_v22, %v3346_v11  ;;  %4193 = vmatmul.mubr.bf16.gmra.mrb[100].mxu1 %v7637_v58  ;;  %v8664_v24 = vmax.f32 %v7709_v17, %v7711_v9 }
 0x1d7   : > { %4429 = vmatmul.mubr.bf16.gmra.mrb[104].mxu0 %v7685_v5  ;;  %5357 = vmatprep.mubr.msk.bf16.mxu1 %vm2882_vm0, %v7657_v6  ;;  %v8665_v6 = vmax.f32 %v7719_v48, %v7727_v10  ;;  %v8666_v10 = vld [vmem:[#allocation8_spill] sm:$0xff] }
 0x1d8   : > { %5366 = vmatprep.mubr.msk.bf16.mxu0 %vm2882_vm0, %v7705_v33  ;;  %v8246_v16 = vmax.f32 %v4536_v38, %v3570_v46  ;;  %v4567_v3 = vmax.f32 %v8238_v37, %v8205_v63 }
 0x1d9   : > { %v3350_v7 = vpop.f32.mrb[60].mxu1 }
 0x1da   : > { %v4521_v22 = vmax.f32 %v8664_v24, %v3350_v7  ;;  %v3352_v11 = vpop.f32.mrb[61].mxu1  ;;  %v4568_v58 = vmax.f32 %v8246_v16, %v8212_v56 }
 0x1db   : > { %v3354_v31 = vpop.f32.mrb[62].mxu1 }
 0x1dc   : > { %v4537_v55 = vmax.f32 %v4521_v22, %v3352_v11  ;;  %v4522_v15 = vmax.f32 %v8665_v6, %v3354_v31  ;;  %v3356_v46 = vpop.f32.mrb[63].mxu1 }
 0x1de   : > { %v8258_v0 = vmax.f32 %v4537_v55, %v3576_v13  ;;  %v4538_v45 = vmax.f32 %v4522_v15, %v3356_v46  ;;  %4203 = vmatmul.mubr.bf16.gmra.mrb[104].mxu1 %v7685_v5  ;;  %v8667_v5 = vld [vmem:[#allocation9_spill] sm:$0xff]  ;;  %v8669_v13 = vld [vmem:[#allocation11_spill] sm:$0xff] }
 0x1df   : > { %4439 = vmatmul.mubr.bf16.gmra.mrb[108].mxu0 %v7733_v51  ;;  %5358 = vmatprep.mubr.msk.bf16.mxu1 %vm2882_vm0, %v7705_v33  ;;  %v8668_v33 = vld [vmem:[#allocation10_spill] sm:$0xff] }
 0x1e0   : > { %5367 = vmatprep.mubr.msk.bf16.mxu0 %vm2882_vm0, %v7753_v52  ;;  %v8266_v17 = vmax.f32 %v4538_v45, %v3580_v60  ;;  %v4569_v48 = vmax.f32 %v8258_v0, %v8229_v19  ;;  %v8672_v60 = vld [vmem:[#allocation14_spill] sm:$0xff] }
 0x1e2   : > { %v4570_v9 = vmax.f32 %v8266_v17, %v8236_v62 }
 0x1e6   : > { %4213 = vmatmul.mubr.bf16.gmra.mrb[108].mxu1 %v7733_v51  ;;  %v8670_v51 = vld [vmem:[#allocation12_spill] sm:$0xff] }
 0x1e7   : > { %4449 = vmatmul.mubr.bf16.gmra.mrb[112].mxu0 %v8666_v10  ;;  %5359 = vmatprep.mubr.msk.bf16.mxu1 %vm2882_vm0, %v7753_v52  ;;  %v8671_v52 = vld [vmem:[#allocation13_spill] sm:$0xff] }
 0x1e8   : > { %5368 = vmatprep.mubr.msk.bf16.mxu0 %vm2882_vm0, %v8667_v5 }
 0x1ee   : > { %4223 = vmatmul.mubr.bf16.gmra.mrb[112].mxu1 %v8666_v10 }
 0x1ef   : > { %4459 = vmatmul.mubr.bf16.gmra.mrb[116].mxu0 %v8668_v33  ;;  %5360 = vmatprep.mubr.msk.bf16.mxu1 %vm2882_vm0, %v8667_v5 }
 0x1f0   : > { %5369 = vmatprep.mubr.msk.bf16.mxu0 %vm2882_vm0, %v8669_v13 }
 0x1f6   : > { %4233 = vmatmul.mubr.bf16.gmra.mrb[116].mxu1 %v8668_v33 }
 0x1f7   : > { %4469 = vmatmul.mubr.bf16.gmra.mrb[120].mxu0 %v8670_v51  ;;  %5361 = vmatprep.mubr.msk.bf16.mxu1 %vm2882_vm0, %v8669_v13 }
 0x1f8   : > { %5370 = vmatprep.mubr.msk.bf16.mxu0 %vm2882_vm0, %v8671_v52 }
 0x1fe   : > { %4243 = vmatmul.mubr.bf16.gmra.mrb[120].mxu1 %v8670_v51 }
 0x1ff   : > { %4479 = vmatmul.mubr.bf16.gmra.mrb[124].mxu0 %v8672_v60  ;;  %5362 = vmatprep.mubr.msk.bf16.mxu1 %vm2882_vm0, %v8671_v52 }
 0x206   : > { %4253 = vmatmul.mubr.bf16.gmra.mrb[124].mxu1 %v8672_v60 }
 0x21a   : > { %v3958_v23 = vpop.f32.mrb[64].mxu0 }
 0x21b   : > { %v8295_v39 = vpop.f32.mrb[65].mxu0 }
 0x21c   : > { %v3962_v38 = vpop.f32.mrb[66].mxu0 }
 0x21d   : > { %v8297_v7 = vpop.f32.mrb[67].mxu0 }
 0x221   : > { %v3732_v24 = vpop.f32.mrb[64].mxu1 }
 0x222   : > { %v3968_v22 = vpop.f32.mrb[68].mxu0  ;;  %v4571_v11 = vmax.f32 %v4555_v59, %v3732_v24  ;;  %v3734_v31 = vpop.f32.mrb[65].mxu1 }
 0x223   : > { %v8302_v55 = vpop.f32.mrb[69].mxu0  ;;  %v3736_v6 = vpop.f32.mrb[66].mxu1 }
 0x224   : > { %v3972_v15 = vpop.f32.mrb[70].mxu0  ;;  %v4587_v46 = vmax.f32 %v4571_v11, %v3734_v31  ;;  %v4572_v45 = vmax.f32 %v4556_v47, %v3736_v6  ;;  %v3738_v10 = vpop.f32.mrb[67].mxu1 }
 0x225   : > { %v8307_v5 = vpop.f32.mrb[71].mxu0 }
 0x226   : > { %v8309_v33 = vmax.f32 %v4587_v46, %v3958_v23  ;;  %v4588_v13 = vmax.f32 %v4572_v45, %v3738_v10 }
 0x228   : > { %v8311_v51 = vmax.f32 %v4588_v13, %v3962_v38  ;;  %v4619_v26 = vmax.f32 %v8309_v33, %v8295_v39 }
 0x229   : > { %v3742_v40 = vpop.f32.mrb[68].mxu1 }
 0x22a   : > { %v3978_v59 = vpop.f32.mrb[72].mxu0  ;;  %v4573_v52 = vmax.f32 %v4557_v54, %v3742_v40  ;;  %v3744_v60 = vpop.f32.mrb[69].mxu1  ;;  %v4620_v50 = vmax.f32 %v8311_v51, %v8297_v7 }
 0x22b   : > { %v8318_v1 = vpop.f32.mrb[73].mxu0  ;;  %v3746_v47 = vpop.f32.mrb[70].mxu1 }
 0x22c   : > { %v3982_v23 = vpop.f32.mrb[74].mxu0  ;;  %v4589_v24 = vmax.f32 %v4573_v52, %v3744_v60  ;;  %v4574_v38 = vmax.f32 %v4558_v53, %v3746_v47  ;;  %v3748_v11 = vpop.f32.mrb[71].mxu1 }
 0x22d   : > { %v8325_v31 = vpop.f32.mrb[75].mxu0 }
 0x22e   : > { %v8327_v6 = vmax.f32 %v4589_v24, %v3968_v22  ;;  %v4590_v4 = vmax.f32 %v4574_v38, %v3748_v11 }
 0x230   : > { %v8329_v20 = vmax.f32 %v4590_v4, %v3972_v15  ;;  %v4621_v54 = vmax.f32 %v8327_v6, %v8302_v55 }
 0x231   : > { %v3752_v46 = vpop.f32.mrb[72].mxu1 }
 0x232   : > { %v3988_v45 = vpop.f32.mrb[76].mxu0  ;;  %v4575_v10 = vmax.f32 %v4559_v8, %v3752_v46  ;;  %v3754_v13 = vpop.f32.mrb[73].mxu1  ;;  %v4622_v14 = vmax.f32 %v8329_v20, %v8307_v5 }
 0x233   : > { %v8336_v57 = vpop.f32.mrb[77].mxu0  ;;  %v3756_v53 = vpop.f32.mrb[74].mxu1 }
 0x234   : > { %v3992_v22 = vpop.f32.mrb[78].mxu0  ;;  %v4591_v40 = vmax.f32 %v4575_v10, %v3754_v13  ;;  %v4576_v15 = vmax.f32 %v4560_v35, %v3756_v53  ;;  %v3758_v52 = vpop.f32.mrb[75].mxu1 }
 0x235   : > { %v8343_v60 = vpop.f32.mrb[79].mxu0 }
 0x236   : > { %v8345_v47 = vmax.f32 %v4591_v40, %v3978_v59  ;;  %v4592_v12 = vmax.f32 %v4576_v15, %v3758_v52 }
 0x238   : > { %v8347_v44 = vmax.f32 %v4592_v12, %v3982_v23  ;;  %v4623_v8 = vmax.f32 %v8345_v47, %v8318_v1  ;;  %v8673_v23 = vmax.f32 %v8169_v2, %v8110_v25  ;;  %v8674_v12 = vmax.f32 %v8190_v32, %v8146_v29 }
 0x239   : > { %v3762_v24 = vpop.f32.mrb[76].mxu1 }
 0x23a   : > { %v3998_v38 = vpop.f32.mrb[80].mxu0  ;;  %v4577_v11 = vmax.f32 %v4561_v21, %v3762_v24  ;;  %v3764_v4 = vpop.f32.mrb[77].mxu1  ;;  %v4624_v41 = vmax.f32 %v8347_v44, %v8325_v31 }
 0x23b   : > { %v8354_v28 = vpop.f32.mrb[81].mxu0  ;;  %v3766_v35 = vpop.f32.mrb[78].mxu1 }
 0x23c   : > { %v4002_v59 = vpop.f32.mrb[82].mxu0  ;;  %v4593_v46 = vmax.f32 %v4577_v11, %v3764_v4  ;;  %v4578_v10 = vmax.f32 %v8673_v23, %v3766_v35  ;;  %v3768_v13 = vpop.f32.mrb[79].mxu1 }
 0x23d   : > { %v8361_v53 = vpop.f32.mrb[83].mxu0 }
 0x23e   : > { %v8363_v40 = vmax.f32 %v4593_v46, %v3988_v45  ;;  %v4594_v42 = vmax.f32 %v4578_v10, %v3768_v13 }
 0x240   : > { %v8365_v43 = vmax.f32 %v4594_v42, %v3992_v22  ;;  %v4625_v21 = vmax.f32 %v8363_v40, %v8336_v57  ;;  %v8675_v22 = vmax.f32 %v8198_v49, %v8156_v30 }
 0x241   : > { %v3772_v15 = vpop.f32.mrb[80].mxu1 }
 0x242   : > { %v4008_v52 = vpop.f32.mrb[84].mxu0  ;;  %v4579_v24 = vmax.f32 %v8674_v12, %v3772_v15  ;;  %v3774_v11 = vpop.f32.mrb[81].mxu1 }
 0x243   : > { %v8372_v25 = vpop.f32.mrb[85].mxu0  ;;  %v3776_v45 = vpop.f32.mrb[82].mxu1 }
 0x244   : > { %v4012_v4 = vpop.f32.mrb[86].mxu0  ;;  %v4595_v35 = vmax.f32 %v4579_v24, %v3774_v11  ;;  %v4580_v46 = vmax.f32 %v8675_v22, %v3776_v45  ;;  %v3778_v23 = vpop.f32.mrb[83].mxu1  ;;  %v8676_v24 = vmax.f32 %v8214_v34, %v8181_v27 }
 0x245   : > { %v8379_v10 = vpop.f32.mrb[87].mxu0 }
 0x246   : > { %v8381_v13 = vmax.f32 %v4595_v35, %v3998_v38  ;;  %v4596_v29 = vmax.f32 %v4580_v46, %v3778_v23 }
 0x248   : > { %v8383_v32 = vmax.f32 %v4596_v29, %v4002_v59  ;;  %v4627_v42 = vmax.f32 %v8381_v13, %v8354_v28 }
 0x249   : > { %v3782_v15 = vpop.f32.mrb[84].mxu1 }
 0x24a   : > { %v4018_v12 = vpop.f32.mrb[88].mxu0  ;;  %v4581_v11 = vmax.f32 %v8676_v24, %v3782_v15  ;;  %v3784_v2 = vpop.f32.mrb[85].mxu1  ;;  %v4628_v49 = vmax.f32 %v8383_v32, %v8361_v53 }
 0x24b   : > { %v8390_v30 = vpop.f32.mrb[89].mxu0  ;;  %v3786_v38 = vpop.f32.mrb[86].mxu1 }
 0x24c   : > { %v4022_v45 = vpop.f32.mrb[90].mxu0  ;;  %v4597_v35 = vmax.f32 %v4581_v11, %v3784_v2  ;;  %v4582_v59 = vmax.f32 %v4566_v61, %v3786_v38  ;;  %v3788_v22 = vpop.f32.mrb[87].mxu1 }
 0x24d   : > { %v8397_v46 = vpop.f32.mrb[91].mxu0 }
 0x24e   : > { %v8399_v23 = vmax.f32 %v4597_v35, %v4008_v52  ;;  %v4598_v27 = vmax.f32 %v4582_v59, %v3788_v22 }
 0x250   : > { %v8401_v34 = vmax.f32 %v4598_v27, %v4012_v4  ;;  %v4629_v29 = vmax.f32 %v8399_v23, %v8372_v25 }
 0x251   : > { %v3792_v15 = vpop.f32.mrb[88].mxu1 }
 0x252   : > { %v4028_v24 = vpop.f32.mrb[92].mxu0  ;;  %v4583_v2 = vmax.f32 %v4567_v3, %v3792_v15  ;;  %v3794_v11 = vpop.f32.mrb[89].mxu1  ;;  %v4630_v36 = vmax.f32 %v8401_v34, %v8379_v10 }
 0x253   : > { %v8408_v18 = vpop.f32.mrb[93].mxu0  ;;  %v3796_v61 = vpop.f32.mrb[90].mxu1 }
 0x254   : > { %v4032_v52 = vpop.f32.mrb[94].mxu0  ;;  %v4599_v38 = vmax.f32 %v4583_v2, %v3794_v11  ;;  %v4584_v4 = vmax.f32 %v4568_v58, %v3796_v61  ;;  %v3798_v35 = vpop.f32.mrb[91].mxu1 }
 0x255   : > { %v8415_v59 = vpop.f32.mrb[95].mxu0 }
 0x256   : > { %v8417_v22 = vmax.f32 %v4599_v38, %v4018_v12  ;;  %v4600_v37 = vmax.f32 %v4584_v4, %v3798_v35 }
 0x258   : > { %v8419_v63 = vmax.f32 %v4600_v37, %v4022_v45  ;;  %v4631_v3 = vmax.f32 %v8417_v22, %v8390_v30 }
 0x259   : > { %v3802_v27 = vpop.f32.mrb[92].mxu1 }
 0x25a   : > { %v4585_v15 = vmax.f32 %v4569_v48, %v3802_v27  ;;  %v3804_v2 = vpop.f32.mrb[93].mxu1  ;;  %v4632_v56 = vmax.f32 %v8419_v63, %v8397_v46  ;;  %v4489_v48 = vlaneseq }
 0x25b   : > { %v3806_v16 = vpop.f32.mrb[94].mxu1 }
 0x25c   : > { %v4601_v58 = vmax.f32 %v4585_v15, %v3804_v2  ;;  %v4586_v12 = vmax.f32 %v4570_v9, %v3806_v16  ;;  %v3808_v45 = vpop.f32.mrb[95].mxu1  ;;  %v4490_v35 = vand.u32 127, %v4489_v48 }
 0x25e   : > { %v8431_v11 = vmax.f32 %v4601_v58, %v4028_v24  ;;  %v4602_v61 = vmax.f32 %v4586_v12, %v3808_v45  ;;  %vm4667_vm1 = vcmp.ge.s32.totalorder %v4490_v35, 32  ;;  %vm4668_vm2 = vcmp.lt.s32.totalorder %v4490_v35, 48 }
 0x25f   : > { %vm4704_vm3 = vcmp.ge.s32.totalorder %v4490_v35, 16  ;;  %vm4705_vm4 = vcmp.lt.s32.totalorder %v4490_v35, 32  ;;  %vm8439_vm5 = vmand %vm4667_vm1, %vm4668_vm2 }
 0x260   : > { %v8433_v38 = vmax.f32 %v4602_v61, %v4032_v52  ;;  %v4633_v19 = vmax.f32 %v8431_v11, %v8408_v18  ;;  %vm4706_vm6 = vmand %vm4704_vm3, %vm4705_vm4 }
 0x261   : > { %vm8448_vm7 = vmor %vm4706_vm6, %vm8439_vm5 }
 0x29a   : > { %v4410_v4 = vpop.f32.mrb[96].mxu0 }
 0x29b   : > { %v4412_v37 = vpop.f32.mrb[97].mxu0  ;;  %v4672_v39 = vsel %vm8439_vm5, -1e+30, %v4410_v4 }
 0x29c   : > { %v4414_v27 = vpop.f32.mrb[98].mxu0 }
 0x29d   : > { %v4416_v15 = vpop.f32.mrb[99].mxu0  ;;  %v4673_v0 = vsel %vm8439_vm5, -1e+30, %v4414_v27 }
 0x2a1   : > { %v4184_v17 = vpop.f32.mrb[96].mxu1 }
 0x2a2   : > { %v4420_v9 = vpop.f32.mrb[100].mxu0  ;;  %v4635_v24 = vmax.f32 %v4619_v26, %v4184_v17  ;;  %v4186_v52 = vpop.f32.mrb[97].mxu1  ;;  %v4710_v17 = vsel %vm8448_vm7, -1e+30, %v4412_v37 }
 0x2a3   : > { %v4422_v2 = vpop.f32.mrb[101].mxu0  ;;  %v4188_v16 = vpop.f32.mrb[98].mxu1 }
 0x2a4   : > { %v4424_v58 = vpop.f32.mrb[102].mxu0  ;;  %v4651_v45 = vmax.f32 %v4635_v24, %v4186_v52  ;;  %v4636_v61 = vmax.f32 %v4620_v50, %v4188_v16  ;;  %v4190_v48 = vpop.f32.mrb[99].mxu1  ;;  %v8464_v24 = vld [vmem:[%s8609_s2] ss:$0 sm:$0xff]  ;;  %v4711_v50 = vsel %vm8448_vm7, -1e+30, %v4416_v15 }
 0x2a5   : > { %v4426_v35 = vpop.f32.mrb[103].mxu0 }
 0x2a6   : > { %v4688_v33 = vmax.f32 %v4651_v45, %v4672_v39  ;;  %v4652_v26 = vmax.f32 %v4636_v61, %v4190_v48  ;;  %v4713_v5 = vsel %vm8448_vm7, -1e+30, %v4426_v35 }
 0x2a8   : > { %v4726_v7 = vmax.f32 %v4688_v33, %v4710_v17  ;;  %v4689_v51 = vmax.f32 %v4652_v26, %v4673_v0  ;;  %v4674_v26 = vsel %vm8439_vm5, -1e+30, %v4420_v9 }
 0x2a9   : > { %v4194_v4 = vpop.f32.mrb[100].mxu1 }
 0x2aa   : > { %v4430_v52 = vpop.f32.mrb[104].mxu0  ;;  %v4749_v16 = vadd.f32 %v8464_v24, %v4726_v7  ;;  %v4727_v45 = vmax.f32 %v4689_v51, %v4711_v50  ;;  %v4637_v37 = vmax.f32 %v4621_v54, %v4194_v4  ;;  %v4196_v27 = vpop.f32.mrb[101].mxu1  ;;  %v4712_v50 = vsel %vm8448_vm7, -1e+30, %v4422_v2 }
 0x2ab   : > { %v4432_v61 = vpop.f32.mrb[105].mxu0  ;;  %v4198_v0 = vpop.f32.mrb[102].mxu1  ;;  %v4675_v4 = vsel %vm8439_vm5, -1e+30, %v4424_v58 }
 0x2ac   : > { %v4434_v15 = vpop.f32.mrb[106].mxu0  ;;  %v4765_v48 = vmax.f32 %v4749_v16, 0.0  ;;  %v4750_v39 = vadd.f32 %v8464_v24, %v4727_v45  ;;  %v4653_v33 = vmax.f32 %v4637_v37, %v4196_v27  ;;  %v4638_v55 = vmax.f32 %v4622_v14, %v4198_v0  ;;  %v4200_v6 = vpop.f32.mrb[103].mxu1 }
 0x2ad   : > { %v4436_v54 = vpop.f32.mrb[107].mxu0 }
 0x2ae   : > { %4781 = vst [vmem:[%s8476_s16] sm:$0xff] %v4765_v48  ;;  %v4766_v17 = vmax.f32 %v4750_v39, 0.0  ;;  %v4690_v7 = vmax.f32 %v4653_v33, %v4674_v26  ;;  %v4654_v51 = vmax.f32 %v4638_v55, %v4200_v6  ;;  %v4715_v31 = vsel %vm8448_vm7, -1e+30, %v4436_v54 }
 0x2af   : > { %v8681_v54 = vmax.f32 %v8365_v43, %v8343_v60 }
 0x2b0   : > { %4782 = vst [vmem:[%s8476_s16 + $0x8] sm:$0xff] %v4766_v17  ;;  %v4728_v16 = vmax.f32 %v4690_v7, %v4712_v50  ;;  %v4691_v45 = vmax.f32 %v4654_v51, %v4675_v4  ;;  %v4676_v17 = vsel %vm8439_vm5, -1e+30, %v4430_v52  ;;  %v4714_v7 = vsel %vm8448_vm7, -1e+30, %v4432_v61 }
 0x2b1   : > { %v4204_v20 = vpop.f32.mrb[104].mxu1  ;;  %v4677_v51 = vsel %vm8439_vm5, -1e+30, %v4434_v15 }
 0x2b2   : > { %v4440_v14 = vpop.f32.mrb[108].mxu0  ;;  %v4751_v9 = vadd.f32 %v8464_v24, %v4728_v16  ;;  %v4729_v37 = vmax.f32 %v4691_v45, %v4713_v5  ;;  %v4639_v27 = vmax.f32 %v4623_v8, %v4204_v20  ;;  %v4206_v2 = vpop.f32.mrb[105].mxu1 }
 0x2b3   : > { %v4442_v0 = vpop.f32.mrb[109].mxu0  ;;  %v4208_v58 = vpop.f32.mrb[106].mxu1 }
 0x2b4   : > { %v4444_v48 = vpop.f32.mrb[110].mxu0  ;;  %v4767_v39 = vmax.f32 %v4751_v9, 0.0  ;;  %v4752_v33 = vadd.f32 %v8464_v24, %v4729_v37  ;;  %v4655_v55 = vmax.f32 %v4639_v27, %v4206_v2  ;;  %v4640_v35 = vmax.f32 %v4624_v41, %v4208_v58  ;;  %v4210_v6 = vpop.f32.mrb[107].mxu1 }
 0x2b5   : > { %v4446_v26 = vpop.f32.mrb[111].mxu0 }
 0x2b6   : > { %4783 = vst [vmem:[%s8476_s16 + $0x10] sm:$0xff] %v4767_v39  ;;  %v4768_v1 = vmax.f32 %v4752_v33, 0.0  ;;  %v4692_v47 = vmax.f32 %v4655_v55, %v4676_v17  ;;  %v4656_v8 = vmax.f32 %v4640_v35, %v4210_v6  ;;  %v4678_v33 = vsel %vm8439_vm5, -1e+30, %v4440_v14 }
 0x2b7   : > { %v4716_v55 = vsel %vm8448_vm7, -1e+30, %v4442_v0  ;;  %v4679_v35 = vsel %vm8439_vm5, -1e+30, %v4444_v48  ;;  %v4717_v60 = vsel %vm8448_vm7, -1e+30, %v4446_v26 }
 0x2b8   : > { %4784 = vst [vmem:[%s8476_s16 + $0x18] sm:$0xff] %v4768_v1  ;;  %v4730_v50 = vmax.f32 %v4692_v47, %v4714_v7  ;;  %v4693_v4 = vmax.f32 %v4656_v8, %v4677_v51 }
 0x2b9   : > { %v4214_v44 = vpop.f32.mrb[108].mxu1 }
 0x2ba   : > { %v4450_v41 = vpop.f32.mrb[112].mxu0  ;;  %v4753_v52 = vadd.f32 %v8464_v24, %v4730_v50  ;;  %v4731_v16 = vmax.f32 %v4693_v4, %v4715_v31  ;;  %v4641_v45 = vmax.f32 %v4625_v21, %v4214_v44  ;;  %v4216_v61 = vpop.f32.mrb[109].mxu1 }
 0x2bb   : > { %v4452_v5 = vpop.f32.mrb[113].mxu0  ;;  %v4218_v15 = vpop.f32.mrb[110].mxu1 }
 0x2bc   : > { %v4454_v20 = vpop.f32.mrb[114].mxu0  ;;  %v4769_v9 = vmax.f32 %v4753_v52, 0.0  ;;  %v4754_v37 = vadd.f32 %v8464_v24, %v4731_v16  ;;  %v4657_v27 = vmax.f32 %v4641_v45, %v4216_v61  ;;  %v4642_v2 = vmax.f32 %v8681_v54, %v4218_v15  ;;  %v4220_v58 = vpop.f32.mrb[111].mxu1 }
 0x2bd   : > { %v4456_v39 = vpop.f32.mrb[115].mxu0  ;;  %v4680_v16 = vsel %vm8439_vm5, -1e+30, %v4450_v41  ;;  %v4718_v45 = vsel %vm8448_vm7, -1e+30, %v4452_v5 }
 0x2be   : > { %4785 = vst [vmem:[%s8476_s16 + $0x20] sm:$0xff] %v4769_v9  ;;  %v4770_v57 = vmax.f32 %v4754_v37, 0.0  ;;  %v4694_v40 = vmax.f32 %v4657_v27, %v4678_v33  ;;  %v4658_v21 = vmax.f32 %v4642_v2, %v4220_v58  ;;  %v4681_v61 = vsel %vm8439_vm5, -1e+30, %v4454_v20 }
 0x2bf   : > { %v4719_v53 = vsel %vm8448_vm7, -1e+30, %v4456_v39 }
 0x2c0   : > { %4786 = vst [vmem:[%s8476_s16 + $0x28] sm:$0xff] %v4770_v57  ;;  %v4732_v6 = vmax.f32 %v4694_v40, %v4716_v55  ;;  %v4695_v17 = vmax.f32 %v4658_v21, %v4679_v35 }
 0x2c1   : > { %v4224_v43 = vpop.f32.mrb[112].mxu1 }
 0x2c2   : > { %v4460_v1 = vpop.f32.mrb[116].mxu0  ;;  %v4755_v14 = vadd.f32 %v8464_v24, %v4732_v6  ;;  %v4733_v47 = vmax.f32 %v4695_v17, %v4717_v60  ;;  %v4643_v8 = vmax.f32 %v4627_v42, %v4224_v43  ;;  %v4226_v0 = vpop.f32.mrb[113].mxu1 }
 0x2c3   : > { %v4462_v7 = vpop.f32.mrb[117].mxu0  ;;  %v4228_v48 = vpop.f32.mrb[114].mxu1  ;;  %v4682_v55 = vsel %vm8439_vm5, -1e+30, %v4460_v1 }
 0x2c4   : > { %v4464_v51 = vpop.f32.mrb[118].mxu0  ;;  %v4771_v50 = vmax.f32 %v4755_v14, 0.0  ;;  %v4756_v4 = vadd.f32 %v8464_v24, %v4733_v47  ;;  %v4659_v31 = vmax.f32 %v4643_v8, %v4226_v0  ;;  %v4644_v26 = vmax.f32 %v4628_v49, %v4228_v48  ;;  %v4230_v44 = vpop.f32.mrb[115].mxu1 }
 0x2c5   : > { %v4466_v52 = vpop.f32.mrb[119].mxu0  ;;  %v4720_v35 = vsel %vm8448_vm7, -1e+30, %v4462_v7  ;;  %v4683_v6 = vsel %vm8439_vm5, -1e+30, %v4464_v51 }
 0x2c6   : > { %4787 = vst [vmem:[%s8476_s16 + $0x30] sm:$0xff] %v4771_v50  ;;  %v4772_v28 = vmax.f32 %v4756_v4, 0.0  ;;  %v4696_v13 = vmax.f32 %v4659_v31, %v4680_v16  ;;  %v4660_v42 = vmax.f32 %v4644_v26, %v4230_v44  ;;  %v4721_v10 = vsel %vm8448_vm7, -1e+30, %v4466_v52 }
 0x2c8   : > { %4788 = vst [vmem:[%s8476_s16 + $0x38] sm:$0xff] %v4772_v28  ;;  %v4734_v15 = vmax.f32 %v4696_v13, %v4718_v45  ;;  %v4697_v9 = vmax.f32 %v4660_v42, %v4681_v61 }
 0x2c9   : > { %v4234_v32 = vpop.f32.mrb[116].mxu1 }
 0x2ca   : > { %v4470_v49 = vpop.f32.mrb[120].mxu0  ;;  %v4757_v41 = vadd.f32 %v8464_v24, %v4734_v15  ;;  %v4735_v37 = vmax.f32 %v4697_v9, %v4719_v53  ;;  %v4645_v27 = vmax.f32 %v4629_v29, %v4234_v32  ;;  %v4236_v5 = vpop.f32.mrb[117].mxu1 }
 0x2cb   : > { %v4472_v54 = vpop.f32.mrb[121].mxu0  ;;  %v4238_v20 = vpop.f32.mrb[118].mxu1  ;;  %v4684_v44 = vsel %vm8439_vm5, -1e+30, %v4470_v49  ;;  %v8682_v49 = vmax.f32 %v8433_v38, %v8415_v59 }
 0x2cc   : > { %v4474_v2 = vpop.f32.mrb[122].mxu0  ;;  %v4773_v58 = vmax.f32 %v4757_v41, 0.0  ;;  %v4758_v33 = vadd.f32 %v8464_v24, %v4735_v37  ;;  %v4661_v57 = vmax.f32 %v4645_v27, %v4236_v5  ;;  %v4646_v39 = vmax.f32 %v4630_v36, %v4238_v20  ;;  %v4240_v40 = vpop.f32.mrb[119].mxu1 }
 0x2cd   : > { %v4476_v21 = vpop.f32.mrb[123].mxu0  ;;  %v4722_v52 = vsel %vm8448_vm7, -1e+30, %v4472_v54  ;;  %v4685_v16 = vsel %vm8439_vm5, -1e+30, %v4474_v2 }
 0x2ce   : > { %4789 = vst [vmem:[%s8476_s16 + $0x40] sm:$0xff] %v4773_v58  ;;  %v4774_v25 = vmax.f32 %v4758_v33, 0.0  ;;  %v4698_v23 = vmax.f32 %v4661_v57, %v4682_v55  ;;  %v4662_v29 = vmax.f32 %v4646_v39, %v4240_v40  ;;  %v4723_v63 = vsel %vm8448_vm7, -1e+30, %v4476_v21 }
 0x2d0   : > { %4790 = vst [vmem:[%s8476_s16 + $0x48] sm:$0xff] %v4774_v25  ;;  %v4736_v17 = vmax.f32 %v4698_v23, %v4720_v35  ;;  %v4699_v60 = vmax.f32 %v4662_v29, %v4683_v6 }
 0x2d1   : > { %v4244_v34 = vpop.f32.mrb[120].mxu1 }
 0x2d2   : > { %v4480_v36 = vpop.f32.mrb[124].mxu0  ;;  %v4759_v43 = vadd.f32 %v8464_v24, %v4736_v17  ;;  %v4737_v1 = vmax.f32 %v4699_v60, %v4721_v10  ;;  %v4647_v14 = vmax.f32 %v4631_v3, %v4244_v34  ;;  %v4246_v47 = vpop.f32.mrb[121].mxu1 }
 0x2d3   : > { %v4482_v8 = vpop.f32.mrb[125].mxu0  ;;  %v4248_v0 = vpop.f32.mrb[122].mxu1  ;;  %v4686_v27 = vsel %vm8439_vm5, -1e+30, %v4480_v36 }
 0x2d4   : > { %v4484_v7 = vpop.f32.mrb[126].mxu0  ;;  %v4775_v48 = vmax.f32 %v4759_v43, 0.0  ;;  %v4760_v51 = vadd.f32 %v8464_v24, %v4737_v1  ;;  %v4663_v50 = vmax.f32 %v4647_v14, %v4246_v47  ;;  %v4648_v4 = vmax.f32 %v4632_v56, %v4248_v0  ;;  %v4250_v31 = vpop.f32.mrb[123].mxu1 }
 0x2d5   : > { %v4486_v26 = vpop.f32.mrb[127].mxu0  ;;  %v4724_v5 = vsel %vm8448_vm7, -1e+30, %v4482_v8  ;;  %v4687_v54 = vsel %vm8439_vm5, -1e+30, %v4484_v7 }
 0x2d6   : > { %4791 = vst [vmem:[%s8476_s16 + $0x50] sm:$0xff] %v4775_v48  ;;  %v4776_v30 = vmax.f32 %v4760_v51, 0.0  ;;  %v4700_v22 = vmax.f32 %v4663_v50, %v4684_v44  ;;  %v4664_v3 = vmax.f32 %v4648_v4, %v4250_v31  ;;  %v4725_v38 = vsel %vm8448_vm7, -1e+30, %v4486_v26 }
 0x2d8   : > { %4792 = vst [vmem:[%s8476_s16 + $0x58] sm:$0xff] %v4776_v30  ;;  %v4738_v28 = vmax.f32 %v4700_v22, %v4722_v52  ;;  %v4701_v46 = vmax.f32 %v4664_v3, %v4685_v16 }
 0x2d9   : > { %v4254_v56 = vpop.f32.mrb[124].mxu1 }
 0x2da   : > { %v4761_v13 = vadd.f32 %v8464_v24, %v4738_v28  ;;  %v4739_v42 = vmax.f32 %v4701_v46, %v4723_v63  ;;  %v4649_v45 = vmax.f32 %v4633_v19, %v4254_v56  ;;  %v4256_v61 = vpop.f32.mrb[125].mxu1 }
 0x2db   : > { %v4258_v15 = vpop.f32.mrb[126].mxu1 }
 0x2dc   : > { %v4777_v9 = vmax.f32 %v4761_v13, 0.0  ;;  %v4762_v53 = vadd.f32 %v8464_v24, %v4739_v42  ;;  %v4665_v32 = vmax.f32 %v4649_v45, %v4256_v61  ;;  %v4650_v41 = vmax.f32 %v8682_v49, %v4258_v15  ;;  %v4260_v37 = vpop.f32.mrb[127].mxu1 }
 0x2de   : > { %4793 = vst [vmem:[%s8476_s16 + $0x60] sm:$0xff] %v4777_v9  ;;  %v4778_v18 = vmax.f32 %v4762_v53, 0.0  ;;  %v4702_v11 = vmax.f32 %v4665_v32, %v4686_v27  ;;  %v4666_v19 = vmax.f32 %v4650_v41, %v4260_v37 }
 0x2e0   : > { %4794 = vst [vmem:[%s8476_s16 + $0x68] sm:$0xff] %v4778_v18  ;;  %v4740_v20 = vmax.f32 %v4702_v11, %v4724_v5  ;;  %v4703_v59 = vmax.f32 %v4666_v19, %v4687_v54 }
 0x2e2   : > { %v4763_v2 = vadd.f32 %v8464_v24, %v4740_v20  ;;  %v4741_v58 = vmax.f32 %v4703_v59, %v4725_v38 }
 0x2e4   : > { %v4779_v33 = vmax.f32 %v4763_v2, 0.0  ;;  %v4764_v57 = vadd.f32 %v8464_v24, %v4741_v58 }
 0x2e6   : > { %4795 = vst [vmem:[%s8476_s16 + $0x70] sm:$0xff] %v4779_v33  ;;  %v4780_v39 = vmax.f32 %v4764_v57, 0.0 }
 0x2e8   : > { %4796 = vst [vmem:[%s8476_s16 + $0x78] sm:$0xff] %v4780_v39 }
 0x2e9 PF: > { %s13_s12 = sadd.s32 1, %s6339_s12  }
 0x2ea   : > { %p10_p4 = scmp.ge.s32.totalorder %s13_s12, 6  }
 0x2ec   :  { %12 = sbr.rel (!%p10_p4) target bundleno = 1 (0x1), region = 62 }

</bundles_post_ra>
